<compile_context>
chip_gen: v7x
topology: tpu7x:2x2x1
jax: 0.10.0
libtpu: 0.0.40
codegen_flags: <defaults>
</compile_context>

<pallas_src>
import functools

import jax
import jax.numpy as jnp
from jax.experimental import pallas as pl
from jax.experimental.pallas import tpu as pltpu

IN_SIZE = 27
IN_PAD = 32               # pad contraction dim of the prologue matmul
HIDDEN = 40
HIDDEN_PAD = 128          # pad hidden so each gate block is one 128-lane vreg
OUT_SIZE = 27
OUT_PAD = 128             # lane-dense output store
NUM_LAYERS = 2

# PyTorch gate order is (i, f, g, o); we pack columns as (i, f, o, g) so the three
# sigmoid gates are contiguous (one wide EUP call) and tanh(g) is the last block.
GATE_ORDER = (0, 1, 3, 2)


def lstm_text_kernel(x_ref, wih0_ref, whh0_ref, b0_ref,
                     wih1_ref, whh1_ref, b1_ref, wlin_ref, blin_ref,
                     y_ref, h_ref, c_ref, *, seq, batch):
    HP = HIDDEN_PAD
    B = batch
    bf16 = jnp.bfloat16

    # ---- prologue: layer-0 input contribution for ALL time steps, bias folded in ----
    # (seq*B, IN_PAD) @ (IN_PAD, 4*HP) -> f32; one big MXU pass, no sequential dep.
    xg_all = (jnp.dot(x_ref[...], wih0_ref[...],
                      preferred_element_type=jnp.float32)
              + b0_ref[...])

    # small (B, 4*HP) bias broadcast hoisted out of the loop (4 vregs)
    b1b = jnp.broadcast_to(b1_ref[...], (B, 4 * HP))

    zeros = jnp.zeros((B, HP), jnp.float32)
    h0, c0, h1, c1 = zeros, zeros, zeros, zeros

    def gates(g, c_prev):
        # columns packed as [ i | f | o | g ], each a 128-lane block; pad lanes are 0,
        # so padded h/c lanes stay exactly 0 through the recurrence.
        # sigmoid(x) = 0.5*tanh(0.5*x) + 0.5 -> one EUP tanh (no exp + divide).
        s = 0.5 * jnp.tanh(0.5 * g[:, 0:3 * HP]) + 0.5
        i = s[:, 0 * HP:1 * HP]
        f = s[:, 1 * HP:2 * HP]
        o = s[:, 2 * HP:3 * HP]
        gg = jnp.tanh(g[:, 3 * HP:4 * HP])
        c_new = f * c_prev + i * gg
        h_new = o * jnp.tanh(c_new)
        return h_new, c_new

    # ---- fully unrolled recurrence (seq is small & static) ----
    h1_steps = []
    for t in range(seq):
        # layer-1 recurrent matmul depends only on h1(t-1): independent of layer 0,
        # so the scheduler can overlap it with layer-0's matmul + gate math.
        a1_rec = jnp.dot(h1.astype(bf16), whh1_ref[...],
                         preferred_element_type=jnp.float32)

        # layer 0: only the recurrent matmul remains on the serial path
        g0 = xg_all[t * B:(t + 1) * B, :] + jnp.dot(
            h0.astype(bf16), whh0_ref[...], preferred_element_type=jnp.float32)
        h0, c0 = gates(g0, c0)

        # TODO(synk): inter-layer dropout (p=0.1) is train-mode only and stochastic;
        #             eval-mode semantics (no dropout) are implemented here.

        # layer 1
        g1 = (jnp.dot(h0.astype(bf16), wih1_ref[...],
                      preferred_element_type=jnp.float32)
              + a1_rec + b1b)
        h1, c1 = gates(g1, c1)

        h1_steps.append(h1)   # stays in vregs (seq * 1 vreg total)

    # ---- epilogue: one projection matmul + one lane-dense store for all steps ----
    h1_all = jnp.concatenate(h1_steps, axis=0)                      # (seq*B, HP)
    y_ref[...] = (jnp.dot(h1_all.astype(bf16), wlin_ref[...],
                          preferred_element_type=jnp.float32)
                  + blin_ref[...])

    # final (h, c): lane-dense padded stores; wrapper slices to HIDDEN
    h_ref[0] = h0
    h_ref[1] = h1
    c_ref[0] = c0
    c_ref[1] = c1


# ----------------------------- weight re-layout ------------------------------

def _pack_gate_cols(w):
    """(rows, 4*HIDDEN) PyTorch (i,f,g,o) -> (rows, 4*HIDDEN_PAD) packed (i,f,o,g),
    each gate at a 128-lane offset; padded lanes are zero (keeps padded h/c lanes
    exactly zero through the recurrence)."""
    rows = w.shape[0]
    pad = jnp.zeros((rows, HIDDEN_PAD - HIDDEN), w.dtype)
    blocks = []
    for g in GATE_ORDER:
        blocks.append(w[:, g * HIDDEN:(g + 1) * HIDDEN])
        blocks.append(pad)
    return jnp.concatenate(blocks, axis=1)


def _pad_rows(w, rows_pad):
    return jnp.pad(w, ((0, rows_pad - w.shape[0]), (0, 0)))


def lstm_text_forward(x, params):
    seq, B, _ = x.shape
    HP = HIDDEN_PAD
    B_pad = max(8, ((B + 7) // 8) * 8)     # one f32 sublane tile per step
    bf16 = jnp.bfloat16

    # ---- layout plumbing (host/XLA side, outside the kernel) ----
    # batch padded to 8, input dim padded 27->32, matmul operands cast to bf16.
    x_p = jnp.zeros((seq, B_pad, IN_PAD), jnp.float32).at[:, :B, :IN_SIZE].set(x)
    x_flat = x_p.reshape(seq * B_pad, IN_PAD).astype(bf16)

    wih0_p = _pad_rows(_pack_gate_cols(params["wih0"]), IN_PAD).astype(bf16)   # (32, 4*HP)
    whh0_p = _pad_rows(_pack_gate_cols(params["whh0"]), HP).astype(bf16)       # (HP, 4*HP)
    b0_p = _pack_gate_cols(params["b0"])                                       # (1, 4*HP) f32
    wih1_p = _pad_rows(_pack_gate_cols(params["wih1"]), HP).astype(bf16)       # (HP, 4*HP)
    whh1_p = _pad_rows(_pack_gate_cols(params["whh1"]), HP).astype(bf16)       # (HP, 4*HP)
    b1_p = _pack_gate_cols(params["b1"])                                       # (1, 4*HP) f32
    wlin_p = (jnp.zeros((HP, OUT_PAD), jnp.float32)
              .at[:HIDDEN, :OUT_SIZE].set(params["wlin"])).astype(bf16)        # (HP, 128)
    blin_p = jnp.zeros((1, OUT_PAD), jnp.float32).at[:, :OUT_SIZE].set(params["blin"])

    vmem = pl.BlockSpec(memory_space=pltpu.MemorySpace.VMEM)
    kernel = functools.partial(lstm_text_kernel, seq=seq, batch=B_pad)

    y_pad, h_pad, c_pad = pl.pallas_call(
        kernel,
        out_shape=(
            jax.ShapeDtypeStruct((seq * B_pad, OUT_PAD), jnp.float32),
            jax.ShapeDtypeStruct((NUM_LAYERS, B_pad, HP), jnp.float32),
            jax.ShapeDtypeStruct((NUM_LAYERS, B_pad, HP), jnp.float32),
        ),
        in_specs=[vmem] * 9,
        out_specs=(vmem, vmem, vmem),
    )(x_flat, wih0_p, whh0_p, b0_p, wih1_p, whh1_p, b1_p, wlin_p, blin_p)

    # slice padded batch / padded lanes back to the PyTorch shapes
    y = y_pad.reshape(seq, B_pad, OUT_PAD)[:, :B, :OUT_SIZE]
    h = h_pad[:, :B, :HIDDEN]
    c = c_pad[:, :B, :HIDDEN]
    return y, h, c


# ----------------------------- params & reference ----------------------------

def init_params(key):
    """Deterministic init matching nn.LSTM / nn.Linear shapes (stored pre-transposed:
    (in, 4*H) so every in-kernel matmul is row-major activations @ W)."""
    k = 1.0 / jnp.sqrt(jnp.float32(HIDDEN))
    keys = jax.random.split(key, 12)
    u = lambda kk, shape: jax.random.uniform(kk, shape, jnp.float32, -k, k)
    H4 = 4 * HIDDEN
    return {
        "wih0": u(keys[0], (IN_SIZE, H4)),
        "whh0": u(keys[1], (HIDDEN, H4)),
        "b0":   (u(keys[2], (1, H4)) + u(keys[3], (1, H4))),   # b_ih_l0 + b_hh_l0
        "wih1": u(keys[4], (HIDDEN, H4)),
        "whh1": u(keys[5], (HIDDEN, H4)),
        "b1":   (u(keys[6], (1, H4)) + u(keys[7], (1, H4))),   # b_ih_l1 + b_hh_l1
        "wlin": u(keys[8], (HIDDEN, OUT_SIZE)),
        "blin": u(keys[9], (1, OUT_SIZE)),
    }


def ref_forward(x, p):
    """Pure-JAX f32 reference of the PyTorch LSTMText forward (eval semantics)."""
    seq, B, _ = x.shape
    H = HIDDEN
    h = [jnp.zeros((B, H), jnp.float32) for _ in range(NUM_LAYERS)]
    c = [jnp.zeros((B, H), jnp.float32) for _ in range(NUM_LAYERS)]
    ys = []
    for t in range(seq):
        inp = x[t]
        for l in range(NUM_LAYERS):
            g = inp @ p[f"wih{l}"] + h[l] @ p[f"whh{l}"] + p[f"b{l}"]
            i = jax.nn.sigmoid(g[:, 0 * H:1 * H])
            f = jax.nn.sigmoid(g[:, 1 * H:2 * H])
            gg = jnp.tanh(g[:, 2 * H:3 * H])
            o = jax.nn.sigmoid(g[:, 3 * H:4 * H])
            c[l] = f * c[l] + i * gg
            h[l] = o * jnp.tanh(c[l])
            inp = h[l]
        ys.append(inp @ p["wlin"] + p["blin"])
    return jnp.stack(ys, 0), jnp.stack(h, 0), jnp.stack(c, 0)


if __name__ == "__main__":
    key = jax.random.PRNGKey(0)
    k_x, k_p = jax.random.split(key)

    SEQ, BATCH = 8, 2
    x = jax.random.normal(k_x, (SEQ, BATCH, IN_SIZE), jnp.float32)
    params = init_params(k_p)

    y, h, c = jax.jit(lstm_text_forward)(x, params)
    jax.block_until_ready((y, h, c))

    y_ref, h_ref, c_ref = ref_forward(x, params)

    assert y.shape == (SEQ, BATCH, OUT_SIZE)
    assert h.shape == (NUM_LAYERS, BATCH, HIDDEN)
    assert c.shape == (NUM_LAYERS, BATCH, HIDDEN)
    # bf16 MXU operands (f32 accumulation / f32 state) vs a pure-f32 reference:
    # use a bf16-appropriate tolerance.
    assert jnp.allclose(y, y_ref, atol=1e-2, rtol=1e-2)
    assert jnp.allclose(h, h_ref, atol=1e-2, rtol=1e-2)
    assert jnp.allclose(c, c_ref, atol=1e-2, rtol=1e-2)

    print("KERNEL_OK")
</pallas_src>

<mosaic_0001>
module attributes {stable_mosaic.version = 11 : i64} {
  func.func @lstm_text_kernel(%arg0: memref<64x32xbf16, #tpu.memory_space<vmem>>, %arg1: memref<32x512xbf16, #tpu.memory_space<vmem>>, %arg2: memref<128x512xbf16, #tpu.memory_space<vmem>>, %arg3: memref<1x512xf32, #tpu.memory_space<vmem>>, %arg4: memref<128x512xbf16, #tpu.memory_space<vmem>>, %arg5: memref<128x512xbf16, #tpu.memory_space<vmem>>, %arg6: memref<1x512xf32, #tpu.memory_space<vmem>>, %arg7: memref<128x128xbf16, #tpu.memory_space<vmem>>, %arg8: memref<1x128xf32, #tpu.memory_space<vmem>>, %arg9: memref<64x128xf32, #tpu.memory_space<vmem>>, %arg10: memref<2x8x128xf32, #tpu.memory_space<vmem>>, %arg11: memref<2x8x128xf32, #tpu.memory_space<vmem>>) attributes {dimension_semantics = [], scalar_prefetch = 0 : i64, scratch_operands = 0 : i64, tpu.core_type = #tpu.core_type<tc>} {
    %c0 = arith.constant 0 : index
    %c0_0 = arith.constant 0 : index
    %0 = vector.load %arg0[%c0, %c0_0] : memref<64x32xbf16, #tpu.memory_space<vmem>>, vector<64x32xbf16>
    %c0_1 = arith.constant 0 : index
    %c0_2 = arith.constant 0 : index
    %1 = vector.load %arg1[%c0_1, %c0_2] : memref<32x512xbf16, #tpu.memory_space<vmem>>, vector<32x512xbf16>
    %cst = arith.constant dense<0.000000e+00> : vector<64x512xf32>
    %2 = tpu.matmul %0, %1, %cst {dimension_numbers = #tpu.dot_dimension_numbers<[1], [0], [0], [1], [0, 0, 1, 1], [], []>} : vector<64x32xbf16>, vector<32x512xbf16>, vector<64x512xf32> -> vector<64x512xf32>
    %c0_3 = arith.constant 0 : index
    %c0_4 = arith.constant 0 : index
    %3 = vector.load %arg3[%c0_3, %c0_4] : memref<1x512xf32, #tpu.memory_space<vmem>>, vector<1x512xf32>
    %4 = vector.broadcast %3 : vector<1x512xf32> to vector<64x512xf32>
    %5 = arith.addf %2, %4 : vector<64x512xf32>
    %c0_5 = arith.constant 0 : index
    %c0_6 = arith.constant 0 : index
    %6 = vector.load %arg6[%c0_5, %c0_6] : memref<1x512xf32, #tpu.memory_space<vmem>>, vector<1x512xf32>
    %7 = vector.shape_cast %6 : vector<1x512xf32> to vector<1x512xf32>
    %8 = vector.broadcast %7 : vector<1x512xf32> to vector<8x512xf32>
    %cst_7 = arith.constant 0.000000e+00 : f32
    %9 = vector.broadcast %cst_7 : f32 to vector<8x128xf32>
    %10 = arith.truncf %9 : vector<8x128xf32> to vector<8x128xbf16>
    %c0_8 = arith.constant 0 : index
    %c0_9 = arith.constant 0 : index
    %11 = vector.load %arg5[%c0_8, %c0_9] : memref<128x512xbf16, #tpu.memory_space<vmem>>, vector<128x512xbf16>
    %cst_10 = arith.constant dense<0.000000e+00> : vector<8x512xf32>
    %12 = tpu.matmul %10, %11, %cst_10 {dimension_numbers = #tpu.dot_dimension_numbers<[1], [0], [0], [1], [0, 0, 1, 1], [], []>} : vector<8x128xbf16>, vector<128x512xbf16>, vector<8x512xf32> -> vector<8x512xf32>
    %13 = vector.extract_strided_slice %5 {offsets = [0, 0], sizes = [8, 512], strides = [1, 1]} : vector<64x512xf32> to vector<8x512xf32>
    %14 = arith.truncf %9 : vector<8x128xf32> to vector<8x128xbf16>
    %c0_11 = arith.constant 0 : index
    %c0_12 = arith.constant 0 : index
    %15 = vector.load %arg2[%c0_11, %c0_12] : memref<128x512xbf16, #tpu.memory_space<vmem>>, vector<128x512xbf16>
    %cst_13 = arith.constant dense<0.000000e+00> : vector<8x512xf32>
    %16 = tpu.matmul %14, %15, %cst_13 {dimension_numbers = #tpu.dot_dimension_numbers<[1], [0], [0], [1], [0, 0, 1, 1], [], []>} : vector<8x128xbf16>, vector<128x512xbf16>, vector<8x512xf32> -> vector<8x512xf32>
    %17 = arith.addf %13, %16 : vector<8x512xf32>
    %18 = vector.extract_strided_slice %17 {offsets = [0, 0], sizes = [8, 384], strides = [1, 1]} : vector<8x512xf32> to vector<8x384xf32>
    %cst_14 = arith.constant 5.000000e-01 : f32
    %19 = vector.broadcast %cst_14 : f32 to vector<8x384xf32>
    %20 = arith.mulf %19, %18 : vector<8x384xf32>
    %21 = math.tanh %20 : vector<8x384xf32>
    %cst_15 = arith.constant 5.000000e-01 : f32
    %22 = vector.broadcast %cst_15 : f32 to vector<8x384xf32>
    %23 = arith.mulf %22, %21 : vector<8x384xf32>
    %cst_16 = arith.constant 5.000000e-01 : f32
    %24 = vector.broadcast %cst_16 : f32 to vector<8x384xf32>
    %25 = arith.addf %23, %24 : vector<8x384xf32>
    %26 = vector.extract_strided_slice %25 {offsets = [0, 0], sizes = [8, 128], strides = [1, 1]} : vector<8x384xf32> to vector<8x128xf32>
    %27 = vector.extract_strided_slice %25 {offsets = [0, 128], sizes = [8, 128], strides = [1, 1]} : vector<8x384xf32> to vector<8x128xf32>
    %28 = vector.extract_strided_slice %25 {offsets = [0, 256], sizes = [8, 128], strides = [1, 1]} : vector<8x384xf32> to vector<8x128xf32>
    %29 = vector.extract_strided_slice %17 {offsets = [0, 384], sizes = [8, 128], strides = [1, 1]} : vector<8x512xf32> to vector<8x128xf32>
    %30 = math.tanh %29 : vector<8x128xf32>
    %31 = arith.mulf %27, %9 : vector<8x128xf32>
    %32 = arith.mulf %26, %30 : vector<8x128xf32>
    %33 = arith.addf %31, %32 : vector<8x128xf32>
    %34 = math.tanh %33 : vector<8x128xf32>
    %35 = arith.mulf %28, %34 : vector<8x128xf32>
    %36 = arith.truncf %35 : vector<8x128xf32> to vector<8x128xbf16>
    %c0_17 = arith.constant 0 : index
    %c0_18 = arith.constant 0 : index
    %37 = vector.load %arg4[%c0_17, %c0_18] : memref<128x512xbf16, #tpu.memory_space<vmem>>, vector<128x512xbf16>
    %cst_19 = arith.constant dense<0.000000e+00> : vector<8x512xf32>
    %38 = tpu.matmul %36, %37, %cst_19 {dimension_numbers = #tpu.dot_dimension_numbers<[1], [0], [0], [1], [0, 0, 1, 1], [], []>} : vector<8x128xbf16>, vector<128x512xbf16>, vector<8x512xf32> -> vector<8x512xf32>
    %39 = arith.addf %38, %12 : vector<8x512xf32>
    %40 = arith.addf %39, %8 : vector<8x512xf32>
    %41 = vector.extract_strided_slice %40 {offsets = [0, 0], sizes = [8, 384], strides = [1, 1]} : vector<8x512xf32> to vector<8x384xf32>
    %cst_20 = arith.constant 5.000000e-01 : f32
    %42 = vector.broadcast %cst_20 : f32 to vector<8x384xf32>
    %43 = arith.mulf %42, %41 : vector<8x384xf32>
    %44 = math.tanh %43 : vector<8x384xf32>
    %cst_21 = arith.constant 5.000000e-01 : f32
    %45 = vector.broadcast %cst_21 : f32 to vector<8x384xf32>
    %46 = arith.mulf %45, %44 : vector<8x384xf32>
    %cst_22 = arith.constant 5.000000e-01 : f32
    %47 = vector.broadcast %cst_22 : f32 to vector<8x384xf32>
    %48 = arith.addf %46, %47 : vector<8x384xf32>
    %49 = vector.extract_strided_slice %48 {offsets = [0, 0], sizes = [8, 128], strides = [1, 1]} : vector<8x384xf32> to vector<8x128xf32>
    %50 = vector.extract_strided_slice %48 {offsets = [0, 128], sizes = [8, 128], strides = [1, 1]} : vector<8x384xf32> to vector<8x128xf32>
    %51 = vector.extract_strided_slice %48 {offsets = [0, 256], sizes = [8, 128], strides = [1, 1]} : vector<8x384xf32> to vector<8x128xf32>
    %52 = vector.extract_strided_slice %40 {offsets = [0, 384], sizes = [8, 128], strides = [1, 1]} : vector<8x512xf32> to vector<8x128xf32>
    %53 = math.tanh %52 : vector<8x128xf32>
    %54 = arith.mulf %50, %9 : vector<8x128xf32>
    %55 = arith.mulf %49, %53 : vector<8x128xf32>
    %56 = arith.addf %54, %55 : vector<8x128xf32>
    %57 = math.tanh %56 : vector<8x128xf32>
    %58 = arith.mulf %51, %57 : vector<8x128xf32>
    %59 = arith.truncf %58 : vector<8x128xf32> to vector<8x128xbf16>
    %c0_23 = arith.constant 0 : index
    %c0_24 = arith.constant 0 : index
    %60 = vector.load %arg5[%c0_23, %c0_24] : memref<128x512xbf16, #tpu.memory_space<vmem>>, vector<128x512xbf16>
    %cst_25 = arith.constant dense<0.000000e+00> : vector<8x512xf32>
    %61 = tpu.matmul %59, %60, %cst_25 {dimension_numbers = #tpu.dot_dimension_numbers<[1], [0], [0], [1], [0, 0, 1, 1], [], []>} : vector<8x128xbf16>, vector<128x512xbf16>, vector<8x512xf32> -> vector<8x512xf32>
    %62 = vector.extract_strided_slice %5 {offsets = [8, 0], sizes = [8, 512], strides = [1, 1]} : vector<64x512xf32> to vector<8x512xf32>
    %63 = arith.truncf %35 : vector<8x128xf32> to vector<8x128xbf16>
    %c0_26 = arith.constant 0 : index
    %c0_27 = arith.constant 0 : index
    %64 = vector.load %arg2[%c0_26, %c0_27] : memref<128x512xbf16, #tpu.memory_space<vmem>>, vector<128x512xbf16>
    %cst_28 = arith.constant dense<0.000000e+00> : vector<8x512xf32>
    %65 = tpu.matmul %63, %64, %cst_28 {dimension_numbers = #tpu.dot_dimension_numbers<[1], [0], [0], [1], [0, 0, 1, 1], [], []>} : vector<8x128xbf16>, vector<128x512xbf16>, vector<8x512xf32> -> vector<8x512xf32>
    %66 = arith.addf %62, %65 : vector<8x512xf32>
    %67 = vector.extract_strided_slice %66 {offsets = [0, 0], sizes = [8, 384], strides = [1, 1]} : vector<8x512xf32> to vector<8x384xf32>
    %cst_29 = arith.constant 5.000000e-01 : f32
    %68 = vector.broadcast %cst_29 : f32 to vector<8x384xf32>
    %69 = arith.mulf %68, %67 : vector<8x384xf32>
    %70 = math.tanh %69 : vector<8x384xf32>
    %cst_30 = arith.constant 5.000000e-01 : f32
    %71 = vector.broadcast %cst_30 : f32 to vector<8x384xf32>
    %72 = arith.mulf %71, %70 : vector<8x384xf32>
    %cst_31 = arith.constant 5.000000e-01 : f32
    %73 = vector.broadcast %cst_31 : f32 to vector<8x384xf32>
    %74 = arith.addf %72, %73 : vector<8x384xf32>
    %75 = vector.extract_strided_slice %74 {offsets = [0, 0], sizes = [8, 128], strides = [1, 1]} : vector<8x384xf32> to vector<8x128xf32>
    %76 = vector.extract_strided_slice %74 {offsets = [0, 128], sizes = [8, 128], strides = [1, 1]} : vector<8x384xf32> to vector<8x128xf32>
    %77 = vector.extract_strided_slice %74 {offsets = [0, 256], sizes = [8, 128], strides = [1, 1]} : vector<8x384xf32> to vector<8x128xf32>
    %78 = vector.extract_strided_slice %66 {offsets = [0, 384], sizes = [8, 128], strides = [1, 1]} : vector<8x512xf32> to vector<8x128xf32>
    %79 = math.tanh %78 : vector<8x128xf32>
    %80 = arith.mulf %76, %33 : vector<8x128xf32>
    %81 = arith.mulf %75, %79 : vector<8x128xf32>
    %82 = arith.addf %80, %81 : vector<8x128xf32>
    %83 = math.tanh %82 : vector<8x128xf32>
    %84 = arith.mulf %77, %83 : vector<8x128xf32>
    %85 = arith.truncf %84 : vector<8x128xf32> to vector<8x128xbf16>
    %c0_32 = arith.constant 0 : index
    %c0_33 = arith.constant 0 : index
    %86 = vector.load %arg4[%c0_32, %c0_33] : memref<128x512xbf16, #tpu.memory_space<vmem>>, vector<128x512xbf16>
    %cst_34 = arith.constant dense<0.000000e+00> : vector<8x512xf32>
    %87 = tpu.matmul %85, %86, %cst_34 {dimension_numbers = #tpu.dot_dimension_numbers<[1], [0], [0], [1], [0, 0, 1, 1], [], []>} : vector<8x128xbf16>, vector<128x512xbf16>, vector<8x512xf32> -> vector<8x512xf32>
    %88 = arith.addf %87, %61 : vector<8x512xf32>
    %89 = arith.addf %88, %8 : vector<8x512xf32>
    %90 = vector.extract_strided_slice %89 {offsets = [0, 0], sizes = [8, 384], strides = [1, 1]} : vector<8x512xf32> to vector<8x384xf32>
    %cst_35 = arith.constant 5.000000e-01 : f32
    %91 = vector.broadcast %cst_35 : f32 to vector<8x384xf32>
    %92 = arith.mulf %91, %90 : vector<8x384xf32>
    %93 = math.tanh %92 : vector<8x384xf32>
    %cst_36 = arith.constant 5.000000e-01 : f32
    %94 = vector.broadcast %cst_36 : f32 to vector<8x384xf32>
    %95 = arith.mulf %94, %93 : vector<8x384xf32>
    %cst_37 = arith.constant 5.000000e-01 : f32
    %96 = vector.broadcast %cst_37 : f32 to vector<8x384xf32>
    %97 = arith.addf %95, %96 : vector<8x384xf32>
    %98 = vector.extract_strided_slice %97 {offsets = [0, 0], sizes = [8, 128], strides = [1, 1]} : vector<8x384xf32> to vector<8x128xf32>
    %99 = vector.extract_strided_slice %97 {offsets = [0, 128], sizes = [8, 128], strides = [1, 1]} : vector<8x384xf32> to vector<8x128xf32>
    %100 = vector.extract_strided_slice %97 {offsets = [0, 256], sizes = [8, 128], strides = [1, 1]} : vector<8x384xf32> to vector<8x128xf32>
    %101 = vector.extract_strided_slice %89 {offsets = [0, 384], sizes = [8, 128], strides = [1, 1]} : vector<8x512xf32> to vector<8x128xf32>
    %102 = math.tanh %101 : vector<8x128xf32>
    %103 = arith.mulf %99, %56 : vector<8x128xf32>
    %104 = arith.mulf %98, %102 : vector<8x128xf32>
    %105 = arith.addf %103, %104 : vector<8x128xf32>
    %106 = math.tanh %105 : vector<8x128xf32>
    %107 = arith.mulf %100, %106 : vector<8x128xf32>
    %108 = arith.truncf %107 : vector<8x128xf32> to vector<8x128xbf16>
    %c0_38 = arith.constant 0 : index
    %c0_39 = arith.constant 0 : index
    %109 = vector.load %arg5[%c0_38, %c0_39] : memref<128x512xbf16, #tpu.memory_space<vmem>>, vector<128x512xbf16>
    %cst_40 = arith.constant dense<0.000000e+00> : vector<8x512xf32>
    %110 = tpu.matmul %108, %109, %cst_40 {dimension_numbers = #tpu.dot_dimension_numbers<[1], [0], [0], [1], [0, 0, 1, 1], [], []>} : vector<8x128xbf16>, vector<128x512xbf16>, vector<8x512xf32> -> vector<8x512xf32>
    %111 = vector.extract_strided_slice %5 {offsets = [16, 0], sizes = [8, 512], strides = [1, 1]} : vector<64x512xf32> to vector<8x512xf32>
    %112 = arith.truncf %84 : vector<8x128xf32> to vector<8x128xbf16>
    %c0_41 = arith.constant 0 : index
    %c0_42 = arith.constant 0 : index
    %113 = vector.load %arg2[%c0_41, %c0_42] : memref<128x512xbf16, #tpu.memory_space<vmem>>, vector<128x512xbf16>
    %cst_43 = arith.constant dense<0.000000e+00> : vector<8x512xf32>
    %114 = tpu.matmul %112, %113, %cst_43 {dimension_numbers = #tpu.dot_dimension_numbers<[1], [0], [0], [1], [0, 0, 1, 1], [], []>} : vector<8x128xbf16>, vector<128x512xbf16>, vector<8x512xf32> -> vector<8x512xf32>
    %115 = arith.addf %111, %114 : vector<8x512xf32>
    %116 = vector.extract_strided_slice %115 {offsets = [0, 0], sizes = [8, 384], strides = [1, 1]} : vector<8x512xf32> to vector<8x384xf32>
    %cst_44 = arith.constant 5.000000e-01 : f32
    %117 = vector.broadcast %cst_44 : f32 to vector<8x384xf32>
    %118 = arith.mulf %117, %116 : vector<8x384xf32>
    %119 = math.tanh %118 : vector<8x384xf32>
    %cst_45 = arith.constant 5.000000e-01 : f32
    %120 = vector.broadcast %cst_45 : f32 to vector<8x384xf32>
    %121 = arith.mulf %120, %119 : vector<8x384xf32>
    %cst_46 = arith.constant 5.000000e-01 : f32
    %122 = vector.broadcast %cst_46 : f32 to vector<8x384xf32>
    %123 = arith.addf %121, %122 : vector<8x384xf32>
    %124 = vector.extract_strided_slice %123 {offsets = [0, 0], sizes = [8, 128], strides = [1, 1]} : vector<8x384xf32> to vector<8x128xf32>
    %125 = vector.extract_strided_slice %123 {offsets = [0, 128], sizes = [8, 128], strides = [1, 1]} : vector<8x384xf32> to vector<8x128xf32>
    %126 = vector.extract_strided_slice %123 {offsets = [0, 256], sizes = [8, 128], strides = [1, 1]} : vector<8x384xf32> to vector<8x128xf32>
    %127 = vector.extract_strided_slice %115 {offsets = [0, 384], sizes = [8, 128], strides = [1, 1]} : vector<8x512xf32> to vector<8x128xf32>
    %128 = math.tanh %127 : vector<8x128xf32>
    %129 = arith.mulf %125, %82 : vector<8x128xf32>
    %130 = arith.mulf %124, %128 : vector<8x128xf32>
    %131 = arith.addf %129, %130 : vector<8x128xf32>
    %132 = math.tanh %131 : vector<8x128xf32>
    %133 = arith.mulf %126, %132 : vector<8x128xf32>
    %134 = arith.truncf %133 : vector<8x128xf32> to vector<8x128xbf16>
    %c0_47 = arith.constant 0 : index
    %c0_48 = arith.constant 0 : index
    %135 = vector.load %arg4[%c0_47, %c0_48] : memref<128x512xbf16, #tpu.memory_space<vmem>>, vector<128x512xbf16>
    %cst_49 = arith.constant dense<0.000000e+00> : vector<8x512xf32>
    %136 = tpu.matmul %134, %135, %cst_49 {dimension_numbers = #tpu.dot_dimension_numbers<[1], [0], [0], [1], [0, 0, 1, 1], [], []>} : vector<8x128xbf16>, vector<128x512xbf16>, vector<8x512xf32> -> vector<8x512xf32>
    %137 = arith.addf %136, %110 : vector<8x512xf32>
    %138 = arith.addf %137, %8 : vector<8x512xf32>
    %139 = vector.extract_strided_slice %138 {offsets = [0, 0], sizes = [8, 384], strides = [1, 1]} : vector<8x512xf32> to vector<8x384xf32>
    %cst_50 = arith.constant 5.000000e-01 : f32
    %140 = vector.broadcast %cst_50 : f32 to vector<8x384xf32>
    %141 = arith.mulf %140, %139 : vector<8x384xf32>
    %142 = math.tanh %141 : vector<8x384xf32>
    %cst_51 = arith.constant 5.000000e-01 : f32
    %143 = vector.broadcast %cst_51 : f32 to vector<8x384xf32>
    %144 = arith.mulf %143, %142 : vector<8x384xf32>
    %cst_52 = arith.constant 5.000000e-01 : f32
    %145 = vector.broadcast %cst_52 : f32 to vector<8x384xf32>
    %146 = arith.addf %144, %145 : vector<8x384xf32>
    %147 = vector.extract_strided_slice %146 {offsets = [0, 0], sizes = [8, 128], strides = [1, 1]} : vector<8x384xf32> to vector<8x128xf32>
    %148 = vector.extract_strided_slice %146 {offsets = [0, 128], sizes = [8, 128], strides = [1, 1]} : vector<8x384xf32> to vector<8x128xf32>
    %149 = vector.extract_strided_slice %146 {offsets = [0, 256], sizes = [8, 128], strides = [1, 1]} : vector<8x384xf32> to vector<8x128xf32>
    %150 = vector.extract_strided_slice %138 {offsets = [0, 384], sizes = [8, 128], strides = [1, 1]} : vector<8x512xf32> to vector<8x128xf32>
    %151 = math.tanh %150 : vector<8x128xf32>
    %152 = arith.mulf %148, %105 : vector<8x128xf32>
    %153 = arith.mulf %147, %151 : vector<8x128xf32>
    %154 = arith.addf %152, %153 : vector<8x128xf32>
    %155 = math.tanh %154 : vector<8x128xf32>
    %156 = arith.mulf %149, %155 : vector<8x128xf32>
    %157 = arith.truncf %156 : vector<8x128xf32> to vector<8x128xbf16>
    %c0_53 = arith.constant 0 : index
    %c0_54 = arith.constant 0 : index
    %158 = vector.load %arg5[%c0_53, %c0_54] : memref<128x512xbf16, #tpu.memory_space<vmem>>, vector<128x512xbf16>
    %cst_55 = arith.constant dense<0.000000e+00> : vector<8x512xf32>
    %159 = tpu.matmul %157, %158, %cst_55 {dimension_numbers = #tpu.dot_dimension_numbers<[1], [0], [0], [1], [0, 0, 1, 1], [], []>} : vector<8x128xbf16>, vector<128x512xbf16>, vector<8x512xf32> -> vector<8x512xf32>
    %160 = vector.extract_strided_slice %5 {offsets = [24, 0], sizes = [8, 512], strides = [1, 1]} : vector<64x512xf32> to vector<8x512xf32>
    %161 = arith.truncf %133 : vector<8x128xf32> to vector<8x128xbf16>
    %c0_56 = arith.constant 0 : index
    %c0_57 = arith.constant 0 : index
    %162 = vector.load %arg2[%c0_56, %c0_57] : memref<128x512xbf16, #tpu.memory_space<vmem>>, vector<128x512xbf16>
    %cst_58 = arith.constant dense<0.000000e+00> : vector<8x512xf32>
    %163 = tpu.matmul %161, %162, %cst_58 {dimension_numbers = #tpu.dot_dimension_numbers<[1], [0], [0], [1], [0, 0, 1, 1], [], []>} : vector<8x128xbf16>, vector<128x512xbf16>, vector<8x512xf32> -> vector<8x512xf32>
    %164 = arith.addf %160, %163 : vector<8x512xf32>
    %165 = vector.extract_strided_slice %164 {offsets = [0, 0], sizes = [8, 384], strides = [1, 1]} : vector<8x512xf32> to vector<8x384xf32>
    %cst_59 = arith.constant 5.000000e-01 : f32
    %166 = vector.broadcast %cst_59 : f32 to vector<8x384xf32>
    %167 = arith.mulf %166, %165 : vector<8x384xf32>
    %168 = math.tanh %167 : vector<8x384xf32>
    %cst_60 = arith.constant 5.000000e-01 : f32
    %169 = vector.broadcast %cst_60 : f32 to vector<8x384xf32>
    %170 = arith.mulf %169, %168 : vector<8x384xf32>
    %cst_61 = arith.constant 5.000000e-01 : f32
    %171 = vector.broadcast %cst_61 : f32 to vector<8x384xf32>
    %172 = arith.addf %170, %171 : vector<8x384xf32>
    %173 = vector.extract_strided_slice %172 {offsets = [0, 0], sizes = [8, 128], strides = [1, 1]} : vector<8x384xf32> to vector<8x128xf32>
    %174 = vector.extract_strided_slice %172 {offsets = [0, 128], sizes = [8, 128], strides = [1, 1]} : vector<8x384xf32> to vector<8x128xf32>
    %175 = vector.extract_strided_slice %172 {offsets = [0, 256], sizes = [8, 128], strides = [1, 1]} : vector<8x384xf32> to vector<8x128xf32>
    %176 = vector.extract_strided_slice %164 {offsets = [0, 384], sizes = [8, 128], strides = [1, 1]} : vector<8x512xf32> to vector<8x128xf32>
    %177 = math.tanh %176 : vector<8x128xf32>
    %178 = arith.mulf %174, %131 : vector<8x128xf32>
    %179 = arith.mulf %173, %177 : vector<8x128xf32>
    %180 = arith.addf %178, %179 : vector<8x128xf32>
    %181 = math.tanh %180 : vector<8x128xf32>
    %182 = arith.mulf %175, %181 : vector<8x128xf32>
    %183 = arith.truncf %182 : vector<8x128xf32> to vector<8x128xbf16>
    %c0_62 = arith.constant 0 : index
    %c0_63 = arith.constant 0 : index
    %184 = vector.load %arg4[%c0_62, %c0_63] : memref<128x512xbf16, #tpu.memory_space<vmem>>, vector<128x512xbf16>
    %cst_64 = arith.constant dense<0.000000e+00> : vector<8x512xf32>
    %185 = tpu.matmul %183, %184, %cst_64 {dimension_numbers = #tpu.dot_dimension_numbers<[1], [0], [0], [1], [0, 0, 1, 1], [], []>} : vector<8x128xbf16>, vector<128x512xbf16>, vector<8x512xf32> -> vector<8x512xf32>
    %186 = arith.addf %185, %159 : vector<8x512xf32>
    %187 = arith.addf %186, %8 : vector<8x512xf32>
    %188 = vector.extract_strided_slice %187 {offsets = [0, 0], sizes = [8, 384], strides = [1, 1]} : vector<8x512xf32> to vector<8x384xf32>
    %cst_65 = arith.constant 5.000000e-01 : f32
    %189 = vector.broadcast %cst_65 : f32 to vector<8x384xf32>
    %190 = arith.mulf %189, %188 : vector<8x384xf32>
    %191 = math.tanh %190 : vector<8x384xf32>
    %cst_66 = arith.constant 5.000000e-01 : f32
    %192 = vector.broadcast %cst_66 : f32 to vector<8x384xf32>
    %193 = arith.mulf %192, %191 : vector<8x384xf32>
    %cst_67 = arith.constant 5.000000e-01 : f32
    %194 = vector.broadcast %cst_67 : f32 to vector<8x384xf32>
    %195 = arith.addf %193, %194 : vector<8x384xf32>
    %196 = vector.extract_strided_slice %195 {offsets = [0, 0], sizes = [8, 128], strides = [1, 1]} : vector<8x384xf32> to vector<8x128xf32>
    %197 = vector.extract_strided_slice %195 {offsets = [0, 128], sizes = [8, 128], strides = [1, 1]} : vector<8x384xf32> to vector<8x128xf32>
    %198 = vector.extract_strided_slice %195 {offsets = [0, 256], sizes = [8, 128], strides = [1, 1]} : vector<8x384xf32> to vector<8x128xf32>
    %199 = vector.extract_strided_slice %187 {offsets = [0, 384], sizes = [8, 128], strides = [1, 1]} : vector<8x512xf32> to vector<8x128xf32>
    %200 = math.tanh %199 : vector<8x128xf32>
    %201 = arith.mulf %197, %154 : vector<8x128xf32>
    %202 = arith.mulf %196, %200 : vector<8x128xf32>
    %203 = arith.addf %201, %202 : vector<8x128xf32>
    %204 = math.tanh %203 : vector<8x128xf32>
    %205 = arith.mulf %198, %204 : vector<8x128xf32>
    %206 = arith.truncf %205 : vector<8x128xf32> to vector<8x128xbf16>
    %c0_68 = arith.constant 0 : index
    %c0_69 = arith.constant 0 : index
    %207 = vector.load %arg5[%c0_68, %c0_69] : memref<128x512xbf16, #tpu.memory_space<vmem>>, vector<128x512xbf16>
    %cst_70 = arith.constant dense<0.000000e+00> : vector<8x512xf32>
    %208 = tpu.matmul %206, %207, %cst_70 {dimension_numbers = #tpu.dot_dimension_numbers<[1], [0], [0], [1], [0, 0, 1, 1], [], []>} : vector<8x128xbf16>, vector<128x512xbf16>, vector<8x512xf32> -> vector<8x512xf32>
    %209 = vector.extract_strided_slice %5 {offsets = [32, 0], sizes = [8, 512], strides = [1, 1]} : vector<64x512xf32> to vector<8x512xf32>
    %210 = arith.truncf %182 : vector<8x128xf32> to vector<8x128xbf16>
    %c0_71 = arith.constant 0 : index
    %c0_72 = arith.constant 0 : index
    %211 = vector.load %arg2[%c0_71, %c0_72] : memref<128x512xbf16, #tpu.memory_space<vmem>>, vector<128x512xbf16>
    %cst_73 = arith.constant dense<0.000000e+00> : vector<8x512xf32>
    %212 = tpu.matmul %210, %211, %cst_73 {dimension_numbers = #tpu.dot_dimension_numbers<[1], [0], [0], [1], [0, 0, 1, 1], [], []>} : vector<8x128xbf16>, vector<128x512xbf16>, vector<8x512xf32> -> vector<8x512xf32>
    %213 = arith.addf %209, %212 : vector<8x512xf32>
    %214 = vector.extract_strided_slice %213 {offsets = [0, 0], sizes = [8, 384], strides = [1, 1]} : vector<8x512xf32> to vector<8x384xf32>
    %cst_74 = arith.constant 5.000000e-01 : f32
    %215 = vector.broadcast %cst_74 : f32 to vector<8x384xf32>
    %216 = arith.mulf %215, %214 : vector<8x384xf32>
    %217 = math.tanh %216 : vector<8x384xf32>
    %cst_75 = arith.constant 5.000000e-01 : f32
    %218 = vector.broadcast %cst_75 : f32 to vector<8x384xf32>
    %219 = arith.mulf %218, %217 : vector<8x384xf32>
    %cst_76 = arith.constant 5.000000e-01 : f32
    %220 = vector.broadcast %cst_76 : f32 to vector<8x384xf32>
    %221 = arith.addf %219, %220 : vector<8x384xf32>
    %222 = vector.extract_strided_slice %221 {offsets = [0, 0], sizes = [8, 128], strides = [1, 1]} : vector<8x384xf32> to vector<8x128xf32>
    %223 = vector.extract_strided_slice %221 {offsets = [0, 128], sizes = [8, 128], strides = [1, 1]} : vector<8x384xf32> to vector<8x128xf32>
    %224 = vector.extract_strided_slice %221 {offsets = [0, 256], sizes = [8, 128], strides = [1, 1]} : vector<8x384xf32> to vector<8x128xf32>
    %225 = vector.extract_strided_slice %213 {offsets = [0, 384], sizes = [8, 128], strides = [1, 1]} : vector<8x512xf32> to vector<8x128xf32>
    %226 = math.tanh %225 : vector<8x128xf32>
    %227 = arith.mulf %223, %180 : vector<8x128xf32>
    %228 = arith.mulf %222, %226 : vector<8x128xf32>
    %229 = arith.addf %227, %228 : vector<8x128xf32>
    %230 = math.tanh %229 : vector<8x128xf32>
    %231 = arith.mulf %224, %230 : vector<8x128xf32>
    %232 = arith.truncf %231 : vector<8x128xf32> to vector<8x128xbf16>
    %c0_77 = arith.constant 0 : index
    %c0_78 = arith.constant 0 : index
    %233 = vector.load %arg4[%c0_77, %c0_78] : memref<128x512xbf16, #tpu.memory_space<vmem>>, vector<128x512xbf16>
    %cst_79 = arith.constant dense<0.000000e+00> : vector<8x512xf32>
    %234 = tpu.matmul %232, %233, %cst_79 {dimension_numbers = #tpu.dot_dimension_numbers<[1], [0], [0], [1], [0, 0, 1, 1], [], []>} : vector<8x128xbf16>, vector<128x512xbf16>, vector<8x512xf32> -> vector<8x512xf32>
    %235 = arith.addf %234, %208 : vector<8x512xf32>
    %236 = arith.addf %235, %8 : vector<8x512xf32>
    %237 = vector.extract_strided_slice %236 {offsets = [0, 0], sizes = [8, 384], strides = [1, 1]} : vector<8x512xf32> to vector<8x384xf32>
    %cst_80 = arith.constant 5.000000e-01 : f32
    %238 = vector.broadcast %cst_80 : f32 to vector<8x384xf32>
    %239 = arith.mulf %238, %237 : vector<8x384xf32>
    %240 = math.tanh %239 : vector<8x384xf32>
    %cst_81 = arith.constant 5.000000e-01 : f32
    %241 = vector.broadcast %cst_81 : f32 to vector<8x384xf32>
    %242 = arith.mulf %241, %240 : vector<8x384xf32>
    %cst_82 = arith.constant 5.000000e-01 : f32
    %243 = vector.broadcast %cst_82 : f32 to vector<8x384xf32>
    %244 = arith.addf %242, %243 : vector<8x384xf32>
    %245 = vector.extract_strided_slice %244 {offsets = [0, 0], sizes = [8, 128], strides = [1, 1]} : vector<8x384xf32> to vector<8x128xf32>
    %246 = vector.extract_strided_slice %244 {offsets = [0, 128], sizes = [8, 128], strides = [1, 1]} : vector<8x384xf32> to vector<8x128xf32>
    %247 = vector.extract_strided_slice %244 {offsets = [0, 256], sizes = [8, 128], strides = [1, 1]} : vector<8x384xf32> to vector<8x128xf32>
    %248 = vector.extract_strided_slice %236 {offsets = [0, 384], sizes = [8, 128], strides = [1, 1]} : vector<8x512xf32> to vector<8x128xf32>
    %249 = math.tanh %248 : vector<8x128xf32>
    %250 = arith.mulf %246, %203 : vector<8x128xf32>
    %251 = arith.mulf %245, %249 : vector<8x128xf32>
    %252 = arith.addf %250, %251 : vector<8x128xf32>
    %253 = math.tanh %252 : vector<8x128xf32>
    %254 = arith.mulf %247, %253 : vector<8x128xf32>
    %255 = arith.truncf %254 : vector<8x128xf32> to vector<8x128xbf16>
    %c0_83 = arith.constant 0 : index
    %c0_84 = arith.constant 0 : index
    %256 = vector.load %arg5[%c0_83, %c0_84] : memref<128x512xbf16, #tpu.memory_space<vmem>>, vector<128x512xbf16>
    %cst_85 = arith.constant dense<0.000000e+00> : vector<8x512xf32>
    %257 = tpu.matmul %255, %256, %cst_85 {dimension_numbers = #tpu.dot_dimension_numbers<[1], [0], [0], [1], [0, 0, 1, 1], [], []>} : vector<8x128xbf16>, vector<128x512xbf16>, vector<8x512xf32> -> vector<8x512xf32>
    %258 = vector.extract_strided_slice %5 {offsets = [40, 0], sizes = [8, 512], strides = [1, 1]} : vector<64x512xf32> to vector<8x512xf32>
    %259 = arith.truncf %231 : vector<8x128xf32> to vector<8x128xbf16>
    %c0_86 = arith.constant 0 : index
    %c0_87 = arith.constant 0 : index
    %260 = vector.load %arg2[%c0_86, %c0_87] : memref<128x512xbf16, #tpu.memory_space<vmem>>, vector<128x512xbf16>
    %cst_88 = arith.constant dense<0.000000e+00> : vector<8x512xf32>
    %261 = tpu.matmul %259, %260, %cst_88 {dimension_numbers = #tpu.dot_dimension_numbers<[1], [0], [0], [1], [0, 0, 1, 1], [], []>} : vector<8x128xbf16>, vector<128x512xbf16>, vector<8x512xf32> -> vector<8x512xf32>
    %262 = arith.addf %258, %261 : vector<8x512xf32>
    %263 = vector.extract_strided_slice %262 {offsets = [0, 0], sizes = [8, 384], strides = [1, 1]} : vector<8x512xf32> to vector<8x384xf32>
    %cst_89 = arith.constant 5.000000e-01 : f32
    %264 = vector.broadcast %cst_89 : f32 to vector<8x384xf32>
    %265 = arith.mulf %264, %263 : vector<8x384xf32>
    %266 = math.tanh %265 : vector<8x384xf32>
    %cst_90 = arith.constant 5.000000e-01 : f32
    %267 = vector.broadcast %cst_90 : f32 to vector<8x384xf32>
    %268 = arith.mulf %267, %266 : vector<8x384xf32>
    %cst_91 = arith.constant 5.000000e-01 : f32
    %269 = vector.broadcast %cst_91 : f32 to vector<8x384xf32>
    %270 = arith.addf %268, %269 : vector<8x384xf32>
    %271 = vector.extract_strided_slice %270 {offsets = [0, 0], sizes = [8, 128], strides = [1, 1]} : vector<8x384xf32> to vector<8x128xf32>
    %272 = vector.extract_strided_slice %270 {offsets = [0, 128], sizes = [8, 128], strides = [1, 1]} : vector<8x384xf32> to vector<8x128xf32>
    %273 = vector.extract_strided_slice %270 {offsets = [0, 256], sizes = [8, 128], strides = [1, 1]} : vector<8x384xf32> to vector<8x128xf32>
    %274 = vector.extract_strided_slice %262 {offsets = [0, 384], sizes = [8, 128], strides = [1, 1]} : vector<8x512xf32> to vector<8x128xf32>
    %275 = math.tanh %274 : vector<8x128xf32>
    %276 = arith.mulf %272, %229 : vector<8x128xf32>
    %277 = arith.mulf %271, %275 : vector<8x128xf32>
    %278 = arith.addf %276, %277 : vector<8x128xf32>
    %279 = math.tanh %278 : vector<8x128xf32>
    %280 = arith.mulf %273, %279 : vector<8x128xf32>
    %281 = arith.truncf %280 : vector<8x128xf32> to vector<8x128xbf16>
    %c0_92 = arith.constant 0 : index
    %c0_93 = arith.constant 0 : index
    %282 = vector.load %arg4[%c0_92, %c0_93] : memref<128x512xbf16, #tpu.memory_space<vmem>>, vector<128x512xbf16>
    %cst_94 = arith.constant dense<0.000000e+00> : vector<8x512xf32>
    %283 = tpu.matmul %281, %282, %cst_94 {dimension_numbers = #tpu.dot_dimension_numbers<[1], [0], [0], [1], [0, 0, 1, 1], [], []>} : vector<8x128xbf16>, vector<128x512xbf16>, vector<8x512xf32> -> vector<8x512xf32>
    %284 = arith.addf %283, %257 : vector<8x512xf32>
    %285 = arith.addf %284, %8 : vector<8x512xf32>
    %286 = vector.extract_strided_slice %285 {offsets = [0, 0], sizes = [8, 384], strides = [1, 1]} : vector<8x512xf32> to vector<8x384xf32>
    %cst_95 = arith.constant 5.000000e-01 : f32
    %287 = vector.broadcast %cst_95 : f32 to vector<8x384xf32>
    %288 = arith.mulf %287, %286 : vector<8x384xf32>
    %289 = math.tanh %288 : vector<8x384xf32>
    %cst_96 = arith.constant 5.000000e-01 : f32
    %290 = vector.broadcast %cst_96 : f32 to vector<8x384xf32>
    %291 = arith.mulf %290, %289 : vector<8x384xf32>
    %cst_97 = arith.constant 5.000000e-01 : f32
    %292 = vector.broadcast %cst_97 : f32 to vector<8x384xf32>
    %293 = arith.addf %291, %292 : vector<8x384xf32>
    %294 = vector.extract_strided_slice %293 {offsets = [0, 0], sizes = [8, 128], strides = [1, 1]} : vector<8x384xf32> to vector<8x128xf32>
    %295 = vector.extract_strided_slice %293 {offsets = [0, 128], sizes = [8, 128], strides = [1, 1]} : vector<8x384xf32> to vector<8x128xf32>
    %296 = vector.extract_strided_slice %293 {offsets = [0, 256], sizes = [8, 128], strides = [1, 1]} : vector<8x384xf32> to vector<8x128xf32>
    %297 = vector.extract_strided_slice %285 {offsets = [0, 384], sizes = [8, 128], strides = [1, 1]} : vector<8x512xf32> to vector<8x128xf32>
    %298 = math.tanh %297 : vector<8x128xf32>
    %299 = arith.mulf %295, %252 : vector<8x128xf32>
    %300 = arith.mulf %294, %298 : vector<8x128xf32>
    %301 = arith.addf %299, %300 : vector<8x128xf32>
    %302 = math.tanh %301 : vector<8x128xf32>
    %303 = arith.mulf %296, %302 : vector<8x128xf32>
    %304 = arith.truncf %303 : vector<8x128xf32> to vector<8x128xbf16>
    %c0_98 = arith.constant 0 : index
    %c0_99 = arith.constant 0 : index
    %305 = vector.load %arg5[%c0_98, %c0_99] : memref<128x512xbf16, #tpu.memory_space<vmem>>, vector<128x512xbf16>
    %cst_100 = arith.constant dense<0.000000e+00> : vector<8x512xf32>
    %306 = tpu.matmul %304, %305, %cst_100 {dimension_numbers = #tpu.dot_dimension_numbers<[1], [0], [0], [1], [0, 0, 1, 1], [], []>} : vector<8x128xbf16>, vector<128x512xbf16>, vector<8x512xf32> -> vector<8x512xf32>
    %307 = vector.extract_strided_slice %5 {offsets = [48, 0], sizes = [8, 512], strides = [1, 1]} : vector<64x512xf32> to vector<8x512xf32>
    %308 = arith.truncf %280 : vector<8x128xf32> to vector<8x128xbf16>
    %c0_101 = arith.constant 0 : index
    %c0_102 = arith.constant 0 : index
    %309 = vector.load %arg2[%c0_101, %c0_102] : memref<128x512xbf16, #tpu.memory_space<vmem>>, vector<128x512xbf16>
    %cst_103 = arith.constant dense<0.000000e+00> : vector<8x512xf32>
    %310 = tpu.matmul %308, %309, %cst_103 {dimension_numbers = #tpu.dot_dimension_numbers<[1], [0], [0], [1], [0, 0, 1, 1], [], []>} : vector<8x128xbf16>, vector<128x512xbf16>, vector<8x512xf32> -> vector<8x512xf32>
    %311 = arith.addf %307, %310 : vector<8x512xf32>
    %312 = vector.extract_strided_slice %311 {offsets = [0, 0], sizes = [8, 384], strides = [1, 1]} : vector<8x512xf32> to vector<8x384xf32>
    %cst_104 = arith.constant 5.000000e-01 : f32
    %313 = vector.broadcast %cst_104 : f32 to vector<8x384xf32>
    %314 = arith.mulf %313, %312 : vector<8x384xf32>
    %315 = math.tanh %314 : vector<8x384xf32>
    %cst_105 = arith.constant 5.000000e-01 : f32
    %316 = vector.broadcast %cst_105 : f32 to vector<8x384xf32>
    %317 = arith.mulf %316, %315 : vector<8x384xf32>
    %cst_106 = arith.constant 5.000000e-01 : f32
    %318 = vector.broadcast %cst_106 : f32 to vector<8x384xf32>
    %319 = arith.addf %317, %318 : vector<8x384xf32>
    %320 = vector.extract_strided_slice %319 {offsets = [0, 0], sizes = [8, 128], strides = [1, 1]} : vector<8x384xf32> to vector<8x128xf32>
    %321 = vector.extract_strided_slice %319 {offsets = [0, 128], sizes = [8, 128], strides = [1, 1]} : vector<8x384xf32> to vector<8x128xf32>
    %322 = vector.extract_strided_slice %319 {offsets = [0, 256], sizes = [8, 128], strides = [1, 1]} : vector<8x384xf32> to vector<8x128xf32>
    %323 = vector.extract_strided_slice %311 {offsets = [0, 384], sizes = [8, 128], strides = [1, 1]} : vector<8x512xf32> to vector<8x128xf32>
    %324 = math.tanh %323 : vector<8x128xf32>
    %325 = arith.mulf %321, %278 : vector<8x128xf32>
    %326 = arith.mulf %320, %324 : vector<8x128xf32>
    %327 = arith.addf %325, %326 : vector<8x128xf32>
    %328 = math.tanh %327 : vector<8x128xf32>
    %329 = arith.mulf %322, %328 : vector<8x128xf32>
    %330 = arith.truncf %329 : vector<8x128xf32> to vector<8x128xbf16>
    %c0_107 = arith.constant 0 : index
    %c0_108 = arith.constant 0 : index
    %331 = vector.load %arg4[%c0_107, %c0_108] : memref<128x512xbf16, #tpu.memory_space<vmem>>, vector<128x512xbf16>
    %cst_109 = arith.constant dense<0.000000e+00> : vector<8x512xf32>
    %332 = tpu.matmul %330, %331, %cst_109 {dimension_numbers = #tpu.dot_dimension_numbers<[1], [0], [0], [1], [0, 0, 1, 1], [], []>} : vector<8x128xbf16>, vector<128x512xbf16>, vector<8x512xf32> -> vector<8x512xf32>
    %333 = arith.addf %332, %306 : vector<8x512xf32>
    %334 = arith.addf %333, %8 : vector<8x512xf32>
    %335 = vector.extract_strided_slice %334 {offsets = [0, 0], sizes = [8, 384], strides = [1, 1]} : vector<8x512xf32> to vector<8x384xf32>
    %cst_110 = arith.constant 5.000000e-01 : f32
    %336 = vector.broadcast %cst_110 : f32 to vector<8x384xf32>
    %337 = arith.mulf %336, %335 : vector<8x384xf32>
    %338 = math.tanh %337 : vector<8x384xf32>
    %cst_111 = arith.constant 5.000000e-01 : f32
    %339 = vector.broadcast %cst_111 : f32 to vector<8x384xf32>
    %340 = arith.mulf %339, %338 : vector<8x384xf32>
    %cst_112 = arith.constant 5.000000e-01 : f32
    %341 = vector.broadcast %cst_112 : f32 to vector<8x384xf32>
    %342 = arith.addf %340, %341 : vector<8x384xf32>
    %343 = vector.extract_strided_slice %342 {offsets = [0, 0], sizes = [8, 128], strides = [1, 1]} : vector<8x384xf32> to vector<8x128xf32>
    %344 = vector.extract_strided_slice %342 {offsets = [0, 128], sizes = [8, 128], strides = [1, 1]} : vector<8x384xf32> to vector<8x128xf32>
    %345 = vector.extract_strided_slice %342 {offsets = [0, 256], sizes = [8, 128], strides = [1, 1]} : vector<8x384xf32> to vector<8x128xf32>
    %346 = vector.extract_strided_slice %334 {offsets = [0, 384], sizes = [8, 128], strides = [1, 1]} : vector<8x512xf32> to vector<8x128xf32>
    %347 = math.tanh %346 : vector<8x128xf32>
    %348 = arith.mulf %344, %301 : vector<8x128xf32>
    %349 = arith.mulf %343, %347 : vector<8x128xf32>
    %350 = arith.addf %348, %349 : vector<8x128xf32>
    %351 = math.tanh %350 : vector<8x128xf32>
    %352 = arith.mulf %345, %351 : vector<8x128xf32>
    %353 = arith.truncf %352 : vector<8x128xf32> to vector<8x128xbf16>
    %c0_113 = arith.constant 0 : index
    %c0_114 = arith.constant 0 : index
    %354 = vector.load %arg5[%c0_113, %c0_114] : memref<128x512xbf16, #tpu.memory_space<vmem>>, vector<128x512xbf16>
    %cst_115 = arith.constant dense<0.000000e+00> : vector<8x512xf32>
    %355 = tpu.matmul %353, %354, %cst_115 {dimension_numbers = #tpu.dot_dimension_numbers<[1], [0], [0], [1], [0, 0, 1, 1], [], []>} : vector<8x128xbf16>, vector<128x512xbf16>, vector<8x512xf32> -> vector<8x512xf32>
    %356 = vector.extract_strided_slice %5 {offsets = [56, 0], sizes = [8, 512], strides = [1, 1]} : vector<64x512xf32> to vector<8x512xf32>
    %357 = arith.truncf %329 : vector<8x128xf32> to vector<8x128xbf16>
    %c0_116 = arith.constant 0 : index
    %c0_117 = arith.constant 0 : index
    %358 = vector.load %arg2[%c0_116, %c0_117] : memref<128x512xbf16, #tpu.memory_space<vmem>>, vector<128x512xbf16>
    %cst_118 = arith.constant dense<0.000000e+00> : vector<8x512xf32>
    %359 = tpu.matmul %357, %358, %cst_118 {dimension_numbers = #tpu.dot_dimension_numbers<[1], [0], [0], [1], [0, 0, 1, 1], [], []>} : vector<8x128xbf16>, vector<128x512xbf16>, vector<8x512xf32> -> vector<8x512xf32>
    %360 = arith.addf %356, %359 : vector<8x512xf32>
    %361 = vector.extract_strided_slice %360 {offsets = [0, 0], sizes = [8, 384], strides = [1, 1]} : vector<8x512xf32> to vector<8x384xf32>
    %cst_119 = arith.constant 5.000000e-01 : f32
    %362 = vector.broadcast %cst_119 : f32 to vector<8x384xf32>
    %363 = arith.mulf %362, %361 : vector<8x384xf32>
    %364 = math.tanh %363 : vector<8x384xf32>
    %cst_120 = arith.constant 5.000000e-01 : f32
    %365 = vector.broadcast %cst_120 : f32 to vector<8x384xf32>
    %366 = arith.mulf %365, %364 : vector<8x384xf32>
    %cst_121 = arith.constant 5.000000e-01 : f32
    %367 = vector.broadcast %cst_121 : f32 to vector<8x384xf32>
    %368 = arith.addf %366, %367 : vector<8x384xf32>
    %369 = vector.extract_strided_slice %368 {offsets = [0, 0], sizes = [8, 128], strides = [1, 1]} : vector<8x384xf32> to vector<8x128xf32>
    %370 = vector.extract_strided_slice %368 {offsets = [0, 128], sizes = [8, 128], strides = [1, 1]} : vector<8x384xf32> to vector<8x128xf32>
    %371 = vector.extract_strided_slice %368 {offsets = [0, 256], sizes = [8, 128], strides = [1, 1]} : vector<8x384xf32> to vector<8x128xf32>
    %372 = vector.extract_strided_slice %360 {offsets = [0, 384], sizes = [8, 128], strides = [1, 1]} : vector<8x512xf32> to vector<8x128xf32>
    %373 = math.tanh %372 : vector<8x128xf32>
    %374 = arith.mulf %370, %327 : vector<8x128xf32>
    %375 = arith.mulf %369, %373 : vector<8x128xf32>
    %376 = arith.addf %374, %375 : vector<8x128xf32>
    %377 = math.tanh %376 : vector<8x128xf32>
    %378 = arith.mulf %371, %377 : vector<8x128xf32>
    %379 = arith.truncf %378 : vector<8x128xf32> to vector<8x128xbf16>
    %c0_122 = arith.constant 0 : index
    %c0_123 = arith.constant 0 : index
    %380 = vector.load %arg4[%c0_122, %c0_123] : memref<128x512xbf16, #tpu.memory_space<vmem>>, vector<128x512xbf16>
    %cst_124 = arith.constant dense<0.000000e+00> : vector<8x512xf32>
    %381 = tpu.matmul %379, %380, %cst_124 {dimension_numbers = #tpu.dot_dimension_numbers<[1], [0], [0], [1], [0, 0, 1, 1], [], []>} : vector<8x128xbf16>, vector<128x512xbf16>, vector<8x512xf32> -> vector<8x512xf32>
    %382 = arith.addf %381, %355 : vector<8x512xf32>
    %383 = arith.addf %382, %8 : vector<8x512xf32>
    %384 = vector.extract_strided_slice %383 {offsets = [0, 0], sizes = [8, 384], strides = [1, 1]} : vector<8x512xf32> to vector<8x384xf32>
    %cst_125 = arith.constant 5.000000e-01 : f32
    %385 = vector.broadcast %cst_125 : f32 to vector<8x384xf32>
    %386 = arith.mulf %385, %384 : vector<8x384xf32>
    %387 = math.tanh %386 : vector<8x384xf32>
    %cst_126 = arith.constant 5.000000e-01 : f32
    %388 = vector.broadcast %cst_126 : f32 to vector<8x384xf32>
    %389 = arith.mulf %388, %387 : vector<8x384xf32>
    %cst_127 = arith.constant 5.000000e-01 : f32
    %390 = vector.broadcast %cst_127 : f32 to vector<8x384xf32>
    %391 = arith.addf %389, %390 : vector<8x384xf32>
    %392 = vector.extract_strided_slice %391 {offsets = [0, 0], sizes = [8, 128], strides = [1, 1]} : vector<8x384xf32> to vector<8x128xf32>
    %393 = vector.extract_strided_slice %391 {offsets = [0, 128], sizes = [8, 128], strides = [1, 1]} : vector<8x384xf32> to vector<8x128xf32>
    %394 = vector.extract_strided_slice %391 {offsets = [0, 256], sizes = [8, 128], strides = [1, 1]} : vector<8x384xf32> to vector<8x128xf32>
    %395 = vector.extract_strided_slice %383 {offsets = [0, 384], sizes = [8, 128], strides = [1, 1]} : vector<8x512xf32> to vector<8x128xf32>
    %396 = math.tanh %395 : vector<8x128xf32>
    %397 = arith.mulf %393, %350 : vector<8x128xf32>
    %398 = arith.mulf %392, %396 : vector<8x128xf32>
    %399 = arith.addf %397, %398 : vector<8x128xf32>
    %400 = math.tanh %399 : vector<8x128xf32>
    %401 = arith.mulf %394, %400 : vector<8x128xf32>
    %402 = tpu.concatenate %58, %107, %156, %205, %254, %303, %352, %401 in 0 : vector<8x128xf32>, vector<8x128xf32>, vector<8x128xf32>, vector<8x128xf32>, vector<8x128xf32>, vector<8x128xf32>, vector<8x128xf32>, vector<8x128xf32> -> vector<64x128xf32>
    %403 = arith.truncf %402 : vector<64x128xf32> to vector<64x128xbf16>
    %c0_128 = arith.constant 0 : index
    %c0_129 = arith.constant 0 : index
    %404 = vector.load %arg7[%c0_128, %c0_129] : memref<128x128xbf16, #tpu.memory_space<vmem>>, vector<128x128xbf16>
    %cst_130 = arith.constant dense<0.000000e+00> : vector<64x128xf32>
    %405 = tpu.matmul %403, %404, %cst_130 {dimension_numbers = #tpu.dot_dimension_numbers<[1], [0], [0], [1], [0, 0, 1, 1], [], []>} : vector<64x128xbf16>, vector<128x128xbf16>, vector<64x128xf32> -> vector<64x128xf32>
    %c0_131 = arith.constant 0 : index
    %c0_132 = arith.constant 0 : index
    %406 = vector.load %arg8[%c0_131, %c0_132] : memref<1x128xf32, #tpu.memory_space<vmem>>, vector<1x128xf32>
    %407 = vector.broadcast %406 : vector<1x128xf32> to vector<64x128xf32>
    %408 = arith.addf %405, %407 : vector<64x128xf32>
    %c0_133 = arith.constant 0 : index
    %c0_134 = arith.constant 0 : index
    %409 = vector.load %arg9[%c0_133, %c0_134] : memref<64x128xf32, #tpu.memory_space<vmem>>, vector<64x128xf32>
    tpu.vector_store %arg9[%c0_133, %c0_134], %408 {strides = array<i32>} : memref<64x128xf32, #tpu.memory_space<vmem>>, vector<64x128xf32>,
    %c0_135 = arith.constant 0 : index
    %c0_136 = arith.constant 0 : index
    %c0_137 = arith.constant 0 : index
    %410 = vector.load %arg10[%c0_135, %c0_136, %c0_137] : memref<2x8x128xf32, #tpu.memory_space<vmem>>, vector<1x8x128xf32>
    %411 = vector.shape_cast %410 : vector<1x8x128xf32> to vector<8x128xf32>
    %412 = vector.shape_cast %378 : vector<8x128xf32> to vector<1x8x128xf32>
    tpu.vector_store %arg10[%c0_135, %c0_136, %c0_137], %412 {strides = array<i32>} : memref<2x8x128xf32, #tpu.memory_space<vmem>>, vector<1x8x128xf32>,
    %c1 = arith.constant 1 : index
    %c0_138 = arith.constant 0 : index
    %c0_139 = arith.constant 0 : index
    %413 = vector.load %arg10[%c1, %c0_138, %c0_139] : memref<2x8x128xf32, #tpu.memory_space<vmem>>, vector<1x8x128xf32>
    %414 = vector.shape_cast %413 : vector<1x8x128xf32> to vector<8x128xf32>
    %415 = vector.shape_cast %401 : vector<8x128xf32> to vector<1x8x128xf32>
    tpu.vector_store %arg10[%c1, %c0_138, %c0_139], %415 {strides = array<i32>} : memref<2x8x128xf32, #tpu.memory_space<vmem>>, vector<1x8x128xf32>,
    %c0_140 = arith.constant 0 : index
    %c0_141 = arith.constant 0 : index
    %c0_142 = arith.constant 0 : index
    %416 = vector.load %arg11[%c0_140, %c0_141, %c0_142] : memref<2x8x128xf32, #tpu.memory_space<vmem>>, vector<1x8x128xf32>
    %417 = vector.shape_cast %416 : vector<1x8x128xf32> to vector<8x128xf32>
    %418 = vector.shape_cast %376 : vector<8x128xf32> to vector<1x8x128xf32>
    tpu.vector_store %arg11[%c0_140, %c0_141, %c0_142], %418 {strides = array<i32>} : memref<2x8x128xf32, #tpu.memory_space<vmem>>, vector<1x8x128xf32>,
    %c1_143 = arith.constant 1 : index
    %c0_144 = arith.constant 0 : index
    %c0_145 = arith.constant 0 : index
    %419 = vector.load %arg11[%c1_143, %c0_144, %c0_145] : memref<2x8x128xf32, #tpu.memory_space<vmem>>, vector<1x8x128xf32>
    %420 = vector.shape_cast %419 : vector<1x8x128xf32> to vector<8x128xf32>
    %421 = vector.shape_cast %399 : vector<8x128xf32> to vector<1x8x128xf32>
    tpu.vector_store %arg11[%c1_143, %c0_144, %c0_145], %421 {strides = array<i32>} : memref<2x8x128xf32, #tpu.memory_space<vmem>>, vector<1x8x128xf32>,
    return
  }
}

</mosaic_0001>

<bundles_post_ra>
// kernel: lstm_text_forward.1
= control target key start
LH: loop header
LB: loop body
LE: loop exit
PB: predicated region body
PF: predicated region fallthrough
CT: control target
= control target key end

     0   :  { %v6937_v1 = vmov 0   ;;  %vm134_vm0 = vcmask 261120   ;;  %s6925_s1 = inlined_call_operand.vmem [shape: bf16[32,512], index: 1, kind: input, shape index: {}]   ;;  %s6926_s5 = inlined_call_operand.vmem [shape: bf16[128,512], index: 5, kind: input, shape index: {}]   ;;  %s6927_s0 = inlined_call_operand.vmem [shape: bf16[64,32], index: 0, kind: input, shape index: {}]   ;;  %s6928_s2 = inlined_call_operand.vmem [shape: bf16[128,512], index: 2, kind: input, shape index: {}]   ;;  %s6929_s4 = inlined_call_operand.vmem [shape: bf16[128,512], index: 4, kind: input, shape index: {}]   ;;  %s6930_s3 = inlined_call_operand.vmem [shape: f32[1,512], index: 3, kind: input, shape index: {}]   ;;  %s6931_s6 = inlined_call_operand.vmem [shape: f32[1,512], index: 6, kind: input, shape index: {}]   ;;  %s6932_s7 = inlined_call_operand.vmem [shape: bf16[128,128], index: 7, kind: input, shape index: {}]   ;;  %s6933_s11 = inlined_call_operand.vmem [shape: f32[2,8,128], index: 11, kind: output, shape index: {2}]   ;;  %s6934_s10 = inlined_call_operand.vmem [shape: f32[2,8,128], index: 10, kind: output, shape index: {1}]   ;;  %s6935_s8 = inlined_call_operand.vmem [shape: f32[1,128], index: 8, kind: input, shape index: {}]   ;;  %s6936_s9 = inlined_call_operand.vmem [shape: f32[64,128], index: 9, kind: output, shape index: {0}]  }
   0x1   :  { %v3556_v0 = vld [vmem:[%s6925_s1 + $0x4] ss:$16 sps:$4 sm:$0xff]   ;;  %179 = vmatprep.mubr.bf16.mxu1 %v6937_v1  ;;  %539 = vmatprep.mubr.bf16.mxu0 %v6937_v1  ;;  %v3560_v3 = vld [vmem:[%s6925_s1] ss:$16 sps:$4 sm:$0xff]   ;;  %v3569_v10 = vld [vmem:[%s6925_s1 + $0x8] ss:$16 sps:$4 sm:$0xff]  }
   0x2   :  { %v4145_v2 = vld [vmem:[%s6926_s5 + $0x4] ss:$16 sps:$4 sm:$0xff]   ;;  %147 = vmatprep.subr.bf16.mxu1 %v3556_v0  ;;  %v4153_v4 = vld [vmem:[%s6926_s5] ss:$16 sps:$4 sm:$0xff]   ;;  %v3571_v11 = vld [vmem:[%s6925_s1 + $0xc] ss:$16 sps:$4 sm:$0xff]  }
   0x3   :  { %507 = vmatprep.subr.bf16.mxu0 %v4145_v2  ;;  %v3562_v5 = vld [vmem:[%s6925_s1 + $0x24] ss:$16 sps:$4 sm:$0xff]   ;;  %148 = vmatpush1.bf16.msra.mxu1 %v3560_v3  ;;  %v3566_v7 = vld [vmem:[%s6925_s1 + $0x20] ss:$16 sps:$4 sm:$0xff]   ;;  %v4220_v17 = vld [vmem:[%s6927_s0 + $0x8] sm:$0xff]  }
   0x4   :  { %508 = vmatpush1.bf16.msra.mxu0 %v4153_v4  ;;  %v4163_v6 = vld [vmem:[%s6926_s5 + $0x24] ss:$16 sps:$4 sm:$0xff]   ;;  %149 = vmatprep.subr.bf16.mxu1 %v3562_v5  ;;  %v4171_v8 = vld [vmem:[%s6926_s5 + $0x20] ss:$16 sps:$4 sm:$0xff]   ;;  %v3588_v19 = vld [vmem:[%s6925_s1 + $0x2c] ss:$16 sps:$4 sm:$0xff]  }
   0x5   :  { %509 = vmatprep.subr.bf16.mxu0 %v4163_v6  ;;  %v4177_v9 = vld [vmem:[%s6927_s0] sm:$0xff]   ;;  %v3586_v21 = vld [vmem:[%s6925_s1 + $0x28] ss:$16 sps:$4 sm:$0xff]   ;;  %v4258_v24 = vld [vmem:[%s6927_s0 + $0x10] sm:$0xff]  }
   0x6   :  { %v4189_v12 = vld [vmem:[%s6926_s5 + $0x44] ss:$16 sps:$4 sm:$0xff]   ;;  %v4194_v13 = vld [vmem:[%s6926_s5 + $0x40] ss:$16 sps:$4 sm:$0xff]   ;;  %v4263_v25 = vld [vmem:[%s6926_s5 + $0xc] ss:$16 sps:$4 sm:$0xff]  }
   0x7   :  { %150 = vmatpush1.bf16.msra.mxu1 %v3566_v7  ;;  %v4199_v14 = vld [vmem:[%s6926_s5 + $0x64] ss:$16 sps:$4 sm:$0xff]   ;;  %v4208_v15 = vld [vmem:[%s6926_s5 + $0x60] ss:$16 sps:$4 sm:$0xff]   ;;  %v4296_v30 = vld [vmem:[%s6927_s0 + $0x18] sm:$0xff]  }
   0x8   :  { %510 = vmatpush1.bf16.msra.mxu0 %v4171_v8  ;;  %220 = vmatprep.subr.bf16.mxu1 %v3571_v11  ;;  %v4215_v16 = vld [vmem:[%s6926_s5 + $0x84] ss:$16 sps:$4 sm:$0xff]   ;;  %v4225_v18 = vld [vmem:[%s6926_s5 + $0x80] ss:$16 sps:$4 sm:$0xff]   ;;  %v4330_v35 = vld [vmem:[%s6926_s5 + $0x8] ss:$16 sps:$4 sm:$0xff]  }
   0x9   :  { %511 = vmatprep.subr.bf16.mxu0 %v4189_v12  ;;  %v4235_v20 = vld [vmem:[%s6926_s5 + $0xa4] ss:$16 sps:$4 sm:$0xff]   ;;  %v4246_v22 = vld [vmem:[%s6926_s5 + $0xa0] ss:$16 sps:$4 sm:$0xff]   ;;  %v4341_v37 = vld [vmem:[%s6926_s5 + $0x2c] ss:$16 sps:$4 sm:$0xff]  }
   0xa   :  { %3404 = vmatmul.mubr.msk.bf16.vlgmr.msra.gmra.mrb[0].mxu1 %vm134_vm0, %v4177_v9  ;;  %v4253_v23 = vld [vmem:[%s6926_s5 + $0xc4] ss:$16 sps:$4 sm:$0xff]   ;;  %v4269_v26 = vld [vmem:[%s6926_s5 + $0xc0] ss:$16 sps:$4 sm:$0xff]   ;;  %v4354_v39 = vld [vmem:[%s6926_s5 + $0x28] ss:$16 sps:$4 sm:$0xff]  }
   0xb   :  { %221 = vmatpush1.bf16.msra.mxu1 %v3569_v10  ;;  %189 = vmatprep.mubr.bf16.mxu1 %v6937_v1  ;;  %v4275_v27 = vld [vmem:[%s6926_s5 + $0xe4] ss:$16 sps:$4 sm:$0xff]   ;;  %v4284_v28 = vld [vmem:[%s6926_s5 + $0xe0] ss:$16 sps:$4 sm:$0xff]   ;;  %v4366_v41 = vld [vmem:[%s6926_s5 + $0x4c] ss:$16 sps:$4 sm:$0xff]  }
   0xc   :  { %512 = vmatpush1.bf16.msra.mxu0 %v4194_v13  ;;  %222 = vmatprep.subr.bf16.mxu1 %v3588_v19  ;;  %v4291_v29 = vld [vmem:[%s6928_s2 + $0x4] ss:$16 sps:$4 sm:$0xff]   ;;  %v4302_v31 = vld [vmem:[%s6928_s2] ss:$16 sps:$4 sm:$0xff]   ;;  %v4379_v43 = vld [vmem:[%s6926_s5 + $0x48] ss:$16 sps:$4 sm:$0xff]  }
   0xd   :  { %513 = vmatprep.subr.bf16.mxu0 %v4199_v14  ;;  %v4308_v32 = vld [vmem:[%s6928_s2 + $0x24] ss:$16 sps:$4 sm:$0xff]   ;;  %v4317_v33 = vld [vmem:[%s6928_s2 + $0x20] ss:$16 sps:$4 sm:$0xff]   ;;  %v4391_v45 = vld [vmem:[%s6926_s5 + $0x6c] ss:$16 sps:$4 sm:$0xff]  }
   0xe   :  { %7253 = vst [vmem:[#allocation2_spill] sm:$0xff] %v4317_v33  ;;  %v4324_v34 = vld [vmem:[%s6928_s2 + $0x44] ss:$16 sps:$4 sm:$0xff]   ;;  %v4335_v36 = vld [vmem:[%s6928_s2 + $0x40] ss:$16 sps:$4 sm:$0xff]  }
   0xf   :  { %223 = vmatpush1.bf16.msra.mxu1 %v3586_v21  ;;  %7254 = vst [vmem:[#allocation3_spill] sm:$0xff] %v4324_v34  ;;  %7255 = vst [vmem:[#allocation4_spill] sm:$0xff] %v4335_v36  ;;  %v4347_v38 = vld [vmem:[%s6928_s2 + $0x64] ss:$16 sps:$4 sm:$0xff]   ;;  %v4359_v40 = vld [vmem:[%s6928_s2 + $0x60] ss:$16 sps:$4 sm:$0xff]  }
  0x10   :  { %514 = vmatpush1.bf16.msra.mxu0 %v4208_v15  ;;  %548 = vmatprep.subr.bf16.mxu1 %v4263_v25  ;;  %7256 = vst [vmem:[#allocation5_spill] sm:$0xff] %v4347_v38  ;;  %7257 = vst [vmem:[#allocation6_spill] sm:$0xff] %v4359_v40  ;;  %v4373_v42 = vld [vmem:[%s6928_s2 + $0x84] ss:$16 sps:$4 sm:$0xff]   ;;  %v4384_v44 = vld [vmem:[%s6928_s2 + $0x80] ss:$16 sps:$4 sm:$0xff]  }
  0x11   :  { %515 = vmatprep.subr.bf16.mxu0 %v4215_v16  ;;  %7258 = vst [vmem:[#allocation7_spill] sm:$0xff] %v4373_v42  ;;  %7259 = vst [vmem:[#allocation8_spill] sm:$0xff] %v4384_v44  ;;  %v4398_v46 = vld [vmem:[%s6928_s2 + $0xa4] ss:$16 sps:$4 sm:$0xff]   ;;  %v4407_v47 = vld [vmem:[%s6926_s5 + $0x68] ss:$16 sps:$4 sm:$0xff]  }
  0x12   :  { %3405 = vmatmul.mubr.msk.bf16.gmra.mrb[4].mxu1 %vm134_vm0, %v4220_v17  ;;  %7260 = vst [vmem:[#allocation9_spill] sm:$0xff] %v4398_v46  ;;  %v4412_v48 = vld [vmem:[%s6928_s2 + $0xa0] ss:$16 sps:$4 sm:$0xff]   ;;  %v4419_v49 = vld [vmem:[%s6926_s5 + $0x8c] ss:$16 sps:$4 sm:$0xff]  }
  0x13   :  { %199 = vmatprep.mubr.bf16.mxu1 %v6937_v1  ;;  %7261 = vst [vmem:[#allocation10_spill] sm:$0xff] %v4412_v48  ;;  %v4424_v50 = vld [vmem:[%s6928_s2 + $0xc4] ss:$16 sps:$4 sm:$0xff]   ;;  %v4432_v51 = vld [vmem:[%s6926_s5 + $0x88] ss:$16 sps:$4 sm:$0xff]  }
  0x14   :  { %516 = vmatpush1.bf16.msra.mxu0 %v4225_v18  ;;  %7262 = vst [vmem:[#allocation11_spill] sm:$0xff] %v4424_v50  ;;  %v4437_v52 = vld [vmem:[%s6928_s2 + $0xc0] ss:$16 sps:$4 sm:$0xff]   ;;  %v4444_v53 = vld [vmem:[%s6926_s5 + $0xac] ss:$16 sps:$4 sm:$0xff]  }
  0x15   :  { %517 = vmatprep.subr.bf16.mxu0 %v4235_v20  ;;  %7263 = vst [vmem:[#allocation12_spill] sm:$0xff] %v4437_v52  ;;  %v4449_v54 = vld [vmem:[%s6928_s2 + $0xe4] ss:$16 sps:$4 sm:$0xff]   ;;  %v4458_v55 = vld [vmem:[%s6926_s5 + $0xa8] ss:$16 sps:$4 sm:$0xff]  }
  0x16   :  { %7264 = vst [vmem:[#allocation13_spill] sm:$0xff] %v4449_v54  ;;  %v4463_v56 = vld [vmem:[%s6928_s2 + $0xe0] ss:$16 sps:$4 sm:$0xff]   ;;  %v4470_v57 = vld [vmem:[%s6926_s5 + $0xcc] ss:$16 sps:$4 sm:$0xff]  }
  0x17   :  { %7265 = vst [vmem:[#allocation14_spill] sm:$0xff] %v4463_v56  ;;  %v4478_v58 = vld [vmem:[%s6926_s5 + $0xc8] ss:$16 sps:$4 sm:$0xff]   ;;  %v4484_v59 = vld [vmem:[%s6926_s5 + $0xec] ss:$16 sps:$4 sm:$0xff]  }
  0x18   :  { %518 = vmatpush1.bf16.msra.mxu0 %v4246_v22  ;;  %v4493_v60 = vld [vmem:[%s6926_s5 + $0xe8] ss:$16 sps:$4 sm:$0xff]   ;;  %v4500_v61 = vld [vmem:[%s6928_s2 + $0xc] ss:$16 sps:$4 sm:$0xff]  }
  0x19   :  { %519 = vmatprep.subr.bf16.mxu0 %v4253_v23  ;;  %v4507_v62 = vld [vmem:[%s6928_s2 + $0x8] ss:$16 sps:$4 sm:$0xff]   ;;  %v4513_v63 = vld [vmem:[%s6928_s2 + $0x2c] ss:$16 sps:$4 sm:$0xff]  }
  0x1a   :  { %3406 = vmatmul.mubr.msk.bf16.gmra.mrb[8].mxu1 %vm134_vm0, %v4258_v24  ;;  %7266 = vst [vmem:[#allocation15_spill] sm:$0xff] %v4513_v63  ;;  %v4520_v0 = vld [vmem:[%s6928_s2 + $0x28] ss:$16 sps:$4 sm:$0xff]   ;;  %v4527_v3 = vld [vmem:[%s6928_s2 + $0x4c] ss:$16 sps:$4 sm:$0xff]  }
  0x1b   :  { %209 = vmatprep.mubr.bf16.mxu1 %v6937_v1  ;;  %7267 = vst [vmem:[#allocation16_spill] sm:$0xff] %v4520_v0  ;;  %7268 = vst [vmem:[#allocation17_spill] sm:$0xff] %v4527_v3  ;;  %v4533_v5 = vld [vmem:[%s6928_s2 + $0x48] ss:$16 sps:$4 sm:$0xff]   ;;  %v4539_v7 = vld [vmem:[%s6928_s2 + $0x6c] ss:$16 sps:$4 sm:$0xff]  }
  0x1c   :  { %520 = vmatpush1.bf16.msra.mxu0 %v4269_v26  ;;  %7269 = vst [vmem:[#allocation18_spill] sm:$0xff] %v4533_v5  ;;  %7270 = vst [vmem:[#allocation19_spill] sm:$0xff] %v4539_v7  ;;  %v4551_v10 = vld [vmem:[%s6928_s2 + $0x8c] ss:$16 sps:$4 sm:$0xff]   ;;  %v4557_v11 = vld [vmem:[%s6928_s2 + $0x88] ss:$16 sps:$4 sm:$0xff]  }
  0x1d   :  { %521 = vmatprep.subr.bf16.mxu0 %v4275_v27  ;;  %7272 = vst [vmem:[#allocation21_spill] sm:$0xff] %v4551_v10  ;;  %7273 = vst [vmem:[#allocation22_spill] sm:$0xff] %v4557_v11  ;;  %v4569_v19 = vld [vmem:[%s6928_s2 + $0xa8] ss:$16 sps:$4 sm:$0xff]   ;;  %v4575_v21 = vld [vmem:[%s6928_s2 + $0xcc] ss:$16 sps:$4 sm:$0xff]  }
  0x1e   :  { %7275 = vst [vmem:[#allocation24_spill] sm:$0xff] %v4569_v19  ;;  %7276 = vst [vmem:[#allocation25_spill] sm:$0xff] %v4575_v21 }
  0x20   :  { %522 = vmatpush1.bf16.msra.mxu0 %v4284_v28 }
  0x21   :  { %781 = vmatprep.subr.bf16.mxu0 %v4291_v29 }
  0x22   :  { %3407 = vmatmul.mubr.msk.bf16.gmra.mrb[12].mxu1 %vm134_vm0, %v4296_v30 }
  0x23   :  { %540 = vmatmul.mubr.bf16.vlgmr.msra.gmra.mrb[0].mxu0 %v6937_v1  ;;  %252 = vmatprep.mubr.bf16.mxu1 %v6937_v1 }
  0x24   :  { %782 = vmatpush1.bf16.msra.mxu0 %v4302_v31  ;;  %813 = vmatprep.mubr.bf16.mxu0 %v6937_v1 }
  0x25   :  { %783 = vmatprep.subr.bf16.mxu0 %v4308_v32 }
  0x28   :  { %784 = vmatpush1.bf16.msra.mxu0 %v4317_v33 }
  0x29   :  { %785 = vmatprep.subr.bf16.mxu0 %v4324_v34 }
  0x2a   :  { %3408 = vmatmul.mubr.msk.bf16.vlgmr.msra.gmra.mrb[16].mxu1 %vm134_vm0, %v4177_v9  ;;  %v4545_v9 = vld [vmem:[%s6928_s2 + $0x68] ss:$16 sps:$4 sm:$0xff]  }
  0x2b   :  { %549 = vmatpush1.bf16.msra.mxu1 %v4330_v35  ;;  %262 = vmatprep.mubr.bf16.mxu1 %v6937_v1  ;;  %7271 = vst [vmem:[#allocation20_spill] sm:$0xff] %v4545_v9 }
  0x2c   :  { %786 = vmatpush1.bf16.msra.mxu0 %v4335_v36  ;;  %550 = vmatprep.subr.bf16.mxu1 %v4341_v37 }
  0x2d   :  { %787 = vmatprep.subr.bf16.mxu0 %v4347_v38 }
  0x2f   :  { %551 = vmatpush1.bf16.msra.mxu1 %v4354_v39 }
  0x30   :  { %788 = vmatpush1.bf16.msra.mxu0 %v4359_v40  ;;  %552 = vmatprep.subr.bf16.mxu1 %v4366_v41 }
  0x31   :  { %789 = vmatprep.subr.bf16.mxu0 %v4373_v42 }
  0x32   :  { %3409 = vmatmul.mubr.msk.bf16.gmra.mrb[20].mxu1 %vm134_vm0, %v4220_v17  ;;  %v4563_v17 = vld [vmem:[%s6928_s2 + $0xac] ss:$16 sps:$4 sm:$0xff]  }
  0x33   :  { %553 = vmatpush1.bf16.msra.mxu1 %v4379_v43  ;;  %272 = vmatprep.mubr.bf16.mxu1 %v6937_v1  ;;  %7274 = vst [vmem:[#allocation23_spill] sm:$0xff] %v4563_v17 }
  0x34   :  { %790 = vmatpush1.bf16.msra.mxu0 %v4384_v44  ;;  %554 = vmatprep.subr.bf16.mxu1 %v4391_v45 }
  0x35   :  { %791 = vmatprep.subr.bf16.mxu0 %v4398_v46 }
  0x37   :  { %555 = vmatpush1.bf16.msra.mxu1 %v4407_v47 }
  0x38   :  { %792 = vmatpush1.bf16.msra.mxu0 %v4412_v48  ;;  %556 = vmatprep.subr.bf16.mxu1 %v4419_v49 }
  0x39   :  { %793 = vmatprep.subr.bf16.mxu0 %v4424_v50  ;;  %v54_v50 = vlaneseq }
  0x3a   :  { %3410 = vmatmul.mubr.msk.bf16.gmra.mrb[24].mxu1 %vm134_vm0, %v4258_v24  ;;  %v4581_v24 = vld [vmem:[%s6928_s2 + $0xc8] ss:$16 sps:$4 sm:$0xff]  }
  0x3b   :  { %557 = vmatpush1.bf16.msra.mxu1 %v4432_v51  ;;  %282 = vmatprep.mubr.bf16.mxu1 %v6937_v1  ;;  %7277 = vst [vmem:[#allocation26_spill] sm:$0xff] %v4581_v24 }
  0x3c   :  { %794 = vmatpush1.bf16.msra.mxu0 %v4437_v52  ;;  %558 = vmatprep.subr.bf16.mxu1 %v4444_v53  ;;  %v4631_v52 = vld [vmem:[%s6929_s4 + $0x2c] ss:$16 sps:$4 sm:$0xff]  }
  0x3d   :  { %795 = vmatprep.subr.bf16.mxu0 %v4449_v54  ;;  %v4602_v54 = vld [vmem:[%s6929_s4 + $0x4] ss:$16 sps:$4 sm:$0xff]   ;;  %7286 = vst [vmem:[#allocation34_spill] sm:$0xff] %v4631_v52 }
  0x3e   :  { %7281 = vst [vmem:[#allocation29_spill] sm:$0xff] %v4602_v54 }
  0x3f   :  { %559 = vmatpush1.bf16.msra.mxu1 %v4458_v55 }
  0x40   :  { %796 = vmatpush1.bf16.msra.mxu0 %v4463_v56  ;;  %560 = vmatprep.subr.bf16.mxu1 %v4470_v57  ;;  %v7280_v56 = vmov 0  }
  0x41   :  { %1078 = vmatprep.subr.bf16.mxu0 %v4602_v54  ;;  %v4626_v54 = vld [vmem:[%s6929_s4 + $0x24] ss:$16 sps:$4 sm:$0xff]  }
  0x42   :  { %3411 = vmatmul.mubr.msk.bf16.gmra.mrb[28].mxu1 %vm134_vm0, %v4296_v30  ;;  %v4587_v30 = vld [vmem:[%s6928_s2 + $0xec] ss:$16 sps:$4 sm:$0xff]   ;;  %7285 = vst [vmem:[#allocation33_spill] sm:$0xff] %v4626_v54 }
  0x43   :  { %814 = vmatmul.mubr.bf16.vlgmr.msra.gmra.mrb[4].mxu0 %v6937_v1  ;;  %561 = vmatpush1.bf16.msra.mxu1 %v4478_v58  ;;  %7278 = vst [vmem:[#allocation27_spill] sm:$0xff] %v4587_v30 }
  0x44   :  { %580 = vmatprep.mubr.bf16.mxu1 %v6937_v1  ;;  %562 = vmatprep.subr.bf16.mxu1 %v4484_v59 }
  0x45   :  { %1110 = vmatprep.mubr.bf16.mxu0 %v6937_v1 }
  0x47   :  { %563 = vmatpush1.bf16.msra.mxu1 %v4493_v60 }
  0x48   :  { %822 = vmatprep.subr.bf16.mxu1 %v4500_v61 }
  0x4a   :  { %581 = vmatmul.mubr.bf16.vlgmr.msra.gmra.mrb[32].mxu1 %v6937_v1 }
  0x4b   :  { %823 = vmatpush1.bf16.msra.mxu1 %v4507_v62  ;;  %854 = vmatprep.mubr.bf16.mxu1 %v6937_v1  ;;  %v4593_v1 = vld [vmem:[%s6928_s2 + $0xe8] ss:$16 sps:$4 sm:$0xff]  }
  0x4c   :  { %824 = vmatprep.subr.bf16.mxu1 %v4513_v63  ;;  %7279 = vst [vmem:[#allocation28_spill] sm:$0xff] %v4593_v1 }
  0x4f   :  { %825 = vmatpush1.bf16.msra.mxu1 %v4520_v0 }
  0x50   :  { %826 = vmatprep.subr.bf16.mxu1 %v4527_v3 }
  0x53   :  { %827 = vmatpush1.bf16.msra.mxu1 %v4533_v5 }
  0x54   :  { %828 = vmatprep.subr.bf16.mxu1 %v4539_v7 }
  0x57   :  { %829 = vmatpush1.bf16.msra.mxu1 %v4545_v9 }
  0x58   :  { %830 = vmatprep.subr.bf16.mxu1 %v4551_v10 }
  0x5b   :  { %831 = vmatpush1.bf16.msra.mxu1 %v4557_v11 }
  0x5c   :  { %832 = vmatprep.subr.bf16.mxu1 %v4563_v17 }
  0x5f   :  { %833 = vmatpush1.bf16.msra.mxu1 %v4569_v19  ;;  %v4763_v19 = vshrl.u32 %v54_v50, 7  ;;  %v4782_v50 = vld [vmem:[%s6929_s4 + $0xe0] ss:$16 sps:$4 sm:$0xff]  }
  0x60   :  { %834 = vmatprep.subr.bf16.mxu1 %v4575_v21  ;;  %v4636_v21 = vld [vmem:[%s6929_s4 + $0x20] ss:$16 sps:$4 sm:$0xff]   ;;  %7311 = vst [vmem:[#allocation59_spill] sm:$0xff] %v4782_v50 }
  0x61   :  { %7287 = vst [vmem:[#allocation35_spill] sm:$0xff] %v4636_v21  ;;  %v7023_v7 = vsub.s32 3, %v4763_v19 }
  0x63   :  { %835 = vmatpush1.bf16.msra.mxu1 %v4581_v24  ;;  %v4607_v24 = vld [vmem:[%s6929_s4 + $0xc] ss:$16 sps:$4 sm:$0xff]  }
  0x64   :  { %836 = vmatprep.subr.bf16.mxu1 %v4587_v30  ;;  %7282 = vst [vmem:[#allocation30_spill] sm:$0xff] %v4607_v24  ;;  %v4618_v30 = vld [vmem:[%s6929_s4 + $0x8] ss:$16 sps:$4 sm:$0xff]  }
  0x65   :  { %7284 = vst [vmem:[#allocation32_spill] sm:$0xff] %v4618_v30 }
  0x67   :  { %837 = vmatpush1.bf16.msra.mxu1 %v4593_v1  ;;  %v4613_v1 = vld [vmem:[%s6929_s4] ss:$16 sps:$4 sm:$0xff]  }
  0x68   :  { %7283 = vst [vmem:[#allocation31_spill] sm:$0xff] %v4613_v1  ;;  %1119 = vmatprep.subr.bf16.mxu1 %v4607_v24  ;;  %1079 = vmatpush1.bf16.msra.mxu0 %v4613_v1  ;;  %v4641_v1 = vld [vmem:[%s6929_s4 + $0x28] ss:$16 sps:$4 sm:$0xff]   ;;  %v4655_v24 = vld [vmem:[%s6929_s4 + $0x4c] ss:$16 sps:$4 sm:$0xff]  }
  0x69   :  { %7288 = vst [vmem:[#allocation36_spill] sm:$0xff] %v4641_v1  ;;  %1080 = vmatprep.subr.bf16.mxu0 %v4626_v54  ;;  %7290 = vst [vmem:[#allocation38_spill] sm:$0xff] %v4655_v24  ;;  %v4660_v54 = vld [vmem:[%s6929_s4 + $0x40] ss:$16 sps:$4 sm:$0xff]  }
  0x6a   :  { %855 = vmatmul.mubr.bf16.vlgmr.msra.gmra.mrb[36].mxu1 %v7280_v56  ;;  %7291 = vst [vmem:[#allocation39_spill] sm:$0xff] %v4660_v54 }
  0x6b   :  { %1151 = vmatprep.mubr.bf16.mxu1 %v7280_v56  ;;  %1120 = vmatpush1.bf16.msra.mxu1 %v4618_v30  ;;  %v4650_v30 = vld [vmem:[%s6929_s4 + $0x44] ss:$16 sps:$4 sm:$0xff]  }
  0x6c   :  { %1121 = vmatprep.subr.bf16.mxu1 %v4631_v52  ;;  %1081 = vmatpush1.bf16.msra.mxu0 %v4636_v21  ;;  %7289 = vst [vmem:[#allocation37_spill] sm:$0xff] %v4650_v30  ;;  %v4665_v21 = vld [vmem:[%s6929_s4 + $0x48] ss:$16 sps:$4 sm:$0xff]   ;;  %v4679_v52 = vld [vmem:[%s6929_s4 + $0x6c] ss:$16 sps:$4 sm:$0xff]  }
  0x6d   :  { %7292 = vst [vmem:[#allocation40_spill] sm:$0xff] %v4665_v21  ;;  %1082 = vmatprep.subr.bf16.mxu0 %v4650_v30  ;;  %7294 = vst [vmem:[#allocation42_spill] sm:$0xff] %v4679_v52  ;;  %v4684_v30 = vld [vmem:[%s6929_s4 + $0x60] ss:$16 sps:$4 sm:$0xff]  }
  0x6e   :  { %7295 = vst [vmem:[#allocation43_spill] sm:$0xff] %v4684_v30 }
  0x6f   :  { %1122 = vmatpush1.bf16.msra.mxu1 %v4641_v1  ;;  %v4674_v1 = vld [vmem:[%s6929_s4 + $0x64] ss:$16 sps:$4 sm:$0xff]  }
  0x70   :  { %1123 = vmatprep.subr.bf16.mxu1 %v4655_v24  ;;  %1083 = vmatpush1.bf16.msra.mxu0 %v4660_v54  ;;  %7293 = vst [vmem:[#allocation41_spill] sm:$0xff] %v4674_v1  ;;  %v4689_v54 = vld [vmem:[%s6929_s4 + $0x68] ss:$16 sps:$4 sm:$0xff]   ;;  %v4703_v24 = vld [vmem:[%s6929_s4 + $0x8c] ss:$16 sps:$4 sm:$0xff]  }
  0x71   :  { %7296 = vst [vmem:[#allocation44_spill] sm:$0xff] %v4689_v54  ;;  %1084 = vmatprep.subr.bf16.mxu0 %v4674_v1  ;;  %7298 = vst [vmem:[#allocation46_spill] sm:$0xff] %v4703_v24  ;;  %v4708_v1 = vld [vmem:[%s6929_s4 + $0x80] ss:$16 sps:$4 sm:$0xff]  }
  0x72   :  { %7299 = vst [vmem:[#allocation47_spill] sm:$0xff] %v4708_v1 }
  0x73   :  { %1124 = vmatpush1.bf16.msra.mxu1 %v4665_v21  ;;  %v4698_v21 = vld [vmem:[%s6929_s4 + $0x84] ss:$16 sps:$4 sm:$0xff]  }
  0x74   :  { %1125 = vmatprep.subr.bf16.mxu1 %v4679_v52  ;;  %1085 = vmatpush1.bf16.msra.mxu0 %v4684_v30  ;;  %7297 = vst [vmem:[#allocation45_spill] sm:$0xff] %v4698_v21  ;;  %v4713_v30 = vld [vmem:[%s6929_s4 + $0x88] ss:$16 sps:$4 sm:$0xff]   ;;  %v4725_v52 = vld [vmem:[%s6929_s4 + $0xac] ss:$16 sps:$4 sm:$0xff]  }
  0x75   :  { %7300 = vst [vmem:[#allocation48_spill] sm:$0xff] %v4713_v30  ;;  %1086 = vmatprep.subr.bf16.mxu0 %v4698_v21  ;;  %7302 = vst [vmem:[#allocation50_spill] sm:$0xff] %v4725_v52  ;;  %v4732_v21 = vld [vmem:[%s6929_s4 + $0xa0] ss:$16 sps:$4 sm:$0xff]  }
  0x76   :  { %7303 = vst [vmem:[#allocation51_spill] sm:$0xff] %v4732_v21 }
  0x77   :  { %1126 = vmatpush1.bf16.msra.mxu1 %v4689_v54  ;;  %v4720_v54 = vld [vmem:[%s6929_s4 + $0xa4] ss:$16 sps:$4 sm:$0xff]  }
  0x78   :  { %1127 = vmatprep.subr.bf16.mxu1 %v4703_v24  ;;  %7301 = vst [vmem:[#allocation49_spill] sm:$0xff] %v4720_v54  ;;  %1087 = vmatpush1.bf16.msra.mxu0 %v4708_v1  ;;  %v4737_v24 = vld [vmem:[%s6929_s4 + $0xa8] ss:$16 sps:$4 sm:$0xff]   ;;  %v4744_v1 = vld [vmem:[%s6929_s4 + $0xc4] ss:$16 sps:$4 sm:$0xff]  }
  0x79   :  { %7304 = vst [vmem:[#allocation52_spill] sm:$0xff] %v4737_v24  ;;  %1088 = vmatprep.subr.bf16.mxu0 %v4720_v54  ;;  %7305 = vst [vmem:[#allocation53_spill] sm:$0xff] %v4744_v1  ;;  %v4756_v54 = vld [vmem:[%s6929_s4 + $0xc0] ss:$16 sps:$4 sm:$0xff]  }
  0x7a   :  { %7307 = vst [vmem:[#allocation55_spill] sm:$0xff] %v4756_v54 }
  0x7b   :  { %1128 = vmatpush1.bf16.msra.mxu1 %v4713_v30  ;;  %v4749_v30 = vld [vmem:[%s6929_s4 + $0xcc] ss:$16 sps:$4 sm:$0xff]  }
  0x7c   :  { %1129 = vmatprep.subr.bf16.mxu1 %v4725_v52  ;;  %7306 = vst [vmem:[#allocation54_spill] sm:$0xff] %v4749_v30  ;;  %1089 = vmatpush1.bf16.msra.mxu0 %v4732_v21  ;;  %v4761_v52 = vld [vmem:[%s6929_s4 + $0xc8] ss:$16 sps:$4 sm:$0xff]   ;;  %v4775_v21 = vld [vmem:[%s6929_s4 + $0xec] ss:$16 sps:$4 sm:$0xff]  }
  0x7d   :  { %7308 = vst [vmem:[#allocation56_spill] sm:$0xff] %v4761_v52  ;;  %1090 = vmatprep.subr.bf16.mxu0 %v4744_v1  ;;  %7310 = vst [vmem:[#allocation58_spill] sm:$0xff] %v4775_v21  ;;  %v7009_v1 = vsub.s32 0, %v4763_v19 }
  0x7f   :  { %1130 = vmatpush1.bf16.msra.mxu1 %v4737_v24  ;;  %v4770_v24 = vld [vmem:[%s6929_s4 + $0xe4] ss:$16 sps:$4 sm:$0xff]  }
  0x80   :  { %1131 = vmatprep.subr.bf16.mxu1 %v4749_v30  ;;  %7309 = vst [vmem:[#allocation57_spill] sm:$0xff] %v4770_v24  ;;  %1091 = vmatpush1.bf16.msra.mxu0 %v4756_v54  ;;  %v4787_v30 = vld [vmem:[%s6929_s4 + $0xe8] ss:$16 sps:$4 sm:$0xff]   ;;  %v7013_v54 = vsub.s32 1, %v4763_v19 }
  0x81   :  { %7312 = vst [vmem:[#allocation60_spill] sm:$0xff] %v4787_v30  ;;  %1092 = vmatprep.subr.bf16.mxu0 %v4770_v24 }
  0x83   :  { %1132 = vmatpush1.bf16.msra.mxu1 %v4761_v52  ;;  %v52_v52 = vld [vmem:[%s6930_s3] sm:$0xf] }
  0x84   :  { %1133 = vmatprep.subr.bf16.mxu1 %v4775_v21  ;;  %1093 = vmatpush1.bf16.msra.mxu0 %v4782_v50  ;;  %v4802_v17 = vrot.slane %v52_v52, %v7009_v1  ;;  %v61_v21 = vrot.slane %v52_v52, %v7013_v54 }
  0x85   :  { %1183 = vmatprep.subr.bf16.mxu0 %v4145_v2 }
  0x87   :  { %1134 = vmatpush1.bf16.msra.mxu1 %v4787_v30 }
  0x88   :  { %1224 = vmatprep.subr.bf16.mxu1 %v4263_v25 }
  0xdd   :  { %v4796_v48 = vpop.f32.mrb[0].mxu1 }
  0xde   :  { %v4804_v46 = vpop.f32.mrb[1].mxu1 }
  0xdf   :  { %v185_v24 = vpop.f32.mrb[2].mxu1 }
  0xe0   :  { %v4811_v11 = vadd.f32 %v185_v24, %v4802_v17  ;;  %v187_v50 = vpop.f32.mrb[3].mxu1 }
  0xe1   :  { %v4813_v44 = vadd.f32 %v187_v50, %v61_v21 }
  0xe2   :  { %7313 = vst [vmem:[#allocation61_spill] sm:$0xff] %v4811_v11 }
  0xe3   :  { %7314 = vst [vmem:[#allocation62_spill] sm:$0xff] %v4813_v44 }
  0xe5   :  { %v191_v30 = vpop.f32.mrb[4].mxu1 }
  0xe6   :  { %v4816_v1 = vadd.f32 %v191_v30, %v4802_v17  ;;  %v193_v10 = vpop.f32.mrb[5].mxu1 }
  0xe7   :  { %v4818_v42 = vadd.f32 %v193_v10, %v61_v21  ;;  %v195_v2 = vpop.f32.mrb[6].mxu1 }
  0xe8   :  { %7315 = vst [vmem:[#allocation63_spill] sm:$0xff] %v4816_v1  ;;  %v4821_v25 = vadd.f32 %v195_v2, %v4802_v17  ;;  %v197_v9 = vpop.f32.mrb[7].mxu1 }
  0xe9   :  { %7316 = vst [vmem:[#allocation64_spill] sm:$0xff] %v4818_v42  ;;  %v4823_v54 = vadd.f32 %v197_v9, %v61_v21 }
  0xea   :  { %7317 = vst [vmem:[#allocation65_spill] sm:$0xff] %v4821_v25 }
  0xeb   :  { %7318 = vst [vmem:[#allocation66_spill] sm:$0xff] %v4823_v54 }
  0xed   :  { %v201_v40 = vpop.f32.mrb[8].mxu1 }
  0xee   :  { %v4826_v24 = vadd.f32 %v201_v40, %v4802_v17  ;;  %v203_v50 = vpop.f32.mrb[9].mxu1 }
  0xef   :  { %v4828_v44 = vadd.f32 %v203_v50, %v61_v21  ;;  %v205_v11 = vpop.f32.mrb[10].mxu1 }
  0xf0   :  { %7319 = vst [vmem:[#allocation67_spill] sm:$0xff] %v4826_v24  ;;  %v4831_v30 = vadd.f32 %v205_v11, %v4802_v17  ;;  %v207_v10 = vpop.f32.mrb[11].mxu1 }
  0xf1   :  { %7320 = vst [vmem:[#allocation68_spill] sm:$0xff] %v4828_v44  ;;  %v4833_v42 = vadd.f32 %v207_v10, %v61_v21 }
  0xf2   :  { %7321 = vst [vmem:[#allocation69_spill] sm:$0xff] %v4831_v30 }
  0xf3   :  { %7322 = vst [vmem:[#allocation70_spill] sm:$0xff] %v4833_v42  ;;  %v7020_v42 = vsub.s32 2, %v4763_v19 }
  0xf5   :  { %v211_v1 = vpop.f32.mrb[12].mxu1 }
  0xf6   :  { %v4835_v2 = vpop.f32.mrb[0].mxu0  ;;  %v4838_v9 = vadd.f32 %v211_v1, %v4802_v17  ;;  %v213_v54 = vpop.f32.mrb[13].mxu1 }
  0xf7   :  { %v4840_v25 = vpop.f32.mrb[1].mxu0  ;;  %v4842_v40 = vadd.f32 %v213_v54, %v61_v21  ;;  %v215_v50 = vpop.f32.mrb[14].mxu1  ;;  %v69_v54 = vrot.slane %v52_v52, %v7023_v7 }
  0xf8   :  { %7323 = vst [vmem:[#allocation71_spill] sm:$0xff] %v4838_v9  ;;  %v545_v44 = vpop.f32.mrb[2].mxu0  ;;  %v4845_v24 = vadd.f32 %v215_v50, %v4802_v17  ;;  %v217_v11 = vpop.f32.mrb[15].mxu1  ;;  %v65_v9 = vrot.slane %v52_v52, %v7020_v42 }
  0xf9   :  { %7324 = vst [vmem:[#allocation72_spill] sm:$0xff] %v4842_v40  ;;  %v546_v30 = vpop.f32.mrb[3].mxu0  ;;  %v4847_v10 = vadd.f32 %v217_v11, %v61_v21 }
  0xfa   :  { %7325 = vst [vmem:[#allocation73_spill] sm:$0xff] %v4845_v24 }
  0xfb   :  { %7326 = vst [vmem:[#allocation74_spill] sm:$0xff] %v4847_v10 }
  0xfd   :  { %v254_v1 = vpop.f32.mrb[16].mxu1 }
  0xfe   :  { %v256_v38 = vpop.f32.mrb[17].mxu1 }
  0xff   :  { %v258_v44 = vpop.f32.mrb[18].mxu1 }
 0x100   :  { %v4855_v40 = vadd.f32 %v258_v44, %v65_v9  ;;  %v260_v50 = vpop.f32.mrb[19].mxu1 }
 0x101   :  { %v4857_v24 = vadd.f32 %v260_v50, %v69_v54 }
 0x102   :  { %7327 = vst [vmem:[#allocation75_spill] sm:$0xff] %v4855_v40 }
 0x103   :  { %7328 = vst [vmem:[#allocation76_spill] sm:$0xff] %v4857_v24 }
 0x105   :  { %v264_v30 = vpop.f32.mrb[20].mxu1 }
 0x106   :  { %v4859_v11 = vadd.f32 %v264_v30, %v65_v9  ;;  %v266_v10 = vpop.f32.mrb[21].mxu1 }
 0x107   :  { %v4861_v5 = vadd.f32 %v266_v10, %v69_v54  ;;  %v268_v36 = vpop.f32.mrb[22].mxu1  ;;  %v182_v10 = vadd.f32 %v4796_v48, %v4802_v17 }
 0x108   :  { %7329 = vst [vmem:[#allocation77_spill] sm:$0xff] %v4859_v11  ;;  %v4863_v3 = vadd.f32 %v268_v36, %v65_v9  ;;  %v270_v42 = vpop.f32.mrb[23].mxu1  ;;  %v184_v36 = vadd.f32 %v4804_v46, %v61_v21 }
 0x109   :  { %7330 = vst [vmem:[#allocation78_spill] sm:$0xff] %v4861_v5  ;;  %v4865_v34 = vadd.f32 %v270_v42, %v69_v54 }
 0x10a   :  { %7331 = vst [vmem:[#allocation79_spill] sm:$0xff] %v4863_v3 }
 0x10b   :  { %7332 = vst [vmem:[#allocation80_spill] sm:$0xff] %v4865_v34 }
 0x10d   :  { %v274_v0 = vpop.f32.mrb[24].mxu1 }
 0x10e   :  { %v4867_v52 = vadd.f32 %v274_v0, %v65_v9  ;;  %v276_v44 = vpop.f32.mrb[25].mxu1 }
 0x10f   :  { %v4869_v7 = vadd.f32 %v276_v44, %v69_v54  ;;  %v278_v50 = vpop.f32.mrb[26].mxu1 }
 0x110   :  { %7333 = vst [vmem:[#allocation81_spill] sm:$0xff] %v4867_v52  ;;  %v4871_v24 = vadd.f32 %v278_v50, %v65_v9  ;;  %v280_v30 = vpop.f32.mrb[27].mxu1 }
 0x111   :  { %7334 = vst [vmem:[#allocation82_spill] sm:$0xff] %v4869_v7  ;;  %v4873_v11 = vadd.f32 %v280_v30, %v69_v54 }
 0x112   :  { %7335 = vst [vmem:[#allocation83_spill] sm:$0xff] %v4871_v24 }
 0x113   :  { %7336 = vst [vmem:[#allocation84_spill] sm:$0xff] %v4873_v11 }
 0x115   :  { %v284_v3 = vpop.f32.mrb[28].mxu1 }
 0x116   :  { %v815_v42 = vpop.f32.mrb[4].mxu0  ;;  %v4878_v34 = vadd.f32 %v284_v3, %v65_v9  ;;  %v286_v52 = vpop.f32.mrb[29].mxu1 }
 0x117   :  { %v863_v0 = vadd.f32 %v815_v42, %v182_v10  ;;  %v817_v5 = vpop.f32.mrb[5].mxu0  ;;  %v4880_v44 = vadd.f32 %v286_v52, %v69_v54  ;;  %v288_v50 = vpop.f32.mrb[30].mxu1  ;;  %v255_v52 = vadd.f32 %v254_v1, %v65_v9 }
 0x118   :  { %7337 = vst [vmem:[#allocation85_spill] sm:$0xff] %v4878_v34  ;;  %v864_v7 = vadd.f32 %v817_v5, %v184_v36  ;;  %v819_v24 = vpop.f32.mrb[6].mxu0  ;;  %v4882_v40 = vadd.f32 %v288_v50, %v65_v9  ;;  %v290_v30 = vpop.f32.mrb[31].mxu1  ;;  %v257_v5 = vadd.f32 %v256_v38, %v69_v54 }
 0x119   :  { %7338 = vst [vmem:[#allocation86_spill] sm:$0xff] %v4880_v44  ;;  %v820_v11 = vpop.f32.mrb[7].mxu0  ;;  %v4884_v33 = vadd.f32 %v290_v30, %v69_v54  ;;  %v867_v10 = vmul.f32 0.5, %v863_v0 }
 0x11a   :  { %7339 = vst [vmem:[#allocation87_spill] sm:$0xff] %v4882_v40  ;;  %v868_v21 = vmul.f32 0.5, %v864_v7 }
 0x11b   :  { %7340 = vst [vmem:[#allocation88_spill] sm:$0xff] %v4884_v33 }
 0x11c   :  { %3724 = vtanh.f32 %v868_v21 }
 0x11d   :  { %v4886_v48 = vpop.f32.mrb[32].mxu1  ;;  %3726 = vtanh.f32 %v867_v10 }
 0x11e   :  { %v4888_v46 = vpop.f32.mrb[33].mxu1 }
 0x11f   :  { %v586_v3 = vpop.f32.mrb[34].mxu1 }
 0x120   :  { %v587_v17 = vpop.f32.mrb[35].mxu1 }
 0x126   :  { %v3725_v30 = vpop.eup %3724 }
 0x127   :  { %v3727_v33 = vpop.eup %3726  ;;  %v874_v44 = vmul.f32 0.5, %v3725_v30 }
 0x128   :  { %v873_v63 = vmul.f32 0.5, %v3727_v33  ;;  %v7343_v33 = vsub.s32 3, %v4763_v19 }
 0x129   :  { %v877_v3 = vadd.f32 0.5, %v874_v44 }
 0x12a   :  { %v876_v7 = vadd.f32 0.5, %v873_v63  ;;  %v7344_v63 = vsub.s32 2, %v4763_v19 }
 0x12b   :  { %v880_v17 = vmul.f32 0.0, %v877_v3 }
 0x13d   :  { %v856_v36 = vpop.f32.mrb[36].mxu1 }
 0x13e   :  { %v865_v24 = vadd.f32 %v856_v36, %v255_v52  ;;  %v858_v42 = vpop.f32.mrb[37].mxu1 }
 0x13f   :  { %v866_v50 = vadd.f32 %v858_v42, %v257_v5  ;;  %v860_v40 = vpop.f32.mrb[38].mxu1 }
 0x140   :  { %v861_v11 = vpop.f32.mrb[39].mxu1  ;;  %v869_v34 = vmul.f32 0.5, %v865_v24 }
 0x141   :  { %3728 = vtanh.f32 %v866_v50 }
 0x142   :  { %3730 = vtanh.f32 %v869_v34 }
 0x14b   :  { %v3729_v0 = vpop.eup %3728 }
 0x14c   :  { %v881_v21 = vmul.f32 %v3729_v0, %v876_v7  ;;  %v3731_v38 = vpop.eup %3730 }
 0x14d   :  { %v875_v1 = vmul.f32 0.5, %v3731_v38 }
 0x14e   :  { %v4890_v9 = vadd.f32 %v881_v21, %v880_v17 }
 0x14f   :  { %v878_v40 = vadd.f32 0.5, %v875_v1  ;;  %v7346_v1 = vld [vmem:[#allocation15_spill] sm:$0xff] }
 0x150   :  { %3732 = vtanh.f32 %v4890_v9 }
 0x15a   :  { %v3733_v54 = vpop.eup %3732 }
 0x15b   :  { %v884_v10 = vmul.f32 %v3733_v54, %v878_v40  ;;  %v7347_v40 = vld [vmem:[#allocation2_spill] sm:$0xff]  ;;  %v7348_v54 = vld [vmem:[#allocation16_spill] sm:$0xff] }
 0x15d   :  { %v4893_v52 = vpack.c.bf16 %v884_v10, %v884_v10  ;;  %v7349_v10 = vld [vmem:[#allocation3_spill] sm:$0xff] }
 0x15f   :  { %1111 = vmatmul.mubr.bf16.vlgmr.msra.gmra.mrb[8].mxu0 %v4893_v52  ;;  %1152 = vmatmul.mubr.bf16.vlgmr.msra.gmra.mrb[40].mxu1 %v4893_v52 }
 0x160   :  { %1184 = vmatpush1.bf16.msra.mxu0 %v4153_v4  ;;  %1225 = vmatpush1.bf16.msra.mxu1 %v4330_v35  ;;  %v293_v4 = vld [vmem:[%s6931_s6] sm:$0xf] }
 0x161   :  { %1185 = vmatprep.subr.bf16.mxu0 %v4163_v6  ;;  %1226 = vmatprep.subr.bf16.mxu1 %v4341_v37  ;;  %v7341_v6 = vsub.s32 0, %v4763_v19  ;;  %v4949_v34 = vrot.slane %v293_v4, %v7343_v33  ;;  %v7367_v33 = vld [vmem:[#allocation12_spill] sm:$0xff] }
 0x162   :  { %1215 = vmatprep.mubr.bf16.mxu0 %v7280_v56  ;;  %1256 = vmatprep.mubr.bf16.mxu1 %v7280_v56 }
 0x164   :  { %1186 = vmatpush1.bf16.msra.mxu0 %v4171_v8  ;;  %1227 = vmatpush1.bf16.msra.mxu1 %v4354_v39  ;;  %v4936_v8 = vrot.slane %v293_v4, %v7341_v6  ;;  %v7351_v6 = vld [vmem:[#allocation4_spill] sm:$0xff] }
 0x165   :  { %1187 = vmatprep.subr.bf16.mxu0 %v4189_v12  ;;  %1228 = vmatprep.subr.bf16.mxu1 %v4366_v41 }
 0x168   :  { %1188 = vmatpush1.bf16.msra.mxu0 %v4194_v13  ;;  %1229 = vmatpush1.bf16.msra.mxu1 %v4379_v43 }
 0x169   :  { %1189 = vmatprep.subr.bf16.mxu0 %v4199_v14  ;;  %1230 = vmatprep.subr.bf16.mxu1 %v4391_v45  ;;  %v7342_v14 = vsub.s32 1, %v4763_v19 }
 0x16c   :  { %1190 = vmatpush1.bf16.msra.mxu0 %v4208_v15  ;;  %1231 = vmatpush1.bf16.msra.mxu1 %v4407_v47  ;;  %v4940_v15 = vrot.slane %v293_v4, %v7342_v14  ;;  %v7357_v14 = vld [vmem:[#allocation7_spill] sm:$0xff] }
 0x16d   :  { %1191 = vmatprep.subr.bf16.mxu0 %v4215_v16  ;;  %1232 = vmatprep.subr.bf16.mxu1 %v4419_v49 }
 0x170   :  { %1192 = vmatpush1.bf16.msra.mxu0 %v4225_v18  ;;  %1233 = vmatpush1.bf16.msra.mxu1 %v4432_v51 }
 0x171   :  { %1193 = vmatprep.subr.bf16.mxu0 %v4235_v20  ;;  %1234 = vmatprep.subr.bf16.mxu1 %v4444_v53 }
 0x174   :  { %1194 = vmatpush1.bf16.msra.mxu0 %v4246_v22  ;;  %1235 = vmatpush1.bf16.msra.mxu1 %v4458_v55 }
 0x175   :  { %1195 = vmatprep.subr.bf16.mxu0 %v4253_v23  ;;  %1236 = vmatprep.subr.bf16.mxu1 %v4470_v57 }
 0x178   :  { %1196 = vmatpush1.bf16.msra.mxu0 %v4269_v26  ;;  %1237 = vmatpush1.bf16.msra.mxu1 %v4478_v58 }
 0x179   :  { %1197 = vmatprep.subr.bf16.mxu0 %v4275_v27  ;;  %1238 = vmatprep.subr.bf16.mxu1 %v4484_v59 }
 0x17c   :  { %1198 = vmatpush1.bf16.msra.mxu0 %v4284_v28  ;;  %1239 = vmatpush1.bf16.msra.mxu1 %v4493_v60 }
 0x17d   :  { %1265 = vmatprep.subr.bf16.mxu0 %v4291_v29  ;;  %1306 = vmatprep.subr.bf16.mxu1 %v4500_v61 }
 0x232   :  { %v1112_v12 = vpop.f32.mrb[8].mxu0  ;;  %v1153_v13 = vpop.f32.mrb[40].mxu1 }
 0x233   :  { %v1113_v16 = vadd.f32 %v1112_v12, %v4835_v2  ;;  %v1154_v18 = vadd.f32 %v1153_v13, %v4886_v48  ;;  %v1114_v20 = vpop.f32.mrb[9].mxu0  ;;  %v1155_v22 = vpop.f32.mrb[41].mxu1  ;;  %v7355_v12 = vld [vmem:[#allocation6_spill] sm:$0xff]  ;;  %v7356_v13 = vld [vmem:[#allocation20_spill] sm:$0xff] }
 0x234   :  { %v1115_v23 = vadd.f32 %v1114_v20, %v4840_v25  ;;  %v1156_v26 = vadd.f32 %v1155_v22, %v4888_v46  ;;  %v1116_v27 = vpop.f32.mrb[10].mxu0  ;;  %v1157_v28 = vpop.f32.mrb[42].mxu1  ;;  %v4955_v25 = vrot.slane %v293_v4, %v7344_v63  ;;  %v7350_v4 = vld [vmem:[#allocation17_spill] sm:$0xff]  ;;  %v7360_v20 = vld [vmem:[#allocation22_spill] sm:$0xff] }
 0x235   :  { %v1160_v29 = vadd.f32 %v1113_v16, %v4936_v8  ;;  %v1117_v35 = vpop.f32.mrb[11].mxu0  ;;  %v1158_v37 = vpop.f32.mrb[43].mxu1  ;;  %v7358_v16 = vld [vmem:[#allocation21_spill] sm:$0xff]  ;;  %v7364_v27 = vld [vmem:[#allocation24_spill] sm:$0xff]  ;;  %v7365_v28 = vld [vmem:[#allocation11_spill] sm:$0xff] }
 0x236   :  { %v1161_v39 = vadd.f32 %v1115_v23, %v4940_v15  ;;  %v1163_v45 = vadd.f32 %v1156_v26, %v4949_v34  ;;  %v1162_v2 = vadd.f32 %v1154_v18, %v4955_v25  ;;  %v7359_v18 = vld [vmem:[#allocation8_spill] sm:$0xff]  ;;  %v7361_v22 = vld [vmem:[#allocation9_spill] sm:$0xff]  ;;  %v7362_v23 = vld [vmem:[#allocation23_spill] sm:$0xff] }
 0x237   :  { %v1164_v41 = vmul.f32 0.5, %v1160_v29  ;;  %v7363_v26 = vld [vmem:[#allocation10_spill] sm:$0xff]  ;;  %v7366_v29 = vld [vmem:[#allocation25_spill] sm:$0xff] }
 0x238   :  { %v1165_v43 = vmul.f32 0.5, %v1161_v39  ;;  %v1166_v44 = vmul.f32 0.5, %v1162_v2  ;;  %v7368_v35 = vld [vmem:[#allocation26_spill] sm:$0xff]  ;;  %v7369_v37 = vld [vmem:[#allocation13_spill] sm:$0xff]  ;;  %v7370_v39 = vld [vmem:[#allocation27_spill] sm:$0xff] }
 0x239   :  { %3734 = vtanh.f32 %v1164_v41  ;;  %v7371_v41 = vld [vmem:[#allocation14_spill] sm:$0xff]  ;;  %v7375_v2 = vld [vmem:[#allocation31_spill] sm:$0xff] }
 0x23a   :  { %3736 = vtanh.f32 %v1165_v43  ;;  %v7372_v43 = vld [vmem:[#allocation28_spill] sm:$0xff]  ;;  %v7374_v63 = vld [vmem:[#allocation30_spill] sm:$0xff] }
 0x23b   :  { %3738 = vtanh.f32 %v1163_v45  ;;  %v7373_v45 = vld [vmem:[#allocation29_spill] sm:$0xff] }
 0x23c   :  { %3740 = vtanh.f32 %v1166_v44  ;;  %v7376_v44 = vld [vmem:[#allocation32_spill] sm:$0xff] }
 0x243   :  { %v3735_v48 = vpop.eup %3734 }
 0x244   :  { %v1170_v46 = vmul.f32 0.5, %v3735_v48  ;;  %v3737_v5 = vpop.eup %3736  ;;  %v7377_v48 = vld [vmem:[#allocation33_spill] sm:$0xff] }
 0x245   :  { %v1171_v24 = vmul.f32 0.5, %v3737_v5  ;;  %v3739_v42 = vpop.eup %3738  ;;  %v7379_v5 = vld [vmem:[#allocation35_spill] sm:$0xff] }
 0x246   :  { %v1173_v36 = vadd.f32 0.5, %v1170_v46  ;;  %v3741_v19 = vpop.eup %3740  ;;  %v7378_v46 = vld [vmem:[#allocation34_spill] sm:$0xff] }
 0x247   :  { %v1174_v50 = vadd.f32 0.5, %v1171_v24  ;;  %v1172_v7 = vmul.f32 0.5, %v3741_v19  ;;  %v7381_v24 = vld [vmem:[#allocation37_spill] sm:$0xff]  ;;  %v7387_v19 = vld [vmem:[#allocation43_spill] sm:$0xff] }
 0x248   :  { %v1178_v11 = vmul.f32 %v3739_v42, %v1173_v36  ;;  %v7380_v36 = vld [vmem:[#allocation36_spill] sm:$0xff]  ;;  %v7382_v42 = vld [vmem:[#allocation38_spill] sm:$0xff] }
 0x249   :  { %v1177_v30 = vmul.f32 0.0, %v1174_v50  ;;  %v1175_v0 = vadd.f32 0.5, %v1172_v7  ;;  %v7384_v50 = vld [vmem:[#allocation40_spill] sm:$0xff] }
 0x24a   :  { %v7388_v7 = vld [vmem:[#allocation44_spill] sm:$0xff] }
 0x24b   :  { %v4958_v3 = vadd.f32 %v1178_v11, %v1177_v30  ;;  %v7385_v11 = vld [vmem:[#allocation41_spill] sm:$0xff]  ;;  %v7386_v30 = vld [vmem:[#allocation42_spill] sm:$0xff] }
 0x24d   :  { %3742 = vtanh.f32 %v4958_v3 }
 0x257   :  { %v3743_v17 = vpop.eup %3742 }
 0x258   :  { %v4961_v21 = vmul.f32 %v3743_v17, %v1175_v0  ;;  %v7389_v0 = vld [vmem:[#allocation45_spill] sm:$0xff]  ;;  %v7390_v17 = vld [vmem:[#allocation46_spill] sm:$0xff] }
 0x25a   :  { %7345 = vst [vmem:[#allocation89_spill] sm:$0xff] %v4961_v21  ;;  %v1182_v38 = vpack.c.bf16 %v4961_v21, %v4961_v21 }
 0x25c   :  { %1216 = vmatmul.mubr.bf16.vlgmr.msra.gmra.mrb[12].mxu0 %v1182_v38  ;;  %1257 = vmatmul.mubr.bf16.vlgmr.msra.gmra.mrb[44].mxu1 %v1182_v38  ;;  %v7391_v38 = vld [vmem:[#allocation47_spill] sm:$0xff] }
 0x25d   :  { %1266 = vmatpush1.bf16.msra.mxu0 %v4302_v31  ;;  %1307 = vmatpush1.bf16.msra.mxu1 %v4507_v62  ;;  %v7352_v31 = vld [vmem:[#allocation18_spill] sm:$0xff]  ;;  %v7353_v62 = vld [vmem:[#allocation5_spill] sm:$0xff] }
 0x25e   :  { %1267 = vmatprep.subr.bf16.mxu0 %v4308_v32  ;;  %1308 = vmatprep.subr.bf16.mxu1 %v7346_v1  ;;  %v7354_v32 = vld [vmem:[#allocation19_spill] sm:$0xff]  ;;  %v7392_v1 = vld [vmem:[#allocation48_spill] sm:$0xff] }
 0x25f   :  { %1297 = vmatprep.mubr.bf16.mxu0 %v7280_v56  ;;  %1338 = vmatprep.mubr.bf16.mxu1 %v7280_v56 }
 0x261   :  { %1268 = vmatpush1.bf16.msra.mxu0 %v7347_v40  ;;  %1309 = vmatpush1.bf16.msra.mxu1 %v7348_v54  ;;  %v7393_v40 = vld [vmem:[#allocation49_spill] sm:$0xff]  ;;  %v7394_v54 = vld [vmem:[#allocation50_spill] sm:$0xff] }
 0x262   :  { %1269 = vmatprep.subr.bf16.mxu0 %v7349_v10  ;;  %1310 = vmatprep.subr.bf16.mxu1 %v7350_v4  ;;  %v7395_v10 = vld [vmem:[#allocation51_spill] sm:$0xff]  ;;  %v7396_v4 = vld [vmem:[#allocation52_spill] sm:$0xff] }
 0x265   :  { %1270 = vmatpush1.bf16.msra.mxu0 %v7351_v6  ;;  %1311 = vmatpush1.bf16.msra.mxu1 %v7352_v31  ;;  %v7397_v6 = vld [vmem:[#allocation53_spill] sm:$0xff]  ;;  %v7398_v31 = vld [vmem:[#allocation54_spill] sm:$0xff] }
 0x266   :  { %1271 = vmatprep.subr.bf16.mxu0 %v7353_v62  ;;  %1312 = vmatprep.subr.bf16.mxu1 %v7354_v32  ;;  %v7399_v62 = vld [vmem:[#allocation55_spill] sm:$0xff]  ;;  %v7400_v32 = vld [vmem:[#allocation56_spill] sm:$0xff] }
 0x269   :  { %1272 = vmatpush1.bf16.msra.mxu0 %v7355_v12  ;;  %1313 = vmatpush1.bf16.msra.mxu1 %v7356_v13  ;;  %v7401_v12 = vld [vmem:[#allocation57_spill] sm:$0xff]  ;;  %v7402_v13 = vld [vmem:[#allocation58_spill] sm:$0xff] }
 0x26a   :  { %1273 = vmatprep.subr.bf16.mxu0 %v7357_v14  ;;  %1314 = vmatprep.subr.bf16.mxu1 %v7358_v16  ;;  %v7403_v14 = vld [vmem:[#allocation59_spill] sm:$0xff]  ;;  %v7404_v16 = vld [vmem:[#allocation60_spill] sm:$0xff] }
 0x26d   :  { %1274 = vmatpush1.bf16.msra.mxu0 %v7359_v18  ;;  %1315 = vmatpush1.bf16.msra.mxu1 %v7360_v20  ;;  %v5036_v18 = vld [vmem:[%s6926_s5 + $0x4] ss:$16 sps:$4 sm:$0xff]   ;;  %v5042_v20 = vld [vmem:[%s6926_s5 + $0xc] ss:$16 sps:$4 sm:$0xff]  }
 0x26e   :  { %1275 = vmatprep.subr.bf16.mxu0 %v7361_v22  ;;  %1316 = vmatprep.subr.bf16.mxu1 %v7362_v23  ;;  %7405 = vst [vmem:[#allocation15_spill] sm:$0xff] %v5036_v18  ;;  %7406 = vst [vmem:[#allocation2_spill] sm:$0xff] %v5042_v20 }
 0x271   :  { %1276 = vmatpush1.bf16.msra.mxu0 %v7363_v26  ;;  %1317 = vmatpush1.bf16.msra.mxu1 %v7364_v27 }
 0x272   :  { %1277 = vmatprep.subr.bf16.mxu0 %v7365_v28  ;;  %1318 = vmatprep.subr.bf16.mxu1 %v7366_v29 }
 0x275   :  { %1278 = vmatpush1.bf16.msra.mxu0 %v7367_v33  ;;  %1319 = vmatpush1.bf16.msra.mxu1 %v7368_v35 }
 0x276   :  { %1279 = vmatprep.subr.bf16.mxu0 %v7369_v37  ;;  %1320 = vmatprep.subr.bf16.mxu1 %v7370_v39 }
 0x279   :  { %1280 = vmatpush1.bf16.msra.mxu0 %v7371_v41  ;;  %1321 = vmatpush1.bf16.msra.mxu1 %v7372_v43  ;;  %v7407_v41 = vld [vmem:[#allocation61_spill] sm:$0xff] }
 0x27a   :  { %1370 = vmatprep.subr.bf16.mxu0 %v7373_v45  ;;  %1411 = vmatprep.subr.bf16.mxu1 %v7374_v63  ;;  %v7408_v45 = vld [vmem:[#allocation75_spill] sm:$0xff] }
 0x27c   :  { %1298 = vmatmul.mubr.bf16.vlgmr.msra.gmra.mrb[16].mxu0 %v4893_v52  ;;  %1339 = vmatmul.mubr.bf16.vlgmr.msra.gmra.mrb[48].mxu1 %v4893_v52  ;;  %v7383_v52 = vld [vmem:[#allocation39_spill] sm:$0xff] }
 0x27d   :  { %1371 = vmatpush1.bf16.msra.mxu0 %v7375_v2  ;;  %1412 = vmatpush1.bf16.msra.mxu1 %v7376_v44 }
 0x27e   :  { %1372 = vmatprep.subr.bf16.mxu0 %v7377_v48  ;;  %1413 = vmatprep.subr.bf16.mxu1 %v7378_v46  ;;  %v7409_v48 = vld [vmem:[#allocation62_spill] sm:$0xff] }
 0x27f   :  { %1402 = vmatprep.mubr.bf16.mxu0 %v7280_v56  ;;  %1443 = vmatprep.mubr.bf16.mxu1 %v7280_v56 }
 0x281   :  { %1373 = vmatpush1.bf16.msra.mxu0 %v7379_v5  ;;  %1414 = vmatpush1.bf16.msra.mxu1 %v7380_v36  ;;  %v7410_v5 = vld [vmem:[#allocation76_spill] sm:$0xff] }
 0x282   :  { %1374 = vmatprep.subr.bf16.mxu0 %v7381_v24  ;;  %1415 = vmatprep.subr.bf16.mxu1 %v7382_v42 }
 0x285   :  { %1375 = vmatpush1.bf16.msra.mxu0 %v7383_v52  ;;  %1416 = vmatpush1.bf16.msra.mxu1 %v7384_v50 }
 0x286   :  { %1376 = vmatprep.subr.bf16.mxu0 %v7385_v11  ;;  %1417 = vmatprep.subr.bf16.mxu1 %v7386_v30 }
 0x289   :  { %1377 = vmatpush1.bf16.msra.mxu0 %v7387_v19  ;;  %1418 = vmatpush1.bf16.msra.mxu1 %v7388_v7 }
 0x28a   :  { %1378 = vmatprep.subr.bf16.mxu0 %v7389_v0  ;;  %1419 = vmatprep.subr.bf16.mxu1 %v7390_v17 }
 0x28d   :  { %1379 = vmatpush1.bf16.msra.mxu0 %v7391_v38  ;;  %1420 = vmatpush1.bf16.msra.mxu1 %v7392_v1 }
 0x28e   :  { %1380 = vmatprep.subr.bf16.mxu0 %v7393_v40  ;;  %1421 = vmatprep.subr.bf16.mxu1 %v7394_v54 }
 0x291   :  { %1381 = vmatpush1.bf16.msra.mxu0 %v7395_v10  ;;  %1422 = vmatpush1.bf16.msra.mxu1 %v7396_v4 }
 0x292   :  { %1382 = vmatprep.subr.bf16.mxu0 %v7397_v6  ;;  %1423 = vmatprep.subr.bf16.mxu1 %v7398_v31 }
 0x295   :  { %1383 = vmatpush1.bf16.msra.mxu0 %v7399_v62  ;;  %1424 = vmatpush1.bf16.msra.mxu1 %v7400_v32 }
 0x296   :  { %1384 = vmatprep.subr.bf16.mxu0 %v7401_v12  ;;  %1425 = vmatprep.subr.bf16.mxu1 %v7402_v13 }
 0x299   :  { %1385 = vmatpush1.bf16.msra.mxu0 %v7403_v14  ;;  %1426 = vmatpush1.bf16.msra.mxu1 %v7404_v16 }
 0x29a   :  { %1475 = vmatprep.subr.bf16.mxu0 %v5036_v18  ;;  %1516 = vmatprep.subr.bf16.mxu1 %v5042_v20 }
 0x32f   :  { %v5045_v22 = vpop.f32.mrb[12].mxu0  ;;  %v5047_v23 = vpop.f32.mrb[44].mxu1 }
 0x330   :  { %v5049_v26 = vpop.f32.mrb[13].mxu0  ;;  %v5051_v27 = vpop.f32.mrb[45].mxu1 }
 0x331   :  { %v1221_v28 = vpop.f32.mrb[14].mxu0  ;;  %v1262_v29 = vpop.f32.mrb[46].mxu1 }
 0x332   :  { %v1222_v33 = vpop.f32.mrb[15].mxu0  ;;  %v1263_v35 = vpop.f32.mrb[47].mxu1 }
 0x34f   :  { %v1299_v37 = vpop.f32.mrb[16].mxu0  ;;  %v1340_v39 = vpop.f32.mrb[48].mxu1 }
 0x350   :  { %v1347_v43 = vadd.f32 %v1299_v37, %v7407_v41  ;;  %v1349_v63 = vadd.f32 %v1340_v39, %v7408_v45  ;;  %v1301_v2 = vpop.f32.mrb[17].mxu0  ;;  %v1342_v44 = vpop.f32.mrb[49].mxu1 }
 0x351   :  { %v1348_v46 = vadd.f32 %v1301_v2, %v7409_v48  ;;  %v1350_v36 = vadd.f32 %v1342_v44, %v7410_v5  ;;  %v1303_v21 = vpop.f32.mrb[18].mxu0  ;;  %v1344_v20 = vpop.f32.mrb[50].mxu1  ;;  %v5080_v5 = vld [vmem:[%s6926_s5 + $0x24] ss:$16 sps:$4 sm:$0xff]  }
 0x352   :  { %v1351_v18 = vmul.f32 0.5, %v1347_v43  ;;  %v1304_v16 = vpop.f32.mrb[19].mxu0  ;;  %v1345_v28 = vpop.f32.mrb[51].mxu1  ;;  %v1353_v33 = vmul.f32 0.5, %v1349_v63 }
 0x353   :  { %v1352_v29 = vmul.f32 0.5, %v1348_v46  ;;  %v5094_v28 = vld [vmem:[%s6926_s5 + $0x20] ss:$16 sps:$4 sm:$0xff]  }
 0x354   :  { %3744 = vtanh.f32 %v1351_v18 }
 0x355   :  { %3746 = vtanh.f32 %v1352_v29  ;;  %v5100_v29 = vld [vmem:[%s6926_s5 + $0x28] ss:$16 sps:$4 sm:$0xff]  }
 0x356   :  { %3748 = vtanh.f32 %v1350_v36  ;;  %v5086_v36 = vld [vmem:[%s6926_s5 + $0x2c] ss:$16 sps:$4 sm:$0xff]  }
 0x357   :  { %3750 = vtanh.f32 %v1353_v33  ;;  %v5106_v33 = vld [vmem:[%s6926_s5 + $0x44] ss:$16 sps:$4 sm:$0xff]  }
 0x35e   :  { %v3745_v35 = vpop.eup %3744 }
 0x35f   :  { %v1357_v37 = vmul.f32 0.5, %v3745_v35  ;;  %v3747_v41 = vpop.eup %3746  ;;  %v5112_v35 = vld [vmem:[%s6926_s5 + $0x4c] ss:$16 sps:$4 sm:$0xff]  }
 0x360   :  { %v1358_v45 = vmul.f32 0.5, %v3747_v41  ;;  %v3749_v14 = vpop.eup %3748  ;;  %v5124_v41 = vld [vmem:[%s6926_s5 + $0x48] ss:$16 sps:$4 sm:$0xff]  }
 0x361   :  { %v1360_v39 = vadd.f32 0.5, %v1357_v37  ;;  %v3751_v16 = vpop.eup %3750  ;;  %v5118_v37 = vld [vmem:[%s6926_s5 + $0x40] ss:$16 sps:$4 sm:$0xff]  }
 0x362   :  { %v1361_v2 = vadd.f32 0.5, %v1358_v45  ;;  %v1359_v18 = vmul.f32 0.5, %v3751_v16  ;;  %v5136_v45 = vld [vmem:[%s6926_s5 + $0x6c] ss:$16 sps:$4 sm:$0xff]  }
 0x363   :  { %v1365_v48 = vmul.f32 %v3749_v14, %v1360_v39  ;;  %v5068_v14 = vld [vmem:[%s6926_s5] ss:$16 sps:$4 sm:$0xff]   ;;  %v5130_v39 = vld [vmem:[%s6926_s5 + $0x64] ss:$16 sps:$4 sm:$0xff]  }
 0x364   :  { %v1364_v21 = vmul.f32 %v1361_v2, %v4890_v9  ;;  %v1362_v43 = vadd.f32 0.5, %v1359_v18  ;;  %v5074_v9 = vld [vmem:[%s6926_s5 + $0x8] ss:$16 sps:$4 sm:$0xff]   ;;  %v5142_v2 = vld [vmem:[%s6926_s5 + $0x60] ss:$16 sps:$4 sm:$0xff]  }
 0x366   :  { %v5058_v20 = vadd.f32 %v1365_v48, %v1364_v21  ;;  %v5149_v48 = vld [vmem:[%s6926_s5 + $0x84] ss:$16 sps:$4 sm:$0xff]   ;;  %v5156_v21 = vld [vmem:[%s6926_s5 + $0x80] ss:$16 sps:$4 sm:$0xff]  }
 0x367   :  { %7411 = vst [vmem:[#allocation16_spill] sm:$0xff] %v5156_v21 }
 0x368   :  { %3752 = vtanh.f32 %v5058_v20 }
 0x372   :  { %v3753_v44 = vpop.eup %3752 }
 0x373   :  { %v1368_v63 = vmul.f32 %v3753_v44, %v1362_v43 }
 0x375   :  { %v5061_v46 = vpack.c.bf16 %v1368_v63, %v1368_v63 }
 0x377   :  { %1403 = vmatmul.mubr.bf16.vlgmr.msra.gmra.mrb[20].mxu0 %v5061_v46  ;;  %1444 = vmatmul.mubr.bf16.vlgmr.msra.gmra.mrb[52].mxu1 %v5061_v46 }
 0x378   :  { %1476 = vmatpush1.bf16.msra.mxu0 %v5068_v14  ;;  %1517 = vmatpush1.bf16.msra.mxu1 %v5074_v9 }
 0x379   :  { %1477 = vmatprep.subr.bf16.mxu0 %v5080_v5  ;;  %1518 = vmatprep.subr.bf16.mxu1 %v5086_v36 }
 0x37a   :  { %1507 = vmatprep.mubr.bf16.mxu0 %v7280_v56  ;;  %1548 = vmatprep.mubr.bf16.mxu1 %v7280_v56 }
 0x37c   :  { %1478 = vmatpush1.bf16.msra.mxu0 %v5094_v28  ;;  %1519 = vmatpush1.bf16.msra.mxu1 %v5100_v29 }
 0x37d   :  { %1479 = vmatprep.subr.bf16.mxu0 %v5106_v33  ;;  %1520 = vmatprep.subr.bf16.mxu1 %v5112_v35 }
 0x380   :  { %1480 = vmatpush1.bf16.msra.mxu0 %v5118_v37  ;;  %1521 = vmatpush1.bf16.msra.mxu1 %v5124_v41 }
 0x381   :  { %1481 = vmatprep.subr.bf16.mxu0 %v5130_v39  ;;  %1522 = vmatprep.subr.bf16.mxu1 %v5136_v45 }
 0x384   :  { %1482 = vmatpush1.bf16.msra.mxu0 %v5142_v2  ;;  %1523 = vmatpush1.bf16.msra.mxu1 %v4407_v47  ;;  %v5163_v47 = vld [vmem:[%s6926_s5 + $0xa4] ss:$16 sps:$4 sm:$0xff]  }
 0x385   :  { %1483 = vmatprep.subr.bf16.mxu0 %v5149_v48  ;;  %1524 = vmatprep.subr.bf16.mxu1 %v4419_v49  ;;  %7412 = vst [vmem:[#allocation3_spill] sm:$0xff] %v5163_v47  ;;  %v5170_v49 = vld [vmem:[%s6926_s5 + $0xa0] ss:$16 sps:$4 sm:$0xff]  }
 0x386   :  { %7413 = vst [vmem:[#allocation17_spill] sm:$0xff] %v5170_v49 }
 0x388   :  { %1484 = vmatpush1.bf16.msra.mxu0 %v5156_v21  ;;  %1525 = vmatpush1.bf16.msra.mxu1 %v4432_v51  ;;  %v5177_v51 = vld [vmem:[%s6926_s5 + $0xc4] ss:$16 sps:$4 sm:$0xff]  }
 0x389   :  { %1485 = vmatprep.subr.bf16.mxu0 %v5163_v47  ;;  %1526 = vmatprep.subr.bf16.mxu1 %v4444_v53  ;;  %7414 = vst [vmem:[#allocation4_spill] sm:$0xff] %v5177_v51  ;;  %v5184_v53 = vld [vmem:[%s6926_s5 + $0xc0] ss:$16 sps:$4 sm:$0xff]  }
 0x38a   :  { %7415 = vst [vmem:[#allocation18_spill] sm:$0xff] %v5184_v53 }
 0x38c   :  { %1486 = vmatpush1.bf16.msra.mxu0 %v5170_v49  ;;  %1527 = vmatpush1.bf16.msra.mxu1 %v4458_v55  ;;  %v5191_v55 = vld [vmem:[%s6926_s5 + $0xe4] ss:$16 sps:$4 sm:$0xff]  }
 0x38d   :  { %1487 = vmatprep.subr.bf16.mxu0 %v5177_v51  ;;  %1528 = vmatprep.subr.bf16.mxu1 %v4470_v57  ;;  %7416 = vst [vmem:[#allocation5_spill] sm:$0xff] %v5191_v55  ;;  %v5198_v57 = vld [vmem:[%s6926_s5 + $0xe0] ss:$16 sps:$4 sm:$0xff]  }
 0x38e   :  { %7417 = vst [vmem:[#allocation19_spill] sm:$0xff] %v5198_v57 }
 0x390   :  { %1488 = vmatpush1.bf16.msra.mxu0 %v5184_v53  ;;  %1529 = vmatpush1.bf16.msra.mxu1 %v4478_v58  ;;  %v5205_v58 = vld [vmem:[%s6928_s2 + $0x4] ss:$16 sps:$4 sm:$0xff]  }
 0x391   :  { %1489 = vmatprep.subr.bf16.mxu0 %v5191_v55  ;;  %1530 = vmatprep.subr.bf16.mxu1 %v4484_v59  ;;  %7418 = vst [vmem:[#allocation6_spill] sm:$0xff] %v5205_v58 }
 0x394   :  { %1490 = vmatpush1.bf16.msra.mxu0 %v5198_v57  ;;  %1531 = vmatpush1.bf16.msra.mxu1 %v4493_v60 }
 0x395   :  { %1557 = vmatprep.subr.bf16.mxu0 %v5205_v58  ;;  %1598 = vmatprep.subr.bf16.mxu1 %v4500_v61 }
 0x44a   :  { %v1404_v16 = vpop.f32.mrb[20].mxu0  ;;  %v1445_v59 = vpop.f32.mrb[52].mxu1 }
 0x44b   :  { %v1405_v18 = vadd.f32 %v1404_v16, %v5045_v22  ;;  %v1446_v43 = vadd.f32 %v1445_v59, %v5047_v23  ;;  %v1406_v44 = vpop.f32.mrb[21].mxu0  ;;  %v1447_v63 = vpop.f32.mrb[53].mxu1 }
 0x44c   :  { %v1407_v57 = vadd.f32 %v1406_v44, %v5049_v26  ;;  %v1448_v60 = vadd.f32 %v1447_v63, %v5051_v27  ;;  %v1408_v55 = vpop.f32.mrb[22].mxu0  ;;  %v1449_v53 = vpop.f32.mrb[54].mxu1 }
 0x44d   :  { %v1452_v51 = vadd.f32 %v1405_v18, %v4936_v8  ;;  %v1409_v49 = vpop.f32.mrb[23].mxu0  ;;  %v1450_v58 = vpop.f32.mrb[55].mxu1  ;;  %v1454_v23 = vadd.f32 %v1446_v43, %v4955_v25 }
 0x44e   :  { %v1453_v61 = vadd.f32 %v1407_v57, %v4940_v15  ;;  %v1455_v22 = vadd.f32 %v1448_v60, %v4949_v34 }
 0x44f   :  { %v1456_v47 = vmul.f32 0.5, %v1452_v51  ;;  %v1458_v26 = vmul.f32 0.5, %v1454_v23  ;;  %v5246_v23 = vld [vmem:[%s6928_s2 + $0x2c] ss:$16 sps:$4 sm:$0xff]  }
 0x450   :  { %v1457_v21 = vmul.f32 0.5, %v1453_v61  ;;  %v5228_v61 = vld [vmem:[%s6928_s2] ss:$16 sps:$4 sm:$0xff]  }
 0x451   :  { %3754 = vtanh.f32 %v1456_v47 }
 0x452   :  { %3756 = vtanh.f32 %v1457_v21 }
 0x453   :  { %3758 = vtanh.f32 %v1455_v22  ;;  %v5240_v22 = vld [vmem:[%s6928_s2 + $0x24] ss:$16 sps:$4 sm:$0xff]  }
 0x454   :  { %3760 = vtanh.f32 %v1458_v26  ;;  %v5254_v26 = vld [vmem:[%s6928_s2 + $0x20] ss:$16 sps:$4 sm:$0xff]  }
 0x45b   :  { %v3755_v16 = vpop.eup %3754 }
 0x45c   :  { %v1462_v27 = vmul.f32 0.5, %v3755_v16  ;;  %v3757_v55 = vpop.eup %3756  ;;  %v5260_v16 = vld [vmem:[%s6928_s2 + $0x28] ss:$16 sps:$4 sm:$0xff]  }
 0x45d   :  { %v1463_v59 = vmul.f32 0.5, %v3757_v55  ;;  %v3759_v49 = vpop.eup %3758  ;;  %v5272_v55 = vld [vmem:[%s6928_s2 + $0x4c] ss:$16 sps:$4 sm:$0xff]  }
 0x45e   :  { %v1465_v53 = vadd.f32 0.5, %v1462_v27  ;;  %v3761_v21 = vpop.eup %3760  ;;  %v5266_v27 = vld [vmem:[%s6928_s2 + $0x44] ss:$16 sps:$4 sm:$0xff]  }
 0x45f   :  { %v1466_v58 = vadd.f32 0.5, %v1463_v59  ;;  %v1464_v47 = vmul.f32 0.5, %v3761_v21  ;;  %v5284_v59 = vld [vmem:[%s6928_s2 + $0x48] ss:$16 sps:$4 sm:$0xff]   ;;  %v5314_v21 = vld [vmem:[%s6928_s2 + $0x84] ss:$16 sps:$4 sm:$0xff]  }
 0x460   :  { %v1470_v18 = vmul.f32 %v3759_v49, %v1465_v53  ;;  %v5278_v53 = vld [vmem:[%s6928_s2 + $0x40] ss:$16 sps:$4 sm:$0xff]   ;;  %v5290_v49 = vld [vmem:[%s6928_s2 + $0x64] ss:$16 sps:$4 sm:$0xff]   ;;  %7420 = vst [vmem:[#allocation7_spill] sm:$0xff] %v5314_v21 }
 0x461   :  { %v1469_v51 = vmul.f32 %v1466_v58, %v4958_v3  ;;  %v1467_v44 = vadd.f32 0.5, %v1464_v47  ;;  %v5234_v3 = vld [vmem:[%s6928_s2 + $0x8] ss:$16 sps:$4 sm:$0xff]   ;;  %v5296_v58 = vld [vmem:[%s6928_s2 + $0x6c] ss:$16 sps:$4 sm:$0xff]  }
 0x462   :  { %v5320_v47 = vld [vmem:[%s6928_s2 + $0x8c] ss:$16 sps:$4 sm:$0xff]  }
 0x463   :  { %v5218_v57 = vadd.f32 %v1470_v18, %v1469_v51  ;;  %v5302_v18 = vld [vmem:[%s6928_s2 + $0x60] ss:$16 sps:$4 sm:$0xff]   ;;  %v5308_v51 = vld [vmem:[%s6928_s2 + $0x68] ss:$16 sps:$4 sm:$0xff]   ;;  %7421 = vst [vmem:[#allocation21_spill] sm:$0xff] %v5320_v47 }
 0x465   :  { %3762 = vtanh.f32 %v5218_v57 }
 0x46f   :  { %v3763_v43 = vpop.eup %3762 }
 0x470   :  { %v5221_v63 = vmul.f32 %v3763_v43, %v1467_v44  ;;  %v5326_v44 = vld [vmem:[%s6928_s2 + $0x80] ss:$16 sps:$4 sm:$0xff]   ;;  %v5332_v43 = vld [vmem:[%s6928_s2 + $0x88] ss:$16 sps:$4 sm:$0xff]  }
 0x471   :  { %7422 = vst [vmem:[#allocation8_spill] sm:$0xff] %v5326_v44  ;;  %7423 = vst [vmem:[#allocation22_spill] sm:$0xff] %v5332_v43 }
 0x472   :  { %7419 = vst [vmem:[#allocation20_spill] sm:$0xff] %v5221_v63  ;;  %v1474_v60 = vpack.c.bf16 %v5221_v63, %v5221_v63  ;;  %v5344_v63 = vld [vmem:[%s6928_s2 + $0xac] ss:$16 sps:$4 sm:$0xff]  }
 0x473   :  { %7425 = vst [vmem:[#allocation23_spill] sm:$0xff] %v5344_v63 }
 0x474   :  { %1508 = vmatmul.mubr.bf16.vlgmr.msra.gmra.mrb[24].mxu0 %v1474_v60  ;;  %1549 = vmatmul.mubr.bf16.vlgmr.msra.gmra.mrb[56].mxu1 %v1474_v60  ;;  %v5338_v60 = vld [vmem:[%s6928_s2 + $0xa4] ss:$16 sps:$4 sm:$0xff]  }
 0x475   :  { %1558 = vmatpush1.bf16.msra.mxu0 %v5228_v61  ;;  %1599 = vmatpush1.bf16.msra.mxu1 %v5234_v3  ;;  %7424 = vst [vmem:[#allocation9_spill] sm:$0xff] %v5338_v60 }
 0x476   :  { %1559 = vmatprep.subr.bf16.mxu0 %v5240_v22  ;;  %1600 = vmatprep.subr.bf16.mxu1 %v5246_v23 }
 0x477   :  { %1589 = vmatprep.mubr.bf16.mxu0 %v7280_v56  ;;  %1630 = vmatprep.mubr.bf16.mxu1 %v7280_v56 }
 0x479   :  { %1560 = vmatpush1.bf16.msra.mxu0 %v5254_v26  ;;  %1601 = vmatpush1.bf16.msra.mxu1 %v5260_v16 }
 0x47a   :  { %1561 = vmatprep.subr.bf16.mxu0 %v5266_v27  ;;  %1602 = vmatprep.subr.bf16.mxu1 %v5272_v55 }
 0x47d   :  { %1562 = vmatpush1.bf16.msra.mxu0 %v5278_v53  ;;  %1603 = vmatpush1.bf16.msra.mxu1 %v5284_v59 }
 0x47e   :  { %1563 = vmatprep.subr.bf16.mxu0 %v5290_v49  ;;  %1604 = vmatprep.subr.bf16.mxu1 %v5296_v58 }
 0x481   :  { %1564 = vmatpush1.bf16.msra.mxu0 %v5302_v18  ;;  %1605 = vmatpush1.bf16.msra.mxu1 %v5308_v51 }
 0x482   :  { %1565 = vmatprep.subr.bf16.mxu0 %v5314_v21  ;;  %1606 = vmatprep.subr.bf16.mxu1 %v5320_v47 }
 0x485   :  { %1566 = vmatpush1.bf16.msra.mxu0 %v5326_v44  ;;  %1607 = vmatpush1.bf16.msra.mxu1 %v5332_v43  ;;  %v5350_v44 = vld [vmem:[%s6928_s2 + $0xa0] ss:$16 sps:$4 sm:$0xff]   ;;  %v5356_v43 = vld [vmem:[%s6928_s2 + $0xa8] ss:$16 sps:$4 sm:$0xff]  }
 0x486   :  { %1567 = vmatprep.subr.bf16.mxu0 %v5338_v60  ;;  %1608 = vmatprep.subr.bf16.mxu1 %v5344_v63  ;;  %7426 = vst [vmem:[#allocation10_spill] sm:$0xff] %v5350_v44  ;;  %7427 = vst [vmem:[#allocation24_spill] sm:$0xff] %v5356_v43  ;;  %v5362_v60 = vld [vmem:[%s6928_s2 + $0xc4] ss:$16 sps:$4 sm:$0xff]   ;;  %v5368_v63 = vld [vmem:[%s6928_s2 + $0xcc] ss:$16 sps:$4 sm:$0xff]  }
 0x487   :  { %7428 = vst [vmem:[#allocation11_spill] sm:$0xff] %v5362_v60  ;;  %7429 = vst [vmem:[#allocation25_spill] sm:$0xff] %v5368_v63 }
 0x489   :  { %1568 = vmatpush1.bf16.msra.mxu0 %v5350_v44  ;;  %1609 = vmatpush1.bf16.msra.mxu1 %v5356_v43  ;;  %v5374_v44 = vld [vmem:[%s6928_s2 + $0xc0] ss:$16 sps:$4 sm:$0xff]   ;;  %v5380_v43 = vld [vmem:[%s6928_s2 + $0xc8] ss:$16 sps:$4 sm:$0xff]  }
 0x48a   :  { %1569 = vmatprep.subr.bf16.mxu0 %v5362_v60  ;;  %1610 = vmatprep.subr.bf16.mxu1 %v5368_v63  ;;  %7430 = vst [vmem:[#allocation12_spill] sm:$0xff] %v5374_v44  ;;  %7431 = vst [vmem:[#allocation26_spill] sm:$0xff] %v5380_v43  ;;  %v5386_v60 = vld [vmem:[%s6928_s2 + $0xe4] ss:$16 sps:$4 sm:$0xff]   ;;  %v5392_v63 = vld [vmem:[%s6928_s2 + $0xec] ss:$16 sps:$4 sm:$0xff]  }
 0x48b   :  { %7432 = vst [vmem:[#allocation13_spill] sm:$0xff] %v5386_v60  ;;  %7433 = vst [vmem:[#allocation27_spill] sm:$0xff] %v5392_v63 }
 0x48d   :  { %1570 = vmatpush1.bf16.msra.mxu0 %v5374_v44  ;;  %1611 = vmatpush1.bf16.msra.mxu1 %v5380_v43  ;;  %v5398_v44 = vld [vmem:[%s6928_s2 + $0xe0] ss:$16 sps:$4 sm:$0xff]   ;;  %v5404_v43 = vld [vmem:[%s6928_s2 + $0xe8] ss:$16 sps:$4 sm:$0xff]  }
 0x48e   :  { %1571 = vmatprep.subr.bf16.mxu0 %v5386_v60  ;;  %1612 = vmatprep.subr.bf16.mxu1 %v5392_v63  ;;  %7434 = vst [vmem:[#allocation14_spill] sm:$0xff] %v5398_v44  ;;  %7435 = vst [vmem:[#allocation28_spill] sm:$0xff] %v5404_v43  ;;  %v5410_v60 = vld [vmem:[%s6929_s4 + $0x4] ss:$16 sps:$4 sm:$0xff]   ;;  %v5416_v63 = vld [vmem:[%s6929_s4 + $0xc] ss:$16 sps:$4 sm:$0xff]  }
 0x48f   :  { %7436 = vst [vmem:[#allocation29_spill] sm:$0xff] %v5410_v60  ;;  %7437 = vst [vmem:[#allocation30_spill] sm:$0xff] %v5416_v63 }
 0x491   :  { %1572 = vmatpush1.bf16.msra.mxu0 %v5398_v44  ;;  %1613 = vmatpush1.bf16.msra.mxu1 %v5404_v43  ;;  %v5424_v43 = vld [vmem:[%s6929_s4] ss:$16 sps:$4 sm:$0xff]  }
 0x492   :  { %1662 = vmatprep.subr.bf16.mxu0 %v5410_v60  ;;  %1703 = vmatprep.subr.bf16.mxu1 %v5416_v63  ;;  %7438 = vst [vmem:[#allocation31_spill] sm:$0xff] %v5424_v43  ;;  %v5430_v60 = vld [vmem:[%s6929_s4 + $0x8] ss:$16 sps:$4 sm:$0xff]   ;;  %v5436_v63 = vld [vmem:[%s6929_s4 + $0x24] ss:$16 sps:$4 sm:$0xff]  }
 0x493   :  { %7439 = vst [vmem:[#allocation32_spill] sm:$0xff] %v5430_v60  ;;  %7440 = vst [vmem:[#allocation33_spill] sm:$0xff] %v5436_v63 }
 0x494   :  { %1590 = vmatmul.mubr.bf16.vlgmr.msra.gmra.mrb[28].mxu0 %v5061_v46  ;;  %1631 = vmatmul.mubr.bf16.vlgmr.msra.gmra.mrb[60].mxu1 %v5061_v46  ;;  %v5442_v46 = vld [vmem:[%s6929_s4 + $0x2c] ss:$16 sps:$4 sm:$0xff]  }
 0x495   :  { %1663 = vmatpush1.bf16.msra.mxu0 %v5424_v43  ;;  %1704 = vmatpush1.bf16.msra.mxu1 %v5430_v60  ;;  %7441 = vst [vmem:[#allocation34_spill] sm:$0xff] %v5442_v46  ;;  %v5450_v60 = vld [vmem:[%s6929_s4 + $0x20] ss:$16 sps:$4 sm:$0xff]  }
 0x496   :  { %1664 = vmatprep.subr.bf16.mxu0 %v5436_v63  ;;  %1705 = vmatprep.subr.bf16.mxu1 %v5442_v46  ;;  %7442 = vst [vmem:[#allocation35_spill] sm:$0xff] %v5450_v60  ;;  %v5456_v63 = vld [vmem:[%s6929_s4 + $0x28] ss:$16 sps:$4 sm:$0xff]  }
 0x497   :  { %1694 = vmatprep.mubr.bf16.mxu0 %v7280_v56  ;;  %1735 = vmatprep.mubr.bf16.mxu1 %v7280_v56  ;;  %7443 = vst [vmem:[#allocation36_spill] sm:$0xff] %v5456_v63 }
 0x499   :  { %1665 = vmatpush1.bf16.msra.mxu0 %v5450_v60  ;;  %1706 = vmatpush1.bf16.msra.mxu1 %v5456_v63 }
 0x49a   :  { %1666 = vmatprep.subr.bf16.mxu0 %v7381_v24  ;;  %1707 = vmatprep.subr.bf16.mxu1 %v7382_v42  ;;  %v7444_v24 = vld [vmem:[#allocation59_spill] sm:$0xff]  ;;  %v7445_v42 = vld [vmem:[#allocation60_spill] sm:$0xff] }
 0x49d   :  { %1667 = vmatpush1.bf16.msra.mxu0 %v7383_v52  ;;  %1708 = vmatpush1.bf16.msra.mxu1 %v7384_v50  ;;  %v7446_v52 = vld [vmem:[#allocation15_spill] sm:$0xff]  ;;  %v7447_v50 = vld [vmem:[#allocation2_spill] sm:$0xff] }
 0x49e   :  { %1668 = vmatprep.subr.bf16.mxu0 %v7385_v11  ;;  %1709 = vmatprep.subr.bf16.mxu1 %v7386_v30 }
 0x4a1   :  { %1669 = vmatpush1.bf16.msra.mxu0 %v7387_v19  ;;  %1710 = vmatpush1.bf16.msra.mxu1 %v7388_v7 }
 0x4a2   :  { %1670 = vmatprep.subr.bf16.mxu0 %v7389_v0  ;;  %1711 = vmatprep.subr.bf16.mxu1 %v7390_v17 }
 0x4a5   :  { %1671 = vmatpush1.bf16.msra.mxu0 %v7391_v38  ;;  %1712 = vmatpush1.bf16.msra.mxu1 %v7392_v1 }
 0x4a6   :  { %1672 = vmatprep.subr.bf16.mxu0 %v7393_v40  ;;  %1713 = vmatprep.subr.bf16.mxu1 %v7394_v54 }
 0x4a9   :  { %1673 = vmatpush1.bf16.msra.mxu0 %v7395_v10  ;;  %1714 = vmatpush1.bf16.msra.mxu1 %v7396_v4  ;;  %v7448_v10 = vld [vmem:[#allocation63_spill] sm:$0xff] }
 0x4aa   :  { %1674 = vmatprep.subr.bf16.mxu0 %v7397_v6  ;;  %1715 = vmatprep.subr.bf16.mxu1 %v7398_v31  ;;  %v7449_v6 = vld [vmem:[#allocation77_spill] sm:$0xff] }
 0x4ad   :  { %1675 = vmatpush1.bf16.msra.mxu0 %v7399_v62  ;;  %1716 = vmatpush1.bf16.msra.mxu1 %v7400_v32 }
 0x4ae   :  { %1676 = vmatprep.subr.bf16.mxu0 %v7401_v12  ;;  %1717 = vmatprep.subr.bf16.mxu1 %v7402_v13  ;;  %v7450_v12 = vld [vmem:[#allocation64_spill] sm:$0xff] }
 0x4b1   :  { %1677 = vmatpush1.bf16.msra.mxu0 %v7444_v24  ;;  %1718 = vmatpush1.bf16.msra.mxu1 %v7445_v42  ;;  %v7451_v24 = vld [vmem:[#allocation78_spill] sm:$0xff] }
 0x4b2   :  { %1767 = vmatprep.subr.bf16.mxu0 %v7446_v52  ;;  %1808 = vmatprep.subr.bf16.mxu1 %v7447_v50 }
 0x547   :  { %v5485_v11 = vpop.f32.mrb[24].mxu0  ;;  %v5487_v30 = vpop.f32.mrb[56].mxu1 }
 0x548   :  { %v5489_v19 = vpop.f32.mrb[25].mxu0  ;;  %v5491_v7 = vpop.f32.mrb[57].mxu1 }
 0x549   :  { %v1513_v0 = vpop.f32.mrb[26].mxu0  ;;  %v1554_v17 = vpop.f32.mrb[58].mxu1 }
 0x54a   :  { %v1514_v38 = vpop.f32.mrb[27].mxu0  ;;  %v1555_v1 = vpop.f32.mrb[59].mxu1 }
 0x567   :  { %v1591_v40 = vpop.f32.mrb[28].mxu0  ;;  %v1632_v54 = vpop.f32.mrb[60].mxu1 }
 0x568   :  { %v1639_v4 = vadd.f32 %v1591_v40, %v7448_v10  ;;  %v1641_v31 = vadd.f32 %v1632_v54, %v7449_v6  ;;  %v1593_v62 = vpop.f32.mrb[29].mxu0  ;;  %v1634_v32 = vpop.f32.mrb[61].mxu1 }
 0x569   :  { %v1640_v13 = vadd.f32 %v1593_v62, %v7450_v12  ;;  %v1642_v42 = vadd.f32 %v1634_v32, %v7451_v24  ;;  %v1595_v50 = vpop.f32.mrb[30].mxu0  ;;  %v1636_v52 = vpop.f32.mrb[62].mxu1  ;;  %v7452_v24 = vld [vmem:[#allocation16_spill] sm:$0xff] }
 0x56a   :  { %v1643_v63 = vmul.f32 0.5, %v1639_v4  ;;  %v1596_v60 = vpop.f32.mrb[31].mxu0  ;;  %v1637_v0 = vpop.f32.mrb[63].mxu1  ;;  %v1645_v38 = vmul.f32 0.5, %v1641_v31 }
 0x56b   :  { %v1644_v17 = vmul.f32 0.5, %v1640_v13  ;;  %v7453_v0 = vld [vmem:[#allocation3_spill] sm:$0xff] }
 0x56c   :  { %3764 = vtanh.f32 %v1643_v63 }
 0x56d   :  { %3766 = vtanh.f32 %v1644_v17  ;;  %v5544_v17 = vld [vmem:[%s6926_s5 + $0xac] ss:$16 sps:$4 sm:$0xff]  }
 0x56e   :  { %3768 = vtanh.f32 %v1642_v42  ;;  %v5537_v42 = vld [vmem:[%s6926_s5 + $0x88] ss:$16 sps:$4 sm:$0xff]   ;;  %7454 = vst [vmem:[#allocation37_spill] sm:$0xff] %v5544_v17 }
 0x56f   :  { %3770 = vtanh.f32 %v1645_v38  ;;  %v7455_v38 = vld [vmem:[#allocation17_spill] sm:$0xff] }
 0x576   :  { %v3765_v1 = vpop.eup %3764 }
 0x577   :  { %v1649_v40 = vmul.f32 0.5, %v3765_v1  ;;  %v3767_v10 = vpop.eup %3766  ;;  %v5551_v1 = vld [vmem:[%s6926_s5 + $0xa8] ss:$16 sps:$4 sm:$0xff]  }
 0x578   :  { %v1650_v6 = vmul.f32 0.5, %v3767_v10  ;;  %v3769_v46 = vpop.eup %3768  ;;  %7456 = vst [vmem:[#allocation38_spill] sm:$0xff] %v5551_v1  ;;  %v5558_v10 = vld [vmem:[%s6926_s5 + $0xcc] ss:$16 sps:$4 sm:$0xff]  }
 0x579   :  { %v1652_v54 = vadd.f32 0.5, %v1649_v40  ;;  %v3771_v60 = vpop.eup %3770  ;;  %v7457_v40 = vld [vmem:[#allocation4_spill] sm:$0xff]  ;;  %7458 = vst [vmem:[#allocation39_spill] sm:$0xff] %v5558_v10 }
 0x57a   :  { %v1653_v62 = vadd.f32 0.5, %v1650_v6  ;;  %v1651_v63 = vmul.f32 0.5, %v3771_v60  ;;  %v5565_v6 = vld [vmem:[%s6926_s5 + $0xc8] ss:$16 sps:$4 sm:$0xff]  }
 0x57b   :  { %v1657_v12 = vmul.f32 %v3769_v46, %v1652_v54  ;;  %v5530_v46 = vld [vmem:[%s6926_s5 + $0x8c] ss:$16 sps:$4 sm:$0xff]   ;;  %v7459_v54 = vld [vmem:[#allocation18_spill] sm:$0xff]  ;;  %7460 = vst [vmem:[#allocation40_spill] sm:$0xff] %v5565_v6  ;;  %v5579_v60 = vld [vmem:[%s6926_s5 + $0xe8] ss:$16 sps:$4 sm:$0xff]  }
 0x57c   :  { %v1656_v50 = vmul.f32 %v1653_v62, %v5058_v20  ;;  %v1654_v4 = vadd.f32 0.5, %v1651_v63  ;;  %v5523_v20 = vld [vmem:[%s6926_s5 + $0x68] ss:$16 sps:$4 sm:$0xff]   ;;  %7464 = vst [vmem:[#allocation42_spill] sm:$0xff] %v5579_v60  ;;  %v7465_v63 = vld [vmem:[#allocation6_spill] sm:$0xff] }
 0x57d   :  { %v7461_v62 = vld [vmem:[#allocation5_spill] sm:$0xff] }
 0x57e   :  { %v5498_v52 = vadd.f32 %v1657_v12, %v1656_v50  ;;  %v5572_v12 = vld [vmem:[%s6926_s5 + $0xec] ss:$16 sps:$4 sm:$0xff]  }
 0x57f   :  { %7462 = vst [vmem:[#allocation41_spill] sm:$0xff] %v5572_v12  ;;  %v7463_v50 = vld [vmem:[#allocation19_spill] sm:$0xff] }
 0x580   :  { %3772 = vtanh.f32 %v5498_v52 }
 0x58a   :  { %v3773_v32 = vpop.eup %3772 }
 0x58b   :  { %v1660_v31 = vmul.f32 %v3773_v32, %v1654_v4  ;;  %v5586_v4 = vld [vmem:[%s6928_s2 + $0xc] ss:$16 sps:$4 sm:$0xff]  }
 0x58c   :  { %7466 = vst [vmem:[#allocation43_spill] sm:$0xff] %v5586_v4 }
 0x58d   :  { %v5501_v13 = vpack.c.bf16 %v1660_v31, %v1660_v31 }
 0x58f   :  { %1695 = vmatmul.mubr.bf16.vlgmr.msra.gmra.mrb[32].mxu0 %v5501_v13  ;;  %1736 = vmatmul.mubr.bf16.vlgmr.msra.gmra.mrb[64].mxu1 %v5501_v13 }
 0x590   :  { %1768 = vmatpush1.bf16.msra.mxu0 %v5068_v14  ;;  %1809 = vmatpush1.bf16.msra.mxu1 %v5074_v9 }
 0x591   :  { %1769 = vmatprep.subr.bf16.mxu0 %v5080_v5  ;;  %1810 = vmatprep.subr.bf16.mxu1 %v5086_v36 }
 0x592   :  { %1799 = vmatprep.mubr.bf16.mxu0 %v7280_v56  ;;  %1840 = vmatprep.mubr.bf16.mxu1 %v7280_v56 }
 0x594   :  { %1770 = vmatpush1.bf16.msra.mxu0 %v5094_v28  ;;  %1811 = vmatpush1.bf16.msra.mxu1 %v5100_v29 }
 0x595   :  { %1771 = vmatprep.subr.bf16.mxu0 %v5106_v33  ;;  %1812 = vmatprep.subr.bf16.mxu1 %v5112_v35 }
 0x598   :  { %1772 = vmatpush1.bf16.msra.mxu0 %v5118_v37  ;;  %1813 = vmatpush1.bf16.msra.mxu1 %v5124_v41 }
 0x599   :  { %1773 = vmatprep.subr.bf16.mxu0 %v5130_v39  ;;  %1814 = vmatprep.subr.bf16.mxu1 %v5136_v45 }
 0x59c   :  { %1774 = vmatpush1.bf16.msra.mxu0 %v5142_v2  ;;  %1815 = vmatpush1.bf16.msra.mxu1 %v5523_v20 }
 0x59d   :  { %1775 = vmatprep.subr.bf16.mxu0 %v5149_v48  ;;  %1816 = vmatprep.subr.bf16.mxu1 %v5530_v46 }
 0x5a0   :  { %1776 = vmatpush1.bf16.msra.mxu0 %v7452_v24  ;;  %1817 = vmatpush1.bf16.msra.mxu1 %v5537_v42 }
 0x5a1   :  { %1777 = vmatprep.subr.bf16.mxu0 %v7453_v0  ;;  %1818 = vmatprep.subr.bf16.mxu1 %v5544_v17 }
 0x5a4   :  { %1778 = vmatpush1.bf16.msra.mxu0 %v7455_v38  ;;  %1819 = vmatpush1.bf16.msra.mxu1 %v5551_v1 }
 0x5a5   :  { %1779 = vmatprep.subr.bf16.mxu0 %v7457_v40  ;;  %1820 = vmatprep.subr.bf16.mxu1 %v5558_v10 }
 0x5a8   :  { %1780 = vmatpush1.bf16.msra.mxu0 %v7459_v54  ;;  %1821 = vmatpush1.bf16.msra.mxu1 %v5565_v6 }
 0x5a9   :  { %1781 = vmatprep.subr.bf16.mxu0 %v7461_v62  ;;  %1822 = vmatprep.subr.bf16.mxu1 %v5572_v12 }
 0x5ac   :  { %1782 = vmatpush1.bf16.msra.mxu0 %v7463_v50  ;;  %1823 = vmatpush1.bf16.msra.mxu1 %v5579_v60 }
 0x5ad   :  { %1849 = vmatprep.subr.bf16.mxu0 %v7465_v63  ;;  %1890 = vmatprep.subr.bf16.mxu1 %v5586_v4 }
 0x662   :  { %v1696_v32 = vpop.f32.mrb[32].mxu0  ;;  %v1737_v31 = vpop.f32.mrb[64].mxu1 }
 0x663   :  { %v1697_v50 = vadd.f32 %v1696_v32, %v5485_v11  ;;  %v1738_v12 = vadd.f32 %v1737_v31, %v5487_v30  ;;  %v1698_v62 = vpop.f32.mrb[33].mxu0  ;;  %v1739_v6 = vpop.f32.mrb[65].mxu1  ;;  %v7469_v31 = vld [vmem:[#allocation22_spill] sm:$0xff] }
 0x664   :  { %v1699_v54 = vadd.f32 %v1698_v62, %v5489_v19  ;;  %v1740_v60 = vadd.f32 %v1739_v6, %v5491_v7  ;;  %v1700_v63 = vpop.f32.mrb[34].mxu0  ;;  %v1741_v10 = vpop.f32.mrb[66].mxu1 }
 0x665   :  { %v1744_v40 = vadd.f32 %v1697_v50, %v4936_v8  ;;  %v1701_v1 = vpop.f32.mrb[35].mxu0  ;;  %v1742_v38 = vpop.f32.mrb[67].mxu1  ;;  %v1746_v30 = vadd.f32 %v1738_v12, %v4955_v25 }
 0x666   :  { %v1745_v4 = vadd.f32 %v1699_v54, %v4940_v15  ;;  %v1747_v11 = vadd.f32 %v1740_v60, %v4949_v34 }
 0x667   :  { %v1748_v17 = vmul.f32 0.5, %v1744_v40  ;;  %v1750_v19 = vmul.f32 0.5, %v1746_v30  ;;  %v7471_v30 = vld [vmem:[#allocation23_spill] sm:$0xff] }
 0x668   :  { %v1749_v0 = vmul.f32 0.5, %v1745_v4 }
 0x669   :  { %3774 = vtanh.f32 %v1748_v17 }
 0x66a   :  { %3776 = vtanh.f32 %v1749_v0 }
 0x66b   :  { %3778 = vtanh.f32 %v1747_v11  ;;  %v7470_v11 = vld [vmem:[#allocation9_spill] sm:$0xff] }
 0x66c   :  { %3780 = vtanh.f32 %v1750_v19  ;;  %v7472_v19 = vld [vmem:[#allocation10_spill] sm:$0xff] }
 0x673   :  { %v3775_v62 = vpop.eup %3774 }
 0x674   :  { %v1754_v7 = vmul.f32 0.5, %v3775_v62  ;;  %v3777_v6 = vpop.eup %3776  ;;  %v7473_v62 = vld [vmem:[#allocation24_spill] sm:$0xff] }
 0x675   :  { %v1755_v50 = vmul.f32 0.5, %v3777_v6  ;;  %v3779_v1 = vpop.eup %3778  ;;  %v7475_v6 = vld [vmem:[#allocation25_spill] sm:$0xff] }
 0x676   :  { %v1757_v10 = vadd.f32 0.5, %v1754_v7  ;;  %v3781_v0 = vpop.eup %3780  ;;  %v7474_v7 = vld [vmem:[#allocation11_spill] sm:$0xff] }
 0x677   :  { %v1758_v38 = vadd.f32 0.5, %v1755_v50  ;;  %v1756_v17 = vmul.f32 0.5, %v3781_v0  ;;  %v7477_v50 = vld [vmem:[#allocation26_spill] sm:$0xff] }
 0x678   :  { %v1762_v63 = vmul.f32 %v3779_v1, %v1757_v10  ;;  %v7476_v10 = vld [vmem:[#allocation12_spill] sm:$0xff]  ;;  %v7478_v1 = vld [vmem:[#allocation13_spill] sm:$0xff]  ;;  %v7482_v0 = vld [vmem:[#allocation30_spill] sm:$0xff] }
 0x679   :  { %v1761_v40 = vmul.f32 %v1758_v38, %v5218_v57  ;;  %v1759_v60 = vadd.f32 0.5, %v1756_v17  ;;  %v7468_v57 = vld [vmem:[#allocation8_spill] sm:$0xff]  ;;  %v7479_v38 = vld [vmem:[#allocation27_spill] sm:$0xff] }
 0x67a   :  { %v7483_v17 = vld [vmem:[#allocation32_spill] sm:$0xff] }
 0x67b   :  { %v5598_v54 = vadd.f32 %v1762_v63, %v1761_v40  ;;  %v7480_v63 = vld [vmem:[#allocation28_spill] sm:$0xff]  ;;  %v7481_v40 = vld [vmem:[#allocation29_spill] sm:$0xff] }
 0x67d   :  { %3782 = vtanh.f32 %v5598_v54 }
 0x687   :  { %v3783_v12 = vpop.eup %3782 }
 0x688   :  { %v5601_v4 = vmul.f32 %v3783_v12, %v1759_v60  ;;  %v7484_v60 = vld [vmem:[#allocation33_spill] sm:$0xff]  ;;  %v7485_v12 = vld [vmem:[#allocation34_spill] sm:$0xff] }
 0x68a   :  { %7467 = vst [vmem:[#allocation44_spill] sm:$0xff] %v5601_v4  ;;  %v1766_v32 = vpack.c.bf16 %v5601_v4, %v5601_v4  ;;  %v7487_v4 = vld [vmem:[#allocation36_spill] sm:$0xff] }
 0x68c   :  { %1800 = vmatmul.mubr.bf16.vlgmr.msra.gmra.mrb[36].mxu0 %v1766_v32  ;;  %1841 = vmatmul.mubr.bf16.vlgmr.msra.gmra.mrb[68].mxu1 %v1766_v32  ;;  %v7486_v32 = vld [vmem:[#allocation35_spill] sm:$0xff] }
 0x68d   :  { %1850 = vmatpush1.bf16.msra.mxu0 %v5228_v61  ;;  %1891 = vmatpush1.bf16.msra.mxu1 %v5234_v3 }
 0x68e   :  { %1851 = vmatprep.subr.bf16.mxu0 %v5240_v22  ;;  %1892 = vmatprep.subr.bf16.mxu1 %v5246_v23 }
 0x68f   :  { %1881 = vmatprep.mubr.bf16.mxu0 %v7280_v56  ;;  %1922 = vmatprep.mubr.bf16.mxu1 %v7280_v56 }
 0x691   :  { %1852 = vmatpush1.bf16.msra.mxu0 %v5254_v26  ;;  %1893 = vmatpush1.bf16.msra.mxu1 %v5260_v16 }
 0x692   :  { %1853 = vmatprep.subr.bf16.mxu0 %v5266_v27  ;;  %1894 = vmatprep.subr.bf16.mxu1 %v5272_v55 }
 0x695   :  { %1854 = vmatpush1.bf16.msra.mxu0 %v5278_v53  ;;  %1895 = vmatpush1.bf16.msra.mxu1 %v5284_v59 }
 0x696   :  { %1855 = vmatprep.subr.bf16.mxu0 %v5290_v49  ;;  %1896 = vmatprep.subr.bf16.mxu1 %v5296_v58 }
 0x699   :  { %1856 = vmatpush1.bf16.msra.mxu0 %v5302_v18  ;;  %1897 = vmatpush1.bf16.msra.mxu1 %v5308_v51 }
 0x69a   :  { %1857 = vmatprep.subr.bf16.mxu0 %v5314_v21  ;;  %1898 = vmatprep.subr.bf16.mxu1 %v5320_v47 }
 0x69d   :  { %1858 = vmatpush1.bf16.msra.mxu0 %v7468_v57  ;;  %1899 = vmatpush1.bf16.msra.mxu1 %v7469_v31 }
 0x69e   :  { %1859 = vmatprep.subr.bf16.mxu0 %v7470_v11  ;;  %1900 = vmatprep.subr.bf16.mxu1 %v7471_v30 }
 0x6a1   :  { %1860 = vmatpush1.bf16.msra.mxu0 %v7472_v19  ;;  %1901 = vmatpush1.bf16.msra.mxu1 %v7473_v62  ;;  %v7517_v19 = vld [vmem:[#allocation80_spill] sm:$0xff] }
 0x6a2   :  { %1861 = vmatprep.subr.bf16.mxu0 %v7474_v7  ;;  %1902 = vmatprep.subr.bf16.mxu1 %v7475_v6  ;;  %v7516_v7 = vld [vmem:[#allocation66_spill] sm:$0xff] }
 0x6a5   :  { %1862 = vmatpush1.bf16.msra.mxu0 %v7476_v10  ;;  %1903 = vmatpush1.bf16.msra.mxu1 %v7477_v50  ;;  %v7514_v50 = vld [vmem:[#allocation65_spill] sm:$0xff]  ;;  %v7515_v10 = vld [vmem:[#allocation79_spill] sm:$0xff] }
 0x6a6   :  { %1863 = vmatprep.subr.bf16.mxu0 %v7478_v1  ;;  %1904 = vmatprep.subr.bf16.mxu1 %v7479_v38 }
 0x6a9   :  { %1864 = vmatpush1.bf16.msra.mxu0 %v5398_v44  ;;  %1905 = vmatpush1.bf16.msra.mxu1 %v7480_v63 }
 0x6aa   :  { %1954 = vmatprep.subr.bf16.mxu0 %v7481_v40  ;;  %1995 = vmatprep.subr.bf16.mxu1 %v7482_v0 }
 0x6ac   :  { %1882 = vmatmul.mubr.bf16.vlgmr.msra.gmra.mrb[40].mxu0 %v5501_v13  ;;  %1923 = vmatmul.mubr.bf16.vlgmr.msra.gmra.mrb[72].mxu1 %v5501_v13  ;;  %v5652_v13 = vld [vmem:[%s6929_s4 + $0x44] ss:$16 sps:$4 sm:$0xff]  }
 0x6ad   :  { %1955 = vmatpush1.bf16.msra.mxu0 %v5424_v43  ;;  %1996 = vmatpush1.bf16.msra.mxu1 %v7483_v17  ;;  %7488 = vst [vmem:[#allocation45_spill] sm:$0xff] %v5652_v13 }
 0x6ae   :  { %1956 = vmatprep.subr.bf16.mxu0 %v7484_v60  ;;  %1997 = vmatprep.subr.bf16.mxu1 %v7485_v12  ;;  %v5658_v60 = vld [vmem:[%s6929_s4 + $0x4c] ss:$16 sps:$4 sm:$0xff]   ;;  %v7513_v12 = vld [vmem:[#allocation2_spill] sm:$0xff] }
 0x6af   :  { %1986 = vmatprep.mubr.bf16.mxu0 %v7280_v56  ;;  %2027 = vmatprep.mubr.bf16.mxu1 %v7280_v56  ;;  %7489 = vst [vmem:[#allocation46_spill] sm:$0xff] %v5658_v60 }
 0x6b1   :  { %1957 = vmatpush1.bf16.msra.mxu0 %v7486_v32  ;;  %1998 = vmatpush1.bf16.msra.mxu1 %v7487_v4  ;;  %v5664_v32 = vld [vmem:[%s6929_s4 + $0x40] ss:$16 sps:$4 sm:$0xff]   ;;  %v5670_v4 = vld [vmem:[%s6929_s4 + $0x48] ss:$16 sps:$4 sm:$0xff]  }
 0x6b2   :  { %1958 = vmatprep.subr.bf16.mxu0 %v5652_v13  ;;  %1999 = vmatprep.subr.bf16.mxu1 %v5658_v60  ;;  %7490 = vst [vmem:[#allocation47_spill] sm:$0xff] %v5664_v32  ;;  %7491 = vst [vmem:[#allocation48_spill] sm:$0xff] %v5670_v4  ;;  %v5676_v13 = vld [vmem:[%s6929_s4 + $0x64] ss:$16 sps:$4 sm:$0xff]   ;;  %v5682_v60 = vld [vmem:[%s6929_s4 + $0x6c] ss:$16 sps:$4 sm:$0xff]  }
 0x6b3   :  { %7492 = vst [vmem:[#allocation49_spill] sm:$0xff] %v5676_v13  ;;  %7493 = vst [vmem:[#allocation50_spill] sm:$0xff] %v5682_v60 }
 0x6b5   :  { %1959 = vmatpush1.bf16.msra.mxu0 %v5664_v32  ;;  %2000 = vmatpush1.bf16.msra.mxu1 %v5670_v4  ;;  %v5688_v32 = vld [vmem:[%s6929_s4 + $0x60] ss:$16 sps:$4 sm:$0xff]   ;;  %v5694_v4 = vld [vmem:[%s6929_s4 + $0x68] ss:$16 sps:$4 sm:$0xff]  }
 0x6b6   :  { %1960 = vmatprep.subr.bf16.mxu0 %v5676_v13  ;;  %2001 = vmatprep.subr.bf16.mxu1 %v5682_v60  ;;  %7494 = vst [vmem:[#allocation51_spill] sm:$0xff] %v5688_v32  ;;  %7495 = vst [vmem:[#allocation52_spill] sm:$0xff] %v5694_v4  ;;  %v5700_v13 = vld [vmem:[%s6929_s4 + $0x84] ss:$16 sps:$4 sm:$0xff]   ;;  %v5706_v60 = vld [vmem:[%s6929_s4 + $0x8c] ss:$16 sps:$4 sm:$0xff]  }
 0x6b7   :  { %7496 = vst [vmem:[#allocation53_spill] sm:$0xff] %v5700_v13  ;;  %7497 = vst [vmem:[#allocation54_spill] sm:$0xff] %v5706_v60 }
 0x6b9   :  { %1961 = vmatpush1.bf16.msra.mxu0 %v5688_v32  ;;  %2002 = vmatpush1.bf16.msra.mxu1 %v5694_v4  ;;  %v5712_v32 = vld [vmem:[%s6929_s4 + $0x80] ss:$16 sps:$4 sm:$0xff]   ;;  %v5718_v4 = vld [vmem:[%s6929_s4 + $0x88] ss:$16 sps:$4 sm:$0xff]  }
 0x6ba   :  { %1962 = vmatprep.subr.bf16.mxu0 %v5700_v13  ;;  %2003 = vmatprep.subr.bf16.mxu1 %v5706_v60  ;;  %7498 = vst [vmem:[#allocation55_spill] sm:$0xff] %v5712_v32  ;;  %7499 = vst [vmem:[#allocation56_spill] sm:$0xff] %v5718_v4  ;;  %v5724_v13 = vld [vmem:[%s6929_s4 + $0xa4] ss:$16 sps:$4 sm:$0xff]   ;;  %v5730_v60 = vld [vmem:[%s6929_s4 + $0xac] ss:$16 sps:$4 sm:$0xff]  }
 0x6bb   :  { %7500 = vst [vmem:[#allocation57_spill] sm:$0xff] %v5724_v13  ;;  %7501 = vst [vmem:[#allocation58_spill] sm:$0xff] %v5730_v60 }
 0x6bd   :  { %1963 = vmatpush1.bf16.msra.mxu0 %v5712_v32  ;;  %2004 = vmatpush1.bf16.msra.mxu1 %v5718_v4  ;;  %v5736_v32 = vld [vmem:[%s6929_s4 + $0xa0] ss:$16 sps:$4 sm:$0xff]   ;;  %v5742_v4 = vld [vmem:[%s6929_s4 + $0xa8] ss:$16 sps:$4 sm:$0xff]  }
 0x6be   :  { %1964 = vmatprep.subr.bf16.mxu0 %v5724_v13  ;;  %2005 = vmatprep.subr.bf16.mxu1 %v5730_v60  ;;  %7502 = vst [vmem:[#allocation61_spill] sm:$0xff] %v5736_v32  ;;  %7503 = vst [vmem:[#allocation75_spill] sm:$0xff] %v5742_v4  ;;  %v5748_v13 = vld [vmem:[%s6929_s4 + $0xc4] ss:$16 sps:$4 sm:$0xff]   ;;  %v5754_v60 = vld [vmem:[%s6929_s4 + $0xcc] ss:$16 sps:$4 sm:$0xff]  }
 0x6bf   :  { %7504 = vst [vmem:[#allocation62_spill] sm:$0xff] %v5748_v13  ;;  %7505 = vst [vmem:[#allocation76_spill] sm:$0xff] %v5754_v60 }
 0x6c1   :  { %1965 = vmatpush1.bf16.msra.mxu0 %v5736_v32  ;;  %2006 = vmatpush1.bf16.msra.mxu1 %v5742_v4  ;;  %v5760_v32 = vld [vmem:[%s6929_s4 + $0xc0] ss:$16 sps:$4 sm:$0xff]   ;;  %v5766_v4 = vld [vmem:[%s6929_s4 + $0xc8] ss:$16 sps:$4 sm:$0xff]  }
 0x6c2   :  { %1966 = vmatprep.subr.bf16.mxu0 %v5748_v13  ;;  %2007 = vmatprep.subr.bf16.mxu1 %v5754_v60  ;;  %7506 = vst [vmem:[#allocation59_spill] sm:$0xff] %v5760_v32  ;;  %7507 = vst [vmem:[#allocation60_spill] sm:$0xff] %v5766_v4  ;;  %v5772_v13 = vld [vmem:[%s6929_s4 + $0xe4] ss:$16 sps:$4 sm:$0xff]   ;;  %v5778_v60 = vld [vmem:[%s6929_s4 + $0xec] ss:$16 sps:$4 sm:$0xff]  }
 0x6c3   :  { %7508 = vst [vmem:[#allocation63_spill] sm:$0xff] %v5772_v13  ;;  %7509 = vst [vmem:[#allocation77_spill] sm:$0xff] %v5778_v60 }
 0x6c5   :  { %1967 = vmatpush1.bf16.msra.mxu0 %v5760_v32  ;;  %2008 = vmatpush1.bf16.msra.mxu1 %v5766_v4  ;;  %v5784_v32 = vld [vmem:[%s6929_s4 + $0xe0] ss:$16 sps:$4 sm:$0xff]   ;;  %v5790_v4 = vld [vmem:[%s6929_s4 + $0xe8] ss:$16 sps:$4 sm:$0xff]  }
 0x6c6   :  { %1968 = vmatprep.subr.bf16.mxu0 %v5772_v13  ;;  %2009 = vmatprep.subr.bf16.mxu1 %v5778_v60  ;;  %7510 = vst [vmem:[#allocation64_spill] sm:$0xff] %v5784_v32  ;;  %7511 = vst [vmem:[#allocation78_spill] sm:$0xff] %v5790_v4  ;;  %v7512_v13 = vld [vmem:[#allocation15_spill] sm:$0xff] }
 0x6c9   :  { %1969 = vmatpush1.bf16.msra.mxu0 %v5784_v32  ;;  %2010 = vmatpush1.bf16.msra.mxu1 %v5790_v4 }
 0x6ca   :  { %2059 = vmatprep.subr.bf16.mxu0 %v7512_v13  ;;  %2100 = vmatprep.subr.bf16.mxu1 %v7513_v12 }
 0x75f   :  { %v5795_v17 = vpop.f32.mrb[36].mxu0  ;;  %v5797_v60 = vpop.f32.mrb[68].mxu1 }
 0x760   :  { %v5799_v43 = vpop.f32.mrb[37].mxu0  ;;  %v5801_v0 = vpop.f32.mrb[69].mxu1 }
 0x761   :  { %v1805_v32 = vpop.f32.mrb[38].mxu0  ;;  %v1846_v40 = vpop.f32.mrb[70].mxu1 }
 0x762   :  { %v1806_v63 = vpop.f32.mrb[39].mxu0  ;;  %v1847_v44 = vpop.f32.mrb[71].mxu1 }
 0x77f   :  { %v1883_v38 = vpop.f32.mrb[40].mxu0  ;;  %v1924_v1 = vpop.f32.mrb[72].mxu1 }
 0x780   :  { %v1931_v4 = vadd.f32 %v1883_v38, %v7514_v50  ;;  %v1933_v13 = vadd.f32 %v1924_v1, %v7515_v10  ;;  %v1885_v6 = vpop.f32.mrb[41].mxu0  ;;  %v1926_v12 = vpop.f32.mrb[73].mxu1 }
 0x781   :  { %v1932_v62 = vadd.f32 %v1885_v6, %v7516_v7  ;;  %v1934_v30 = vadd.f32 %v1926_v12, %v7517_v19  ;;  %v1887_v11 = vpop.f32.mrb[42].mxu0  ;;  %v1928_v31 = vpop.f32.mrb[74].mxu1 }
 0x782   :  { %v1935_v57 = vmul.f32 0.5, %v1931_v4  ;;  %v1888_v47 = vpop.f32.mrb[43].mxu0  ;;  %v1929_v32 = vpop.f32.mrb[75].mxu1  ;;  %v1937_v44 = vmul.f32 0.5, %v1933_v13 }
 0x783   :  { %v1936_v40 = vmul.f32 0.5, %v1932_v62 }
 0x784   :  { %3784 = vtanh.f32 %v1935_v57 }
 0x785   :  { %3786 = vtanh.f32 %v1936_v40 }
 0x786   :  { %3788 = vtanh.f32 %v1934_v30 }
 0x787   :  { %3790 = vtanh.f32 %v1937_v44 }
 0x78e   :  { %v3785_v63 = vpop.eup %3784 }
 0x78f   :  { %v1941_v50 = vmul.f32 0.5, %v3785_v63  ;;  %v3787_v38 = vpop.eup %3786 }
 0x790   :  { %v1942_v1 = vmul.f32 0.5, %v3787_v38  ;;  %v3789_v21 = vpop.eup %3788 }
 0x791   :  { %v1944_v10 = vadd.f32 0.5, %v1941_v50  ;;  %v3791_v47 = vpop.eup %3790 }
 0x792   :  { %v1945_v7 = vadd.f32 0.5, %v1942_v1  ;;  %v1943_v4 = vmul.f32 0.5, %v3791_v47 }
 0x793   :  { %v1949_v6 = vmul.f32 %v3789_v21, %v1944_v10 }
 0x794   :  { %v1948_v11 = vmul.f32 %v1945_v7, %v5498_v52  ;;  %v1946_v57 = vadd.f32 0.5, %v1943_v4 }
 0x796   :  { %v5808_v31 = vadd.f32 %v1949_v6, %v1948_v11 }
 0x798   :  { %3792 = vtanh.f32 %v5808_v31 }
 0x7a2   :  { %v3793_v30 = vpop.eup %3792 }
 0x7a3   :  { %v1952_v19 = vmul.f32 %v3793_v30, %v1946_v57 }
 0x7a5   :  { %v5811_v62 = vpack.c.bf16 %v1952_v19, %v1952_v19 }
 0x7a7   :  { %1987 = vmatmul.mubr.bf16.vlgmr.msra.gmra.mrb[44].mxu0 %v5811_v62  ;;  %2028 = vmatmul.mubr.bf16.vlgmr.msra.gmra.mrb[76].mxu1 %v5811_v62 }
 0x7a8   :  { %2060 = vmatpush1.bf16.msra.mxu0 %v5068_v14  ;;  %2101 = vmatpush1.bf16.msra.mxu1 %v5074_v9  ;;  %v7518_v14 = vld [vmem:[#allocation3_spill] sm:$0xff]  ;;  %v7519_v9 = vld [vmem:[#allocation37_spill] sm:$0xff] }
 0x7a9   :  { %2061 = vmatprep.subr.bf16.mxu0 %v5080_v5  ;;  %2102 = vmatprep.subr.bf16.mxu1 %v5086_v36  ;;  %v7520_v5 = vld [vmem:[#allocation17_spill] sm:$0xff]  ;;  %v7521_v36 = vld [vmem:[#allocation38_spill] sm:$0xff] }
 0x7aa   :  { %2091 = vmatprep.mubr.bf16.mxu0 %v7280_v56  ;;  %2132 = vmatprep.mubr.bf16.mxu1 %v7280_v56 }
 0x7ac   :  { %2062 = vmatpush1.bf16.msra.mxu0 %v5094_v28  ;;  %2103 = vmatpush1.bf16.msra.mxu1 %v5100_v29  ;;  %v7522_v28 = vld [vmem:[#allocation4_spill] sm:$0xff]  ;;  %v7523_v29 = vld [vmem:[#allocation39_spill] sm:$0xff] }
 0x7ad   :  { %2063 = vmatprep.subr.bf16.mxu0 %v5106_v33  ;;  %2104 = vmatprep.subr.bf16.mxu1 %v5112_v35  ;;  %v7524_v33 = vld [vmem:[#allocation18_spill] sm:$0xff]  ;;  %v7525_v35 = vld [vmem:[#allocation40_spill] sm:$0xff] }
 0x7b0   :  { %2064 = vmatpush1.bf16.msra.mxu0 %v5118_v37  ;;  %2105 = vmatpush1.bf16.msra.mxu1 %v5124_v41  ;;  %v7526_v37 = vld [vmem:[#allocation5_spill] sm:$0xff] }
 0x7b1   :  { %2065 = vmatprep.subr.bf16.mxu0 %v5130_v39  ;;  %2106 = vmatprep.subr.bf16.mxu1 %v5136_v45  ;;  %v7527_v41 = vld [vmem:[#allocation41_spill] sm:$0xff]  ;;  %v7528_v39 = vld [vmem:[#allocation19_spill] sm:$0xff]  ;;  %v7529_v45 = vld [vmem:[#allocation42_spill] sm:$0xff] }
 0x7b4   :  { %2066 = vmatpush1.bf16.msra.mxu0 %v5142_v2  ;;  %2107 = vmatpush1.bf16.msra.mxu1 %v5523_v20  ;;  %v7530_v2 = vld [vmem:[#allocation6_spill] sm:$0xff] }
 0x7b5   :  { %2067 = vmatprep.subr.bf16.mxu0 %v5149_v48  ;;  %2108 = vmatprep.subr.bf16.mxu1 %v5530_v46  ;;  %v7531_v48 = vld [vmem:[#allocation43_spill] sm:$0xff] }
 0x7b8   :  { %2068 = vmatpush1.bf16.msra.mxu0 %v7452_v24  ;;  %2109 = vmatpush1.bf16.msra.mxu1 %v5537_v42 }
 0x7b9   :  { %2069 = vmatprep.subr.bf16.mxu0 %v7518_v14  ;;  %2110 = vmatprep.subr.bf16.mxu1 %v7519_v9 }
 0x7bc   :  { %2070 = vmatpush1.bf16.msra.mxu0 %v7520_v5  ;;  %2111 = vmatpush1.bf16.msra.mxu1 %v7521_v36 }
 0x7bd   :  { %2071 = vmatprep.subr.bf16.mxu0 %v7522_v28  ;;  %2112 = vmatprep.subr.bf16.mxu1 %v7523_v29 }
 0x7c0   :  { %2072 = vmatpush1.bf16.msra.mxu0 %v7524_v33  ;;  %2113 = vmatpush1.bf16.msra.mxu1 %v7525_v35 }
 0x7c1   :  { %2073 = vmatprep.subr.bf16.mxu0 %v7526_v37  ;;  %2114 = vmatprep.subr.bf16.mxu1 %v7527_v41 }
 0x7c4   :  { %2074 = vmatpush1.bf16.msra.mxu0 %v7528_v39  ;;  %2115 = vmatpush1.bf16.msra.mxu1 %v7529_v45 }
 0x7c5   :  { %2141 = vmatprep.subr.bf16.mxu0 %v7530_v2  ;;  %2182 = vmatprep.subr.bf16.mxu1 %v7531_v48 }
 0x87a   :  { %v1988_v21 = vpop.f32.mrb[44].mxu0  ;;  %v2029_v52 = vpop.f32.mrb[76].mxu1 }
 0x87b   :  { %v1989_v24 = vadd.f32 %v1988_v21, %v5795_v17  ;;  %v2030_v13 = vadd.f32 %v2029_v52, %v5797_v60  ;;  %v1990_v12 = vpop.f32.mrb[45].mxu0  ;;  %v2031_v32 = vpop.f32.mrb[77].mxu1 }
 0x87c   :  { %v1991_v40 = vadd.f32 %v1990_v12, %v5799_v43  ;;  %v2032_v44 = vadd.f32 %v2031_v32, %v5801_v0  ;;  %v1992_v63 = vpop.f32.mrb[46].mxu0  ;;  %v2033_v50 = vpop.f32.mrb[78].mxu1  ;;  %v7549_v12 = vld [vmem:[#allocation29_spill] sm:$0xff]  ;;  %v7550_v32 = vld [vmem:[#allocation30_spill] sm:$0xff] }
 0x87d   :  { %v2036_v38 = vadd.f32 %v1989_v24, %v4936_v8  ;;  %v1993_v10 = vpop.f32.mrb[47].mxu0  ;;  %v2034_v1 = vpop.f32.mrb[79].mxu1  ;;  %v2038_v60 = vadd.f32 %v2030_v13, %v4955_v25  ;;  %v7548_v13 = vld [vmem:[#allocation28_spill] sm:$0xff]  ;;  %v7553_v63 = vld [vmem:[#allocation33_spill] sm:$0xff]  ;;  %v7554_v50 = vld [vmem:[#allocation34_spill] sm:$0xff] }
 0x87e   :  { %v2037_v7 = vadd.f32 %v1991_v40, %v4940_v15  ;;  %v2039_v17 = vadd.f32 %v2032_v44, %v4949_v34  ;;  %v7551_v40 = vld [vmem:[#allocation31_spill] sm:$0xff]  ;;  %v7552_v44 = vld [vmem:[#allocation32_spill] sm:$0xff]  ;;  %v7557_v1 = vld [vmem:[#allocation45_spill] sm:$0xff] }
 0x87f   :  { %v2040_v6 = vmul.f32 0.5, %v2036_v38  ;;  %v2042_v43 = vmul.f32 0.5, %v2038_v60  ;;  %v7555_v38 = vld [vmem:[#allocation35_spill] sm:$0xff]  ;;  %v7556_v10 = vld [vmem:[#allocation36_spill] sm:$0xff] }
 0x880   :  { %v2041_v11 = vmul.f32 0.5, %v2037_v7  ;;  %v7558_v7 = vld [vmem:[#allocation46_spill] sm:$0xff]  ;;  %v7563_v60 = vld [vmem:[#allocation51_spill] sm:$0xff] }
 0x881   :  { %3794 = vtanh.f32 %v2040_v6  ;;  %v7560_v6 = vld [vmem:[#allocation48_spill] sm:$0xff] }
 0x882   :  { %3796 = vtanh.f32 %v2041_v11  ;;  %v7561_v11 = vld [vmem:[#allocation49_spill] sm:$0xff] }
 0x883   :  { %3798 = vtanh.f32 %v2039_v17  ;;  %v7562_v17 = vld [vmem:[#allocation50_spill] sm:$0xff] }
 0x884   :  { %3800 = vtanh.f32 %v2042_v43  ;;  %v7564_v43 = vld [vmem:[#allocation52_spill] sm:$0xff] }
 0x88b   :  { %v3795_v47 = vpop.eup %3794 }
 0x88c   :  { %v2046_v0 = vmul.f32 0.5, %v3795_v47  ;;  %v3797_v4 = vpop.eup %3796  ;;  %v7565_v47 = vld [vmem:[#allocation53_spill] sm:$0xff] }
 0x88d   :  { %v2047_v30 = vmul.f32 0.5, %v3797_v4  ;;  %v3799_v19 = vpop.eup %3798  ;;  %v7567_v4 = vld [vmem:[#allocation55_spill] sm:$0xff] }
 0x88e   :  { %v2049_v57 = vadd.f32 0.5, %v2046_v0  ;;  %v3801_v37 = vpop.eup %3800  ;;  %v7566_v0 = vld [vmem:[#allocation54_spill] sm:$0xff] }
 0x88f   :  { %v2050_v14 = vadd.f32 0.5, %v2047_v30  ;;  %v2048_v39 = vmul.f32 0.5, %v3801_v37  ;;  %v7569_v30 = vld [vmem:[#allocation57_spill] sm:$0xff]  ;;  %v7574_v37 = vld [vmem:[#allocation76_spill] sm:$0xff] }
 0x890   :  { %v2054_v5 = vmul.f32 %v3799_v19, %v2049_v57  ;;  %v7568_v57 = vld [vmem:[#allocation56_spill] sm:$0xff]  ;;  %v7570_v19 = vld [vmem:[#allocation58_spill] sm:$0xff] }
 0x891   :  { %v2053_v28 = vmul.f32 %v2050_v14, %v5598_v54  ;;  %v2051_v2 = vadd.f32 0.5, %v2048_v39  ;;  %v7547_v54 = vld [vmem:[#allocation14_spill] sm:$0xff]  ;;  %v7571_v14 = vld [vmem:[#allocation61_spill] sm:$0xff]  ;;  %v7575_v39 = vld [vmem:[#allocation59_spill] sm:$0xff] }
 0x893   :  { %v5858_v33 = vadd.f32 %v2054_v5, %v2053_v28  ;;  %v7572_v5 = vld [vmem:[#allocation75_spill] sm:$0xff]  ;;  %v7573_v28 = vld [vmem:[#allocation62_spill] sm:$0xff] }
 0x895   :  { %3802 = vtanh.f32 %v5858_v33 }
 0x89f   :  { %v3803_v21 = vpop.eup %3802 }
 0x8a0   :  { %v5861_v52 = vmul.f32 %v3803_v21, %v2051_v2  ;;  %v7576_v2 = vld [vmem:[#allocation60_spill] sm:$0xff]  ;;  %v7577_v21 = vld [vmem:[#allocation63_spill] sm:$0xff] }
 0x8a2   :  { %7532 = vst [vmem:[#allocation16_spill] sm:$0xff] %v5861_v52  ;;  %v2058_v24 = vpack.c.bf16 %v5861_v52, %v5861_v52 }
 0x8a4   :  { %2092 = vmatmul.mubr.bf16.vlgmr.msra.gmra.mrb[48].mxu0 %v2058_v24  ;;  %2133 = vmatmul.mubr.bf16.vlgmr.msra.gmra.mrb[80].mxu1 %v2058_v24  ;;  %v7578_v24 = vld [vmem:[#allocation77_spill] sm:$0xff] }
 0x8a5   :  { %2142 = vmatpush1.bf16.msra.mxu0 %v5228_v61  ;;  %2183 = vmatpush1.bf16.msra.mxu1 %v5234_v3  ;;  %v7533_v61 = vld [vmem:[#allocation7_spill] sm:$0xff]  ;;  %v7534_v3 = vld [vmem:[#allocation21_spill] sm:$0xff] }
 0x8a6   :  { %2143 = vmatprep.subr.bf16.mxu0 %v5240_v22  ;;  %2184 = vmatprep.subr.bf16.mxu1 %v5246_v23  ;;  %v7535_v22 = vld [vmem:[#allocation8_spill] sm:$0xff]  ;;  %v7536_v23 = vld [vmem:[#allocation22_spill] sm:$0xff] }
 0x8a7   :  { %2173 = vmatprep.mubr.bf16.mxu0 %v7280_v56  ;;  %2214 = vmatprep.mubr.bf16.mxu1 %v7280_v56 }
 0x8a9   :  { %2144 = vmatpush1.bf16.msra.mxu0 %v5254_v26  ;;  %2185 = vmatpush1.bf16.msra.mxu1 %v5260_v16  ;;  %v7537_v26 = vld [vmem:[#allocation9_spill] sm:$0xff]  ;;  %v7538_v16 = vld [vmem:[#allocation23_spill] sm:$0xff] }
 0x8aa   :  { %2145 = vmatprep.subr.bf16.mxu0 %v5266_v27  ;;  %2186 = vmatprep.subr.bf16.mxu1 %v5272_v55  ;;  %v7539_v27 = vld [vmem:[#allocation10_spill] sm:$0xff]  ;;  %v7540_v55 = vld [vmem:[#allocation24_spill] sm:$0xff] }
 0x8ad   :  { %2146 = vmatpush1.bf16.msra.mxu0 %v5278_v53  ;;  %2187 = vmatpush1.bf16.msra.mxu1 %v5284_v59  ;;  %v7541_v53 = vld [vmem:[#allocation11_spill] sm:$0xff]  ;;  %v7542_v59 = vld [vmem:[#allocation25_spill] sm:$0xff] }
 0x8ae   :  { %2147 = vmatprep.subr.bf16.mxu0 %v5290_v49  ;;  %2188 = vmatprep.subr.bf16.mxu1 %v5296_v58  ;;  %v7543_v49 = vld [vmem:[#allocation12_spill] sm:$0xff]  ;;  %v7544_v58 = vld [vmem:[#allocation26_spill] sm:$0xff] }
 0x8b1   :  { %2148 = vmatpush1.bf16.msra.mxu0 %v5302_v18  ;;  %2189 = vmatpush1.bf16.msra.mxu1 %v5308_v51  ;;  %v7545_v18 = vld [vmem:[#allocation13_spill] sm:$0xff]  ;;  %v7546_v51 = vld [vmem:[#allocation27_spill] sm:$0xff] }
 0x8b2   :  { %2149 = vmatprep.subr.bf16.mxu0 %v7533_v61  ;;  %2190 = vmatprep.subr.bf16.mxu1 %v7534_v3  ;;  %v7579_v61 = vld [vmem:[#allocation64_spill] sm:$0xff]  ;;  %v7580_v3 = vld [vmem:[#allocation78_spill] sm:$0xff] }
 0x8b5   :  { %2150 = vmatpush1.bf16.msra.mxu0 %v7535_v22  ;;  %2191 = vmatpush1.bf16.msra.mxu1 %v7536_v23  ;;  %v5936_v22 = vld [vmem:[%s6926_s5 + $0x4] ss:$16 sps:$4 sm:$0xff]   ;;  %v5942_v23 = vld [vmem:[%s6926_s5 + $0xc] ss:$16 sps:$4 sm:$0xff]  }
 0x8b6   :  { %2151 = vmatprep.subr.bf16.mxu0 %v7537_v26  ;;  %2192 = vmatprep.subr.bf16.mxu1 %v7538_v16  ;;  %7581 = vst [vmem:[#allocation15_spill] sm:$0xff] %v5936_v22  ;;  %7582 = vst [vmem:[#allocation2_spill] sm:$0xff] %v5942_v23 }
 0x8b9   :  { %2152 = vmatpush1.bf16.msra.mxu0 %v7539_v27  ;;  %2193 = vmatpush1.bf16.msra.mxu1 %v7540_v55 }
 0x8ba   :  { %2153 = vmatprep.subr.bf16.mxu0 %v7541_v53  ;;  %2194 = vmatprep.subr.bf16.mxu1 %v7542_v59 }
 0x8bd   :  { %2154 = vmatpush1.bf16.msra.mxu0 %v7543_v49  ;;  %2195 = vmatpush1.bf16.msra.mxu1 %v7544_v58 }
 0x8be   :  { %2155 = vmatprep.subr.bf16.mxu0 %v7545_v18  ;;  %2196 = vmatprep.subr.bf16.mxu1 %v7546_v51 }
 0x8c1   :  { %2156 = vmatpush1.bf16.msra.mxu0 %v7547_v54  ;;  %2197 = vmatpush1.bf16.msra.mxu1 %v7548_v13  ;;  %v7583_v54 = vld [vmem:[#allocation67_spill] sm:$0xff] }
 0x8c2   :  { %2246 = vmatprep.subr.bf16.mxu0 %v7549_v12  ;;  %2287 = vmatprep.subr.bf16.mxu1 %v7550_v32  ;;  %v7584_v12 = vld [vmem:[#allocation81_spill] sm:$0xff] }
 0x8c4   :  { %2174 = vmatmul.mubr.bf16.vlgmr.msra.gmra.mrb[52].mxu0 %v5811_v62  ;;  %2215 = vmatmul.mubr.bf16.vlgmr.msra.gmra.mrb[84].mxu1 %v5811_v62  ;;  %v7559_v62 = vld [vmem:[#allocation47_spill] sm:$0xff] }
 0x8c5   :  { %2247 = vmatpush1.bf16.msra.mxu0 %v7551_v40  ;;  %2288 = vmatpush1.bf16.msra.mxu1 %v7552_v44 }
 0x8c6   :  { %2248 = vmatprep.subr.bf16.mxu0 %v7553_v63  ;;  %2289 = vmatprep.subr.bf16.mxu1 %v7554_v50  ;;  %v7585_v63 = vld [vmem:[#allocation68_spill] sm:$0xff] }
 0x8c7   :  { %2278 = vmatprep.mubr.bf16.mxu0 %v7280_v56  ;;  %2319 = vmatprep.mubr.bf16.mxu1 %v7280_v56 }
 0x8c9   :  { %2249 = vmatpush1.bf16.msra.mxu0 %v7555_v38  ;;  %2290 = vmatpush1.bf16.msra.mxu1 %v7556_v10  ;;  %v7586_v38 = vld [vmem:[#allocation82_spill] sm:$0xff] }
 0x8ca   :  { %2250 = vmatprep.subr.bf16.mxu0 %v7557_v1  ;;  %2291 = vmatprep.subr.bf16.mxu1 %v7558_v7 }
 0x8cd   :  { %2251 = vmatpush1.bf16.msra.mxu0 %v7559_v62  ;;  %2292 = vmatpush1.bf16.msra.mxu1 %v7560_v6 }
 0x8ce   :  { %2252 = vmatprep.subr.bf16.mxu0 %v7561_v11  ;;  %2293 = vmatprep.subr.bf16.mxu1 %v7562_v17 }
 0x8d1   :  { %2253 = vmatpush1.bf16.msra.mxu0 %v7563_v60  ;;  %2294 = vmatpush1.bf16.msra.mxu1 %v7564_v43 }
 0x8d2   :  { %2254 = vmatprep.subr.bf16.mxu0 %v7565_v47  ;;  %2295 = vmatprep.subr.bf16.mxu1 %v7566_v0 }
 0x8d5   :  { %2255 = vmatpush1.bf16.msra.mxu0 %v7567_v4  ;;  %2296 = vmatpush1.bf16.msra.mxu1 %v7568_v57 }
 0x8d6   :  { %2256 = vmatprep.subr.bf16.mxu0 %v7569_v30  ;;  %2297 = vmatprep.subr.bf16.mxu1 %v7570_v19 }
 0x8d9   :  { %2257 = vmatpush1.bf16.msra.mxu0 %v7571_v14  ;;  %2298 = vmatpush1.bf16.msra.mxu1 %v7572_v5 }
 0x8da   :  { %2258 = vmatprep.subr.bf16.mxu0 %v7573_v28  ;;  %2299 = vmatprep.subr.bf16.mxu1 %v7574_v37 }
 0x8dd   :  { %2259 = vmatpush1.bf16.msra.mxu0 %v7575_v39  ;;  %2300 = vmatpush1.bf16.msra.mxu1 %v7576_v2 }
 0x8de   :  { %2260 = vmatprep.subr.bf16.mxu0 %v7577_v21  ;;  %2301 = vmatprep.subr.bf16.mxu1 %v7578_v24 }
 0x8e1   :  { %2261 = vmatpush1.bf16.msra.mxu0 %v7579_v61  ;;  %2302 = vmatpush1.bf16.msra.mxu1 %v7580_v3 }
 0x8e2   :  { %2351 = vmatprep.subr.bf16.mxu0 %v5936_v22  ;;  %2392 = vmatprep.subr.bf16.mxu1 %v5942_v23 }
 0x977   :  { %v5945_v26 = vpop.f32.mrb[48].mxu0  ;;  %v5947_v16 = vpop.f32.mrb[80].mxu1 }
 0x978   :  { %v5949_v27 = vpop.f32.mrb[49].mxu0  ;;  %v5951_v55 = vpop.f32.mrb[81].mxu1 }
 0x979   :  { %v2097_v53 = vpop.f32.mrb[50].mxu0  ;;  %v2138_v59 = vpop.f32.mrb[82].mxu1 }
 0x97a   :  { %v2098_v49 = vpop.f32.mrb[51].mxu0  ;;  %v2139_v58 = vpop.f32.mrb[83].mxu1 }
 0x997   :  { %v2175_v18 = vpop.f32.mrb[52].mxu0  ;;  %v2216_v51 = vpop.f32.mrb[84].mxu1 }
 0x998   :  { %v2223_v13 = vadd.f32 %v2175_v18, %v7583_v54  ;;  %v2225_v32 = vadd.f32 %v2216_v51, %v7584_v12  ;;  %v2177_v40 = vpop.f32.mrb[53].mxu0  ;;  %v2218_v44 = vpop.f32.mrb[85].mxu1 }
 0x999   :  { %v2224_v50 = vadd.f32 %v2177_v40, %v7585_v63  ;;  %v2226_v10 = vadd.f32 %v2218_v44, %v7586_v38  ;;  %v2179_v52 = vpop.f32.mrb[54].mxu0  ;;  %v2220_v23 = vpop.f32.mrb[86].mxu1  ;;  %v5980_v38 = vld [vmem:[%s6926_s5 + $0x24] ss:$16 sps:$4 sm:$0xff]  }
 0x99a   :  { %v2227_v22 = vmul.f32 0.5, %v2223_v13  ;;  %v2180_v3 = vpop.f32.mrb[55].mxu0  ;;  %v2221_v53 = vpop.f32.mrb[87].mxu1  ;;  %v2229_v49 = vmul.f32 0.5, %v2225_v32 }
 0x99b   :  { %v2228_v59 = vmul.f32 0.5, %v2224_v50  ;;  %v5994_v53 = vld [vmem:[%s6926_s5 + $0x20] ss:$16 sps:$4 sm:$0xff]  }
 0x99c   :  { %3804 = vtanh.f32 %v2227_v22 }
 0x99d   :  { %3806 = vtanh.f32 %v2228_v59  ;;  %v6000_v59 = vld [vmem:[%s6926_s5 + $0x28] ss:$16 sps:$4 sm:$0xff]  }
 0x99e   :  { %3808 = vtanh.f32 %v2226_v10  ;;  %v5986_v10 = vld [vmem:[%s6926_s5 + $0x2c] ss:$16 sps:$4 sm:$0xff]  }
 0x99f   :  { %3810 = vtanh.f32 %v2229_v49  ;;  %v6006_v49 = vld [vmem:[%s6926_s5 + $0x44] ss:$16 sps:$4 sm:$0xff]  }
 0x9a6   :  { %v3805_v58 = vpop.eup %3804 }
 0x9a7   :  { %v2233_v18 = vmul.f32 0.5, %v3805_v58  ;;  %v3807_v54 = vpop.eup %3806  ;;  %v6012_v58 = vld [vmem:[%s6926_s5 + $0x4c] ss:$16 sps:$4 sm:$0xff]  }
 0x9a8   :  { %v2234_v12 = vmul.f32 0.5, %v3807_v54  ;;  %v3809_v61 = vpop.eup %3808  ;;  %v6024_v54 = vld [vmem:[%s6926_s5 + $0x48] ss:$16 sps:$4 sm:$0xff]  }
 0x9a9   :  { %v2236_v51 = vadd.f32 0.5, %v2233_v18  ;;  %v3811_v3 = vpop.eup %3810  ;;  %v6018_v18 = vld [vmem:[%s6926_s5 + $0x40] ss:$16 sps:$4 sm:$0xff]  }
 0x9aa   :  { %v2237_v40 = vadd.f32 0.5, %v2234_v12  ;;  %v2235_v22 = vmul.f32 0.5, %v3811_v3  ;;  %v6036_v12 = vld [vmem:[%s6926_s5 + $0x6c] ss:$16 sps:$4 sm:$0xff]  }
 0x9ab   :  { %v2241_v63 = vmul.f32 %v3809_v61, %v2236_v51  ;;  %v5968_v61 = vld [vmem:[%s6926_s5] ss:$16 sps:$4 sm:$0xff]   ;;  %v6030_v51 = vld [vmem:[%s6926_s5 + $0x64] ss:$16 sps:$4 sm:$0xff]  }
 0x9ac   :  { %v2240_v52 = vmul.f32 %v2237_v40, %v5808_v31  ;;  %v2238_v13 = vadd.f32 0.5, %v2235_v22  ;;  %v5974_v31 = vld [vmem:[%s6926_s5 + $0x8] ss:$16 sps:$4 sm:$0xff]   ;;  %v6042_v40 = vld [vmem:[%s6926_s5 + $0x60] ss:$16 sps:$4 sm:$0xff]  }
 0x9ae   :  { %v5958_v23 = vadd.f32 %v2241_v63, %v2240_v52  ;;  %v6049_v63 = vld [vmem:[%s6926_s5 + $0x84] ss:$16 sps:$4 sm:$0xff]   ;;  %v6056_v52 = vld [vmem:[%s6926_s5 + $0x80] ss:$16 sps:$4 sm:$0xff]  }
 0x9af   :  { %7587 = vst [vmem:[#allocation65_spill] sm:$0xff] %v6056_v52 }
 0x9b0   :  { %3812 = vtanh.f32 %v5958_v23 }
 0x9ba   :  { %v3813_v44 = vpop.eup %3812 }
 0x9bb   :  { %v2244_v32 = vmul.f32 %v3813_v44, %v2238_v13 }
 0x9bd   :  { %v5961_v50 = vpack.c.bf16 %v2244_v32, %v2244_v32 }
 0x9bf   :  { %2279 = vmatmul.mubr.bf16.vlgmr.msra.gmra.mrb[56].mxu0 %v5961_v50  ;;  %2320 = vmatmul.mubr.bf16.vlgmr.msra.gmra.mrb[88].mxu1 %v5961_v50 }
 0x9c0   :  { %2352 = vmatpush1.bf16.msra.mxu0 %v5968_v61  ;;  %2393 = vmatpush1.bf16.msra.mxu1 %v5974_v31 }
 0x9c1   :  { %2353 = vmatprep.subr.bf16.mxu0 %v5980_v38  ;;  %2394 = vmatprep.subr.bf16.mxu1 %v5986_v10 }
 0x9c2   :  { %2383 = vmatprep.mubr.bf16.mxu0 %v7280_v56  ;;  %2424 = vmatprep.mubr.bf16.mxu1 %v7280_v56 }
 0x9c4   :  { %2354 = vmatpush1.bf16.msra.mxu0 %v5994_v53  ;;  %2395 = vmatpush1.bf16.msra.mxu1 %v6000_v59 }
 0x9c5   :  { %2355 = vmatprep.subr.bf16.mxu0 %v6006_v49  ;;  %2396 = vmatprep.subr.bf16.mxu1 %v6012_v58 }
 0x9c8   :  { %2356 = vmatpush1.bf16.msra.mxu0 %v6018_v18  ;;  %2397 = vmatpush1.bf16.msra.mxu1 %v6024_v54 }
 0x9c9   :  { %2357 = vmatprep.subr.bf16.mxu0 %v6030_v51  ;;  %2398 = vmatprep.subr.bf16.mxu1 %v6036_v12 }
 0x9cc   :  { %2358 = vmatpush1.bf16.msra.mxu0 %v6042_v40  ;;  %2399 = vmatpush1.bf16.msra.mxu1 %v5523_v20  ;;  %v6063_v20 = vld [vmem:[%s6926_s5 + $0xa4] ss:$16 sps:$4 sm:$0xff]  }
 0x9cd   :  { %2359 = vmatprep.subr.bf16.mxu0 %v6049_v63  ;;  %2400 = vmatprep.subr.bf16.mxu1 %v5530_v46  ;;  %7588 = vst [vmem:[#allocation79_spill] sm:$0xff] %v6063_v20  ;;  %v6070_v46 = vld [vmem:[%s6926_s5 + $0xa0] ss:$16 sps:$4 sm:$0xff]  }
 0x9ce   :  { %7589 = vst [vmem:[#allocation66_spill] sm:$0xff] %v6070_v46 }
 0x9d0   :  { %2360 = vmatpush1.bf16.msra.mxu0 %v6056_v52  ;;  %2401 = vmatpush1.bf16.msra.mxu1 %v5537_v42  ;;  %v6077_v42 = vld [vmem:[%s6926_s5 + $0xc4] ss:$16 sps:$4 sm:$0xff]  }
 0x9d1   :  { %2361 = vmatprep.subr.bf16.mxu0 %v6063_v20  ;;  %2402 = vmatprep.subr.bf16.mxu1 %v7519_v9  ;;  %7590 = vst [vmem:[#allocation80_spill] sm:$0xff] %v6077_v42  ;;  %v6084_v9 = vld [vmem:[%s6926_s5 + $0xc0] ss:$16 sps:$4 sm:$0xff]  }
 0x9d2   :  { %7591 = vst [vmem:[#allocation3_spill] sm:$0xff] %v6084_v9 }
 0x9d4   :  { %2362 = vmatpush1.bf16.msra.mxu0 %v6070_v46  ;;  %2403 = vmatpush1.bf16.msra.mxu1 %v7521_v36  ;;  %v6091_v36 = vld [vmem:[%s6926_s5 + $0xe4] ss:$16 sps:$4 sm:$0xff]  }
 0x9d5   :  { %2363 = vmatprep.subr.bf16.mxu0 %v6077_v42  ;;  %2404 = vmatprep.subr.bf16.mxu1 %v7523_v29  ;;  %7592 = vst [vmem:[#allocation37_spill] sm:$0xff] %v6091_v36  ;;  %v6098_v29 = vld [vmem:[%s6926_s5 + $0xe0] ss:$16 sps:$4 sm:$0xff]  }
 0x9d6   :  { %7593 = vst [vmem:[#allocation17_spill] sm:$0xff] %v6098_v29 }
 0x9d8   :  { %2364 = vmatpush1.bf16.msra.mxu0 %v6084_v9  ;;  %2405 = vmatpush1.bf16.msra.mxu1 %v7525_v35  ;;  %v6105_v35 = vld [vmem:[%s6928_s2 + $0x4] ss:$16 sps:$4 sm:$0xff]  }
 0x9d9   :  { %2365 = vmatprep.subr.bf16.mxu0 %v6091_v36  ;;  %2406 = vmatprep.subr.bf16.mxu1 %v7527_v41  ;;  %7594 = vst [vmem:[#allocation38_spill] sm:$0xff] %v6105_v35 }
 0x9dc   :  { %2366 = vmatpush1.bf16.msra.mxu0 %v6098_v29  ;;  %2407 = vmatpush1.bf16.msra.mxu1 %v7529_v45 }
 0x9dd   :  { %2433 = vmatprep.subr.bf16.mxu0 %v6105_v35  ;;  %2474 = vmatprep.subr.bf16.mxu1 %v7531_v48 }
 0xa92   :  { %v2280_v3 = vpop.f32.mrb[56].mxu0  ;;  %v2321_v41 = vpop.f32.mrb[88].mxu1 }
 0xa93   :  { %v2281_v22 = vadd.f32 %v2280_v3, %v5945_v26  ;;  %v2322_v13 = vadd.f32 %v2321_v41, %v5947_v16  ;;  %v2282_v44 = vpop.f32.mrb[57].mxu0  ;;  %v2323_v32 = vpop.f32.mrb[89].mxu1 }
 0xa94   :  { %v2283_v29 = vadd.f32 %v2282_v44, %v5949_v27  ;;  %v2324_v45 = vadd.f32 %v2323_v32, %v5951_v55  ;;  %v2284_v36 = vpop.f32.mrb[58].mxu0  ;;  %v2325_v9 = vpop.f32.mrb[90].mxu1 }
 0xa95   :  { %v2328_v42 = vadd.f32 %v2281_v22, %v4936_v8  ;;  %v2285_v46 = vpop.f32.mrb[59].mxu0  ;;  %v2326_v35 = vpop.f32.mrb[91].mxu1  ;;  %v2330_v16 = vadd.f32 %v2322_v13, %v4955_v25 }
 0xa96   :  { %v2329_v48 = vadd.f32 %v2283_v29, %v4940_v15  ;;  %v2331_v26 = vadd.f32 %v2324_v45, %v4949_v34 }
 0xa97   :  { %v2332_v20 = vmul.f32 0.5, %v2328_v42  ;;  %v2334_v27 = vmul.f32 0.5, %v2330_v16  ;;  %v6146_v16 = vld [vmem:[%s6928_s2 + $0x2c] ss:$16 sps:$4 sm:$0xff]  }
 0xa98   :  { %v2333_v52 = vmul.f32 0.5, %v2329_v48  ;;  %v6128_v48 = vld [vmem:[%s6928_s2] ss:$16 sps:$4 sm:$0xff]  }
 0xa99   :  { %3814 = vtanh.f32 %v2332_v20 }
 0xa9a   :  { %3816 = vtanh.f32 %v2333_v52 }
 0xa9b   :  { %3818 = vtanh.f32 %v2331_v26  ;;  %v6140_v26 = vld [vmem:[%s6928_s2 + $0x24] ss:$16 sps:$4 sm:$0xff]  }
 0xa9c   :  { %3820 = vtanh.f32 %v2334_v27  ;;  %v6154_v27 = vld [vmem:[%s6928_s2 + $0x20] ss:$16 sps:$4 sm:$0xff]  }
 0xaa3   :  { %v3815_v3 = vpop.eup %3814 }
 0xaa4   :  { %v2338_v55 = vmul.f32 0.5, %v3815_v3  ;;  %v3817_v36 = vpop.eup %3816  ;;  %v6160_v3 = vld [vmem:[%s6928_s2 + $0x28] ss:$16 sps:$4 sm:$0xff]  }
 0xaa5   :  { %v2339_v41 = vmul.f32 0.5, %v3817_v36  ;;  %v3819_v46 = vpop.eup %3818  ;;  %v6172_v36 = vld [vmem:[%s6928_s2 + $0x4c] ss:$16 sps:$4 sm:$0xff]  }
 0xaa6   :  { %v2341_v9 = vadd.f32 0.5, %v2338_v55  ;;  %v3821_v52 = vpop.eup %3820  ;;  %v6166_v55 = vld [vmem:[%s6928_s2 + $0x44] ss:$16 sps:$4 sm:$0xff]  }
 0xaa7   :  { %v2342_v35 = vadd.f32 0.5, %v2339_v41  ;;  %v2340_v20 = vmul.f32 0.5, %v3821_v52  ;;  %v6184_v41 = vld [vmem:[%s6928_s2 + $0x48] ss:$16 sps:$4 sm:$0xff]   ;;  %v6214_v52 = vld [vmem:[%s6928_s2 + $0x84] ss:$16 sps:$4 sm:$0xff]  }
 0xaa8   :  { %v2346_v22 = vmul.f32 %v3819_v46, %v2341_v9  ;;  %v6178_v9 = vld [vmem:[%s6928_s2 + $0x40] ss:$16 sps:$4 sm:$0xff]   ;;  %v6190_v46 = vld [vmem:[%s6928_s2 + $0x64] ss:$16 sps:$4 sm:$0xff]   ;;  %7596 = vst [vmem:[#allocation39_spill] sm:$0xff] %v6214_v52 }
 0xaa9   :  { %v2345_v42 = vmul.f32 %v2342_v35, %v5858_v33  ;;  %v2343_v44 = vadd.f32 0.5, %v2340_v20  ;;  %v6134_v33 = vld [vmem:[%s6928_s2 + $0x8] ss:$16 sps:$4 sm:$0xff]   ;;  %v6196_v35 = vld [vmem:[%s6928_s2 + $0x6c] ss:$16 sps:$4 sm:$0xff]  }
 0xaaa   :  { %v6220_v20 = vld [vmem:[%s6928_s2 + $0x8c] ss:$16 sps:$4 sm:$0xff]  }
 0xaab   :  { %v6118_v29 = vadd.f32 %v2346_v22, %v2345_v42  ;;  %v6202_v22 = vld [vmem:[%s6928_s2 + $0x60] ss:$16 sps:$4 sm:$0xff]   ;;  %v6208_v42 = vld [vmem:[%s6928_s2 + $0x68] ss:$16 sps:$4 sm:$0xff]   ;;  %7597 = vst [vmem:[#allocation18_spill] sm:$0xff] %v6220_v20 }
 0xaad   :  { %3822 = vtanh.f32 %v6118_v29 }
 0xab7   :  { %v3823_v13 = vpop.eup %3822 }
 0xab8   :  { %v6121_v32 = vmul.f32 %v3823_v13, %v2343_v44  ;;  %v6226_v44 = vld [vmem:[%s6928_s2 + $0x80] ss:$16 sps:$4 sm:$0xff]   ;;  %v6232_v13 = vld [vmem:[%s6928_s2 + $0x88] ss:$16 sps:$4 sm:$0xff]  }
 0xab9   :  { %7598 = vst [vmem:[#allocation40_spill] sm:$0xff] %v6226_v44  ;;  %7599 = vst [vmem:[#allocation5_spill] sm:$0xff] %v6232_v13 }
 0xaba   :  { %7595 = vst [vmem:[#allocation4_spill] sm:$0xff] %v6121_v32  ;;  %v2350_v45 = vpack.c.bf16 %v6121_v32, %v6121_v32  ;;  %v6244_v32 = vld [vmem:[%s6928_s2 + $0xac] ss:$16 sps:$4 sm:$0xff]  }
 0xabb   :  { %7601 = vst [vmem:[#allocation19_spill] sm:$0xff] %v6244_v32 }
 0xabc   :  { %2384 = vmatmul.mubr.bf16.vlgmr.msra.gmra.mrb[60].mxu0 %v2350_v45  ;;  %2425 = vmatmul.mubr.bf16.vlgmr.msra.gmra.mrb[92].mxu1 %v2350_v45  ;;  %v6238_v45 = vld [vmem:[%s6928_s2 + $0xa4] ss:$16 sps:$4 sm:$0xff]  }
 0xabd   :  { %2434 = vmatpush1.bf16.msra.mxu0 %v6128_v48  ;;  %2475 = vmatpush1.bf16.msra.mxu1 %v6134_v33  ;;  %7600 = vst [vmem:[#allocation41_spill] sm:$0xff] %v6238_v45 }
 0xabe   :  { %2435 = vmatprep.subr.bf16.mxu0 %v6140_v26  ;;  %2476 = vmatprep.subr.bf16.mxu1 %v6146_v16 }
 0xabf   :  { %2465 = vmatprep.mubr.bf16.mxu0 %v7280_v56  ;;  %2506 = vmatprep.mubr.bf16.mxu1 %v7280_v56 }
 0xac1   :  { %2436 = vmatpush1.bf16.msra.mxu0 %v6154_v27  ;;  %2477 = vmatpush1.bf16.msra.mxu1 %v6160_v3 }
 0xac2   :  { %2437 = vmatprep.subr.bf16.mxu0 %v6166_v55  ;;  %2478 = vmatprep.subr.bf16.mxu1 %v6172_v36 }
 0xac5   :  { %2438 = vmatpush1.bf16.msra.mxu0 %v6178_v9  ;;  %2479 = vmatpush1.bf16.msra.mxu1 %v6184_v41 }
 0xac6   :  { %2439 = vmatprep.subr.bf16.mxu0 %v6190_v46  ;;  %2480 = vmatprep.subr.bf16.mxu1 %v6196_v35 }
 0xac9   :  { %2440 = vmatpush1.bf16.msra.mxu0 %v6202_v22  ;;  %2481 = vmatpush1.bf16.msra.mxu1 %v6208_v42 }
 0xaca   :  { %2441 = vmatprep.subr.bf16.mxu0 %v6214_v52  ;;  %2482 = vmatprep.subr.bf16.mxu1 %v6220_v20 }
 0xacd   :  { %2442 = vmatpush1.bf16.msra.mxu0 %v6226_v44  ;;  %2483 = vmatpush1.bf16.msra.mxu1 %v6232_v13  ;;  %v6250_v44 = vld [vmem:[%s6928_s2 + $0xa0] ss:$16 sps:$4 sm:$0xff]   ;;  %v6256_v13 = vld [vmem:[%s6928_s2 + $0xa8] ss:$16 sps:$4 sm:$0xff]  }
 0xace   :  { %2443 = vmatprep.subr.bf16.mxu0 %v6238_v45  ;;  %2484 = vmatprep.subr.bf16.mxu1 %v6244_v32  ;;  %7602 = vst [vmem:[#allocation42_spill] sm:$0xff] %v6250_v44  ;;  %7603 = vst [vmem:[#allocation6_spill] sm:$0xff] %v6256_v13  ;;  %v6262_v45 = vld [vmem:[%s6928_s2 + $0xc4] ss:$16 sps:$4 sm:$0xff]   ;;  %v6268_v32 = vld [vmem:[%s6928_s2 + $0xcc] ss:$16 sps:$4 sm:$0xff]  }
 0xacf   :  { %7604 = vst [vmem:[#allocation43_spill] sm:$0xff] %v6262_v45  ;;  %7605 = vst [vmem:[#allocation7_spill] sm:$0xff] %v6268_v32 }
 0xad1   :  { %2444 = vmatpush1.bf16.msra.mxu0 %v6250_v44  ;;  %2485 = vmatpush1.bf16.msra.mxu1 %v6256_v13  ;;  %v6274_v44 = vld [vmem:[%s6928_s2 + $0xc0] ss:$16 sps:$4 sm:$0xff]   ;;  %v6280_v13 = vld [vmem:[%s6928_s2 + $0xc8] ss:$16 sps:$4 sm:$0xff]  }
 0xad2   :  { %2445 = vmatprep.subr.bf16.mxu0 %v6262_v45  ;;  %2486 = vmatprep.subr.bf16.mxu1 %v6268_v32  ;;  %7606 = vst [vmem:[#allocation21_spill] sm:$0xff] %v6274_v44  ;;  %7607 = vst [vmem:[#allocation8_spill] sm:$0xff] %v6280_v13  ;;  %v6286_v45 = vld [vmem:[%s6928_s2 + $0xe4] ss:$16 sps:$4 sm:$0xff]   ;;  %v6292_v32 = vld [vmem:[%s6928_s2 + $0xec] ss:$16 sps:$4 sm:$0xff]  }
 0xad3   :  { %7608 = vst [vmem:[#allocation22_spill] sm:$0xff] %v6286_v45  ;;  %7609 = vst [vmem:[#allocation9_spill] sm:$0xff] %v6292_v32 }
 0xad5   :  { %2446 = vmatpush1.bf16.msra.mxu0 %v6274_v44  ;;  %2487 = vmatpush1.bf16.msra.mxu1 %v6280_v13  ;;  %v6298_v44 = vld [vmem:[%s6928_s2 + $0xe0] ss:$16 sps:$4 sm:$0xff]   ;;  %v6304_v13 = vld [vmem:[%s6928_s2 + $0xe8] ss:$16 sps:$4 sm:$0xff]  }
 0xad6   :  { %2447 = vmatprep.subr.bf16.mxu0 %v6286_v45  ;;  %2488 = vmatprep.subr.bf16.mxu1 %v6292_v32  ;;  %7610 = vst [vmem:[#allocation23_spill] sm:$0xff] %v6298_v44  ;;  %7611 = vst [vmem:[#allocation10_spill] sm:$0xff] %v6304_v13  ;;  %v6310_v45 = vld [vmem:[%s6929_s4 + $0x4] ss:$16 sps:$4 sm:$0xff]   ;;  %v6316_v32 = vld [vmem:[%s6929_s4 + $0xc] ss:$16 sps:$4 sm:$0xff]  }
 0xad7   :  { %7612 = vst [vmem:[#allocation24_spill] sm:$0xff] %v6310_v45  ;;  %7613 = vst [vmem:[#allocation11_spill] sm:$0xff] %v6316_v32 }
 0xad9   :  { %2448 = vmatpush1.bf16.msra.mxu0 %v6298_v44  ;;  %2489 = vmatpush1.bf16.msra.mxu1 %v6304_v13  ;;  %v6324_v13 = vld [vmem:[%s6929_s4] ss:$16 sps:$4 sm:$0xff]  }
 0xada   :  { %2538 = vmatprep.subr.bf16.mxu0 %v6310_v45  ;;  %2579 = vmatprep.subr.bf16.mxu1 %v6316_v32  ;;  %7614 = vst [vmem:[#allocation25_spill] sm:$0xff] %v6324_v13  ;;  %v6330_v45 = vld [vmem:[%s6929_s4 + $0x8] ss:$16 sps:$4 sm:$0xff]   ;;  %v6336_v32 = vld [vmem:[%s6929_s4 + $0x24] ss:$16 sps:$4 sm:$0xff]  }
 0xadb   :  { %7615 = vst [vmem:[#allocation12_spill] sm:$0xff] %v6330_v45  ;;  %7616 = vst [vmem:[#allocation26_spill] sm:$0xff] %v6336_v32 }
 0xadc   :  { %2466 = vmatmul.mubr.bf16.vlgmr.msra.gmra.mrb[64].mxu0 %v5961_v50  ;;  %2507 = vmatmul.mubr.bf16.vlgmr.msra.gmra.mrb[96].mxu1 %v5961_v50  ;;  %v6342_v50 = vld [vmem:[%s6929_s4 + $0x2c] ss:$16 sps:$4 sm:$0xff]  }
 0xadd   :  { %2539 = vmatpush1.bf16.msra.mxu0 %v6324_v13  ;;  %2580 = vmatpush1.bf16.msra.mxu1 %v6330_v45  ;;  %7617 = vst [vmem:[#allocation13_spill] sm:$0xff] %v6342_v50  ;;  %v6350_v45 = vld [vmem:[%s6929_s4 + $0x20] ss:$16 sps:$4 sm:$0xff]  }
 0xade   :  { %2540 = vmatprep.subr.bf16.mxu0 %v6336_v32  ;;  %2581 = vmatprep.subr.bf16.mxu1 %v6342_v50  ;;  %7618 = vst [vmem:[#allocation27_spill] sm:$0xff] %v6350_v45  ;;  %v6356_v32 = vld [vmem:[%s6929_s4 + $0x28] ss:$16 sps:$4 sm:$0xff]  }
 0xadf   :  { %2570 = vmatprep.mubr.bf16.mxu0 %v7280_v56  ;;  %2611 = vmatprep.mubr.bf16.mxu1 %v7280_v56  ;;  %7619 = vst [vmem:[#allocation14_spill] sm:$0xff] %v6356_v32 }
 0xae1   :  { %2541 = vmatpush1.bf16.msra.mxu0 %v6350_v45  ;;  %2582 = vmatpush1.bf16.msra.mxu1 %v6356_v32 }
 0xae2   :  { %2542 = vmatprep.subr.bf16.mxu0 %v7557_v1  ;;  %2583 = vmatprep.subr.bf16.mxu1 %v7558_v7  ;;  %v7620_v1 = vld [vmem:[#allocation64_spill] sm:$0xff]  ;;  %v7621_v7 = vld [vmem:[#allocation78_spill] sm:$0xff] }
 0xae5   :  { %2543 = vmatpush1.bf16.msra.mxu0 %v7559_v62  ;;  %2584 = vmatpush1.bf16.msra.mxu1 %v7560_v6  ;;  %v7622_v62 = vld [vmem:[#allocation15_spill] sm:$0xff]  ;;  %v7623_v6 = vld [vmem:[#allocation2_spill] sm:$0xff] }
 0xae6   :  { %2544 = vmatprep.subr.bf16.mxu0 %v7561_v11  ;;  %2585 = vmatprep.subr.bf16.mxu1 %v7562_v17 }
 0xae9   :  { %2545 = vmatpush1.bf16.msra.mxu0 %v7563_v60  ;;  %2586 = vmatpush1.bf16.msra.mxu1 %v7564_v43 }
 0xaea   :  { %2546 = vmatprep.subr.bf16.mxu0 %v7565_v47  ;;  %2587 = vmatprep.subr.bf16.mxu1 %v7566_v0 }
 0xaed   :  { %2547 = vmatpush1.bf16.msra.mxu0 %v7567_v4  ;;  %2588 = vmatpush1.bf16.msra.mxu1 %v7568_v57 }
 0xaee   :  { %2548 = vmatprep.subr.bf16.mxu0 %v7569_v30  ;;  %2589 = vmatprep.subr.bf16.mxu1 %v7570_v19 }
 0xaf1   :  { %2549 = vmatpush1.bf16.msra.mxu0 %v7571_v14  ;;  %2590 = vmatpush1.bf16.msra.mxu1 %v7572_v5  ;;  %v7624_v14 = vld [vmem:[#allocation69_spill] sm:$0xff] }
 0xaf2   :  { %2550 = vmatprep.subr.bf16.mxu0 %v7573_v28  ;;  %2591 = vmatprep.subr.bf16.mxu1 %v7574_v37  ;;  %v7625_v28 = vld [vmem:[#allocation83_spill] sm:$0xff] }
 0xaf5   :  { %2551 = vmatpush1.bf16.msra.mxu0 %v7575_v39  ;;  %2592 = vmatpush1.bf16.msra.mxu1 %v7576_v2 }
 0xaf6   :  { %2552 = vmatprep.subr.bf16.mxu0 %v7577_v21  ;;  %2593 = vmatprep.subr.bf16.mxu1 %v7578_v24  ;;  %v7626_v21 = vld [vmem:[#allocation70_spill] sm:$0xff] }
 0xaf9   :  { %2553 = vmatpush1.bf16.msra.mxu0 %v7620_v1  ;;  %2594 = vmatpush1.bf16.msra.mxu1 %v7621_v7  ;;  %v7627_v1 = vld [vmem:[#allocation84_spill] sm:$0xff] }
 0xafa   :  { %2643 = vmatprep.subr.bf16.mxu0 %v7622_v62  ;;  %2684 = vmatprep.subr.bf16.mxu1 %v7623_v6 }
 0xb8f   :  { %v6385_v11 = vpop.f32.mrb[60].mxu0  ;;  %v6387_v17 = vpop.f32.mrb[92].mxu1 }
 0xb90   :  { %v6389_v60 = vpop.f32.mrb[61].mxu0  ;;  %v6391_v43 = vpop.f32.mrb[93].mxu1 }
 0xb91   :  { %v2389_v47 = vpop.f32.mrb[62].mxu0  ;;  %v2430_v0 = vpop.f32.mrb[94].mxu1 }
 0xb92   :  { %v2390_v4 = vpop.f32.mrb[63].mxu0  ;;  %v2431_v57 = vpop.f32.mrb[95].mxu1 }
 0xbaf   :  { %v2467_v30 = vpop.f32.mrb[64].mxu0  ;;  %v2508_v19 = vpop.f32.mrb[96].mxu1 }
 0xbb0   :  { %v2515_v5 = vadd.f32 %v2467_v30, %v7624_v14  ;;  %v2517_v37 = vadd.f32 %v2508_v19, %v7625_v28  ;;  %v2469_v39 = vpop.f32.mrb[65].mxu0  ;;  %v2510_v2 = vpop.f32.mrb[97].mxu1 }
 0xbb1   :  { %v2516_v24 = vadd.f32 %v2469_v39, %v7626_v21  ;;  %v2518_v7 = vadd.f32 %v2510_v2, %v7627_v1  ;;  %v2471_v6 = vpop.f32.mrb[66].mxu0  ;;  %v2512_v62 = vpop.f32.mrb[98].mxu1  ;;  %v7628_v1 = vld [vmem:[#allocation65_spill] sm:$0xff] }
 0xbb2   :  { %v2519_v32 = vmul.f32 0.5, %v2515_v5  ;;  %v2472_v45 = vpop.f32.mrb[67].mxu0  ;;  %v2513_v47 = vpop.f32.mrb[99].mxu1  ;;  %v2521_v4 = vmul.f32 0.5, %v2517_v37 }
 0xbb3   :  { %v2520_v0 = vmul.f32 0.5, %v2516_v24  ;;  %v7629_v47 = vld [vmem:[#allocation79_spill] sm:$0xff] }
 0xbb4   :  { %3824 = vtanh.f32 %v2519_v32 }
 0xbb5   :  { %3826 = vtanh.f32 %v2520_v0  ;;  %v6444_v0 = vld [vmem:[%s6926_s5 + $0xac] ss:$16 sps:$4 sm:$0xff]  }
 0xbb6   :  { %3828 = vtanh.f32 %v2518_v7  ;;  %v6437_v7 = vld [vmem:[%s6926_s5 + $0x88] ss:$16 sps:$4 sm:$0xff]   ;;  %7630 = vst [vmem:[#allocation28_spill] sm:$0xff] %v6444_v0 }
 0xbb7   :  { %3830 = vtanh.f32 %v2521_v4  ;;  %v7631_v4 = vld [vmem:[#allocation66_spill] sm:$0xff] }
 0xbbe   :  { %v3825_v57 = vpop.eup %3824 }
 0xbbf   :  { %v2525_v30 = vmul.f32 0.5, %v3825_v57  ;;  %v3827_v14 = vpop.eup %3826  ;;  %v6451_v57 = vld [vmem:[%s6926_s5 + $0xa8] ss:$16 sps:$4 sm:$0xff]  }
 0xbc0   :  { %v2526_v28 = vmul.f32 0.5, %v3827_v14  ;;  %v3829_v50 = vpop.eup %3828  ;;  %7632 = vst [vmem:[#allocation29_spill] sm:$0xff] %v6451_v57  ;;  %v6458_v14 = vld [vmem:[%s6926_s5 + $0xcc] ss:$16 sps:$4 sm:$0xff]  }
 0xbc1   :  { %v2528_v19 = vadd.f32 0.5, %v2525_v30  ;;  %v3831_v45 = vpop.eup %3830  ;;  %v7633_v30 = vld [vmem:[#allocation80_spill] sm:$0xff]  ;;  %7634 = vst [vmem:[#allocation30_spill] sm:$0xff] %v6458_v14 }
 0xbc2   :  { %v2529_v39 = vadd.f32 0.5, %v2526_v28  ;;  %v2527_v32 = vmul.f32 0.5, %v3831_v45  ;;  %v6465_v28 = vld [vmem:[%s6926_s5 + $0xc8] ss:$16 sps:$4 sm:$0xff]  }
 0xbc3   :  { %v2533_v21 = vmul.f32 %v3829_v50, %v2528_v19  ;;  %v6430_v50 = vld [vmem:[%s6926_s5 + $0x8c] ss:$16 sps:$4 sm:$0xff]   ;;  %7636 = vst [vmem:[#allocation31_spill] sm:$0xff] %v6465_v28  ;;  %v6479_v45 = vld [vmem:[%s6926_s5 + $0xe8] ss:$16 sps:$4 sm:$0xff]  }
 0xbc4   :  { %v2532_v6 = vmul.f32 %v2529_v39, %v5958_v23  ;;  %v2530_v5 = vadd.f32 0.5, %v2527_v32  ;;  %v6423_v23 = vld [vmem:[%s6926_s5 + $0x68] ss:$16 sps:$4 sm:$0xff]   ;;  %7640 = vst [vmem:[#allocation33_spill] sm:$0xff] %v6479_v45  ;;  %v7641_v32 = vld [vmem:[#allocation38_spill] sm:$0xff] }
 0xbc5   :  { %v7635_v19 = vld [vmem:[#allocation3_spill] sm:$0xff]  ;;  %v7637_v39 = vld [vmem:[#allocation37_spill] sm:$0xff] }
 0xbc6   :  { %v6398_v62 = vadd.f32 %v2533_v21, %v2532_v6  ;;  %v6472_v21 = vld [vmem:[%s6926_s5 + $0xec] ss:$16 sps:$4 sm:$0xff]  }
 0xbc7   :  { %7638 = vst [vmem:[#allocation32_spill] sm:$0xff] %v6472_v21  ;;  %v7639_v6 = vld [vmem:[#allocation17_spill] sm:$0xff] }
 0xbc8   :  { %3832 = vtanh.f32 %v6398_v62 }
 0xbd2   :  { %v3833_v2 = vpop.eup %3832 }
 0xbd3   :  { %v2536_v37 = vmul.f32 %v3833_v2, %v2530_v5  ;;  %v6486_v5 = vld [vmem:[%s6928_s2 + $0xc] ss:$16 sps:$4 sm:$0xff]  }
 0xbd4   :  { %7642 = vst [vmem:[#allocation34_spill] sm:$0xff] %v6486_v5 }
 0xbd5   :  { %v6401_v24 = vpack.c.bf16 %v2536_v37, %v2536_v37 }
 0xbd7   :  { %2571 = vmatmul.mubr.bf16.vlgmr.msra.gmra.mrb[68].mxu0 %v6401_v24  ;;  %2612 = vmatmul.mubr.bf16.vlgmr.msra.gmra.mrb[100].mxu1 %v6401_v24 }
 0xbd8   :  { %2644 = vmatpush1.bf16.msra.mxu0 %v5968_v61  ;;  %2685 = vmatpush1.bf16.msra.mxu1 %v5974_v31 }
 0xbd9   :  { %2645 = vmatprep.subr.bf16.mxu0 %v5980_v38  ;;  %2686 = vmatprep.subr.bf16.mxu1 %v5986_v10 }
 0xbda   :  { %2675 = vmatprep.mubr.bf16.mxu0 %v7280_v56  ;;  %2716 = vmatprep.mubr.bf16.mxu1 %v7280_v56 }
 0xbdc   :  { %2646 = vmatpush1.bf16.msra.mxu0 %v5994_v53  ;;  %2687 = vmatpush1.bf16.msra.mxu1 %v6000_v59 }
 0xbdd   :  { %2647 = vmatprep.subr.bf16.mxu0 %v6006_v49  ;;  %2688 = vmatprep.subr.bf16.mxu1 %v6012_v58 }
 0xbe0   :  { %2648 = vmatpush1.bf16.msra.mxu0 %v6018_v18  ;;  %2689 = vmatpush1.bf16.msra.mxu1 %v6024_v54 }
 0xbe1   :  { %2649 = vmatprep.subr.bf16.mxu0 %v6030_v51  ;;  %2690 = vmatprep.subr.bf16.mxu1 %v6036_v12 }
 0xbe4   :  { %2650 = vmatpush1.bf16.msra.mxu0 %v6042_v40  ;;  %2691 = vmatpush1.bf16.msra.mxu1 %v6423_v23 }
 0xbe5   :  { %2651 = vmatprep.subr.bf16.mxu0 %v6049_v63  ;;  %2692 = vmatprep.subr.bf16.mxu1 %v6430_v50 }
 0xbe8   :  { %2652 = vmatpush1.bf16.msra.mxu0 %v7628_v1  ;;  %2693 = vmatpush1.bf16.msra.mxu1 %v6437_v7 }
 0xbe9   :  { %2653 = vmatprep.subr.bf16.mxu0 %v7629_v47  ;;  %2694 = vmatprep.subr.bf16.mxu1 %v6444_v0 }
 0xbec   :  { %2654 = vmatpush1.bf16.msra.mxu0 %v7631_v4  ;;  %2695 = vmatpush1.bf16.msra.mxu1 %v6451_v57 }
 0xbed   :  { %2655 = vmatprep.subr.bf16.mxu0 %v7633_v30  ;;  %2696 = vmatprep.subr.bf16.mxu1 %v6458_v14 }
 0xbf0   :  { %2656 = vmatpush1.bf16.msra.mxu0 %v7635_v19  ;;  %2697 = vmatpush1.bf16.msra.mxu1 %v6465_v28 }
 0xbf1   :  { %2657 = vmatprep.subr.bf16.mxu0 %v7637_v39  ;;  %2698 = vmatprep.subr.bf16.mxu1 %v6472_v21 }
 0xbf4   :  { %2658 = vmatpush1.bf16.msra.mxu0 %v7639_v6  ;;  %2699 = vmatpush1.bf16.msra.mxu1 %v6479_v45 }
 0xbf5   :  { %2725 = vmatprep.subr.bf16.mxu0 %v7641_v32  ;;  %2766 = vmatprep.subr.bf16.mxu1 %v6486_v5 }
 0xcaa   :  { %v2572_v2 = vpop.f32.mrb[68].mxu0  ;;  %v2613_v37 = vpop.f32.mrb[100].mxu1 }
 0xcab   :  { %v2573_v6 = vadd.f32 %v2572_v2, %v6385_v11  ;;  %v2614_v21 = vadd.f32 %v2613_v37, %v6387_v17  ;;  %v2574_v39 = vpop.f32.mrb[69].mxu0  ;;  %v2615_v28 = vpop.f32.mrb[101].mxu1  ;;  %v7645_v37 = vld [vmem:[#allocation5_spill] sm:$0xff] }
 0xcac   :  { %v2575_v19 = vadd.f32 %v2574_v39, %v6389_v60  ;;  %v2616_v45 = vadd.f32 %v2615_v28, %v6391_v43  ;;  %v2576_v32 = vpop.f32.mrb[70].mxu0  ;;  %v2617_v14 = vpop.f32.mrb[102].mxu1 }
 0xcad   :  { %v2620_v30 = vadd.f32 %v2573_v6, %v4936_v8  ;;  %v2577_v57 = vpop.f32.mrb[71].mxu0  ;;  %v2618_v4 = vpop.f32.mrb[103].mxu1  ;;  %v2622_v17 = vadd.f32 %v2614_v21, %v4955_v25 }
 0xcae   :  { %v2621_v5 = vadd.f32 %v2575_v19, %v4940_v15  ;;  %v2623_v11 = vadd.f32 %v2616_v45, %v4949_v34 }
 0xcaf   :  { %v2624_v0 = vmul.f32 0.5, %v2620_v30  ;;  %v2626_v60 = vmul.f32 0.5, %v2622_v17  ;;  %v7647_v17 = vld [vmem:[#allocation19_spill] sm:$0xff] }
 0xcb0   :  { %v2625_v47 = vmul.f32 0.5, %v2621_v5 }
 0xcb1   :  { %3834 = vtanh.f32 %v2624_v0 }
 0xcb2   :  { %3836 = vtanh.f32 %v2625_v47 }
 0xcb3   :  { %3838 = vtanh.f32 %v2623_v11  ;;  %v7646_v11 = vld [vmem:[#allocation41_spill] sm:$0xff] }
 0xcb4   :  { %3840 = vtanh.f32 %v2626_v60  ;;  %v7648_v60 = vld [vmem:[#allocation42_spill] sm:$0xff] }
 0xcbb   :  { %v3835_v39 = vpop.eup %3834 }
 0xcbc   :  { %v2630_v43 = vmul.f32 0.5, %v3835_v39  ;;  %v3837_v28 = vpop.eup %3836  ;;  %v7649_v39 = vld [vmem:[#allocation6_spill] sm:$0xff] }
 0xcbd   :  { %v2631_v6 = vmul.f32 0.5, %v3837_v28  ;;  %v3839_v57 = vpop.eup %3838  ;;  %v7651_v28 = vld [vmem:[#allocation7_spill] sm:$0xff] }
 0xcbe   :  { %v2633_v14 = vadd.f32 0.5, %v2630_v43  ;;  %v3841_v47 = vpop.eup %3840  ;;  %v7650_v43 = vld [vmem:[#allocation43_spill] sm:$0xff] }
 0xcbf   :  { %v2634_v4 = vadd.f32 0.5, %v2631_v6  ;;  %v2632_v0 = vmul.f32 0.5, %v3841_v47  ;;  %v7653_v6 = vld [vmem:[#allocation8_spill] sm:$0xff]  ;;  %v7658_v47 = vld [vmem:[#allocation11_spill] sm:$0xff] }
 0xcc0   :  { %v2638_v32 = vmul.f32 %v3839_v57, %v2633_v14  ;;  %v7652_v14 = vld [vmem:[#allocation21_spill] sm:$0xff]  ;;  %v7654_v57 = vld [vmem:[#allocation22_spill] sm:$0xff] }
 0xcc1   :  { %v2637_v30 = vmul.f32 %v2634_v4, %v6118_v29  ;;  %v2635_v45 = vadd.f32 0.5, %v2632_v0  ;;  %v7644_v29 = vld [vmem:[#allocation40_spill] sm:$0xff]  ;;  %v7655_v4 = vld [vmem:[#allocation9_spill] sm:$0xff] }
 0xcc2   :  { %v7659_v0 = vld [vmem:[#allocation12_spill] sm:$0xff] }
 0xcc3   :  { %v6498_v19 = vadd.f32 %v2638_v32, %v2637_v30  ;;  %v7656_v32 = vld [vmem:[#allocation10_spill] sm:$0xff]  ;;  %v7657_v30 = vld [vmem:[#allocation24_spill] sm:$0xff] }
 0xcc5   :  { %3842 = vtanh.f32 %v6498_v19 }
 0xccf   :  { %v3843_v21 = vpop.eup %3842 }
 0xcd0   :  { %v6501_v5 = vmul.f32 %v3843_v21, %v2635_v45  ;;  %v7660_v45 = vld [vmem:[#allocation26_spill] sm:$0xff]  ;;  %v7661_v21 = vld [vmem:[#allocation13_spill] sm:$0xff] }
 0xcd2   :  { %7643 = vst [vmem:[#allocation35_spill] sm:$0xff] %v6501_v5  ;;  %v2642_v2 = vpack.c.bf16 %v6501_v5, %v6501_v5  ;;  %v7663_v5 = vld [vmem:[#allocation14_spill] sm:$0xff] }
 0xcd4   :  { %2676 = vmatmul.mubr.bf16.vlgmr.msra.gmra.mrb[72].mxu0 %v2642_v2  ;;  %2717 = vmatmul.mubr.bf16.vlgmr.msra.gmra.mrb[104].mxu1 %v2642_v2  ;;  %v7662_v2 = vld [vmem:[#allocation27_spill] sm:$0xff] }
 0xcd5   :  { %2726 = vmatpush1.bf16.msra.mxu0 %v6128_v48  ;;  %2767 = vmatpush1.bf16.msra.mxu1 %v6134_v33 }
 0xcd6   :  { %2727 = vmatprep.subr.bf16.mxu0 %v6140_v26  ;;  %2768 = vmatprep.subr.bf16.mxu1 %v6146_v16 }
 0xcd7   :  { %2757 = vmatprep.mubr.bf16.mxu0 %v7280_v56  ;;  %2798 = vmatprep.mubr.bf16.mxu1 %v7280_v56 }
 0xcd9   :  { %2728 = vmatpush1.bf16.msra.mxu0 %v6154_v27  ;;  %2769 = vmatpush1.bf16.msra.mxu1 %v6160_v3 }
 0xcda   :  { %2729 = vmatprep.subr.bf16.mxu0 %v6166_v55  ;;  %2770 = vmatprep.subr.bf16.mxu1 %v6172_v36 }
 0xcdd   :  { %2730 = vmatpush1.bf16.msra.mxu0 %v6178_v9  ;;  %2771 = vmatpush1.bf16.msra.mxu1 %v6184_v41 }
 0xcde   :  { %2731 = vmatprep.subr.bf16.mxu0 %v6190_v46  ;;  %2772 = vmatprep.subr.bf16.mxu1 %v6196_v35 }
 0xce1   :  { %2732 = vmatpush1.bf16.msra.mxu0 %v6202_v22  ;;  %2773 = vmatpush1.bf16.msra.mxu1 %v6208_v42 }
 0xce2   :  { %2733 = vmatprep.subr.bf16.mxu0 %v6214_v52  ;;  %2774 = vmatprep.subr.bf16.mxu1 %v6220_v20 }
 0xce5   :  { %2734 = vmatpush1.bf16.msra.mxu0 %v7644_v29  ;;  %2775 = vmatpush1.bf16.msra.mxu1 %v7645_v37 }
 0xce6   :  { %2735 = vmatprep.subr.bf16.mxu0 %v7646_v11  ;;  %2776 = vmatprep.subr.bf16.mxu1 %v7647_v17 }
 0xce9   :  { %2736 = vmatpush1.bf16.msra.mxu0 %v7648_v60  ;;  %2777 = vmatpush1.bf16.msra.mxu1 %v7649_v39  ;;  %v7693_v60 = vld [vmem:[#allocation86_spill] sm:$0xff] }
 0xcea   :  { %2737 = vmatprep.subr.bf16.mxu0 %v7650_v43  ;;  %2778 = vmatprep.subr.bf16.mxu1 %v7651_v28  ;;  %v7692_v43 = vld [vmem:[#allocation72_spill] sm:$0xff] }
 0xced   :  { %2738 = vmatpush1.bf16.msra.mxu0 %v7652_v14  ;;  %2779 = vmatpush1.bf16.msra.mxu1 %v7653_v6  ;;  %v7690_v6 = vld [vmem:[#allocation71_spill] sm:$0xff]  ;;  %v7691_v14 = vld [vmem:[#allocation85_spill] sm:$0xff] }
 0xcee   :  { %2739 = vmatprep.subr.bf16.mxu0 %v7654_v57  ;;  %2780 = vmatprep.subr.bf16.mxu1 %v7655_v4 }
 0xcf1   :  { %2740 = vmatpush1.bf16.msra.mxu0 %v6298_v44  ;;  %2781 = vmatpush1.bf16.msra.mxu1 %v7656_v32 }
 0xcf2   :  { %2830 = vmatprep.subr.bf16.mxu0 %v7657_v30  ;;  %2871 = vmatprep.subr.bf16.mxu1 %v7658_v47 }
 0xcf4   :  { %2758 = vmatmul.mubr.bf16.vlgmr.msra.gmra.mrb[76].mxu0 %v6401_v24  ;;  %2799 = vmatmul.mubr.bf16.vlgmr.msra.gmra.mrb[108].mxu1 %v6401_v24  ;;  %v6552_v24 = vld [vmem:[%s6929_s4 + $0x44] ss:$16 sps:$4 sm:$0xff]  }
 0xcf5   :  { %2831 = vmatpush1.bf16.msra.mxu0 %v6324_v13  ;;  %2872 = vmatpush1.bf16.msra.mxu1 %v7659_v0  ;;  %7664 = vst [vmem:[#allocation36_spill] sm:$0xff] %v6552_v24 }
 0xcf6   :  { %2832 = vmatprep.subr.bf16.mxu0 %v7660_v45  ;;  %2873 = vmatprep.subr.bf16.mxu1 %v7661_v21  ;;  %v6558_v45 = vld [vmem:[%s6929_s4 + $0x4c] ss:$16 sps:$4 sm:$0xff]   ;;  %v7689_v21 = vld [vmem:[#allocation2_spill] sm:$0xff] }
 0xcf7   :  { %2862 = vmatprep.mubr.bf16.mxu0 %v7280_v56  ;;  %2903 = vmatprep.mubr.bf16.mxu1 %v7280_v56  ;;  %7665 = vst [vmem:[#allocation45_spill] sm:$0xff] %v6558_v45 }
 0xcf9   :  { %2833 = vmatpush1.bf16.msra.mxu0 %v7662_v2  ;;  %2874 = vmatpush1.bf16.msra.mxu1 %v7663_v5  ;;  %v6564_v2 = vld [vmem:[%s6929_s4 + $0x40] ss:$16 sps:$4 sm:$0xff]   ;;  %v6570_v5 = vld [vmem:[%s6929_s4 + $0x48] ss:$16 sps:$4 sm:$0xff]  }
 0xcfa   :  { %2834 = vmatprep.subr.bf16.mxu0 %v6552_v24  ;;  %2875 = vmatprep.subr.bf16.mxu1 %v6558_v45  ;;  %7666 = vst [vmem:[#allocation46_spill] sm:$0xff] %v6564_v2  ;;  %7667 = vst [vmem:[#allocation47_spill] sm:$0xff] %v6570_v5  ;;  %v6576_v24 = vld [vmem:[%s6929_s4 + $0x64] ss:$16 sps:$4 sm:$0xff]   ;;  %v6582_v45 = vld [vmem:[%s6929_s4 + $0x6c] ss:$16 sps:$4 sm:$0xff]  }
 0xcfb   :  { %7668 = vst [vmem:[#allocation48_spill] sm:$0xff] %v6576_v24  ;;  %7669 = vst [vmem:[#allocation49_spill] sm:$0xff] %v6582_v45 }
 0xcfd   :  { %2835 = vmatpush1.bf16.msra.mxu0 %v6564_v2  ;;  %2876 = vmatpush1.bf16.msra.mxu1 %v6570_v5  ;;  %v6588_v2 = vld [vmem:[%s6929_s4 + $0x60] ss:$16 sps:$4 sm:$0xff]   ;;  %v6594_v5 = vld [vmem:[%s6929_s4 + $0x68] ss:$16 sps:$4 sm:$0xff]  }
 0xcfe   :  { %2836 = vmatprep.subr.bf16.mxu0 %v6576_v24  ;;  %2877 = vmatprep.subr.bf16.mxu1 %v6582_v45  ;;  %7670 = vst [vmem:[#allocation50_spill] sm:$0xff] %v6588_v2  ;;  %7671 = vst [vmem:[#allocation51_spill] sm:$0xff] %v6594_v5  ;;  %v6600_v24 = vld [vmem:[%s6929_s4 + $0x84] ss:$16 sps:$4 sm:$0xff]   ;;  %v6606_v45 = vld [vmem:[%s6929_s4 + $0x8c] ss:$16 sps:$4 sm:$0xff]  }
 0xcff   :  { %7672 = vst [vmem:[#allocation52_spill] sm:$0xff] %v6600_v24  ;;  %7673 = vst [vmem:[#allocation53_spill] sm:$0xff] %v6606_v45 }
 0xd01   :  { %2837 = vmatpush1.bf16.msra.mxu0 %v6588_v2  ;;  %2878 = vmatpush1.bf16.msra.mxu1 %v6594_v5  ;;  %v6612_v2 = vld [vmem:[%s6929_s4 + $0x80] ss:$16 sps:$4 sm:$0xff]   ;;  %v6618_v5 = vld [vmem:[%s6929_s4 + $0x88] ss:$16 sps:$4 sm:$0xff]  }
 0xd02   :  { %2838 = vmatprep.subr.bf16.mxu0 %v6600_v24  ;;  %2879 = vmatprep.subr.bf16.mxu1 %v6606_v45  ;;  %7674 = vst [vmem:[#allocation54_spill] sm:$0xff] %v6612_v2  ;;  %7675 = vst [vmem:[#allocation55_spill] sm:$0xff] %v6618_v5  ;;  %v6624_v24 = vld [vmem:[%s6929_s4 + $0xa4] ss:$16 sps:$4 sm:$0xff]   ;;  %v6630_v45 = vld [vmem:[%s6929_s4 + $0xac] ss:$16 sps:$4 sm:$0xff]  }
 0xd03   :  { %7676 = vst [vmem:[#allocation56_spill] sm:$0xff] %v6624_v24  ;;  %7677 = vst [vmem:[#allocation57_spill] sm:$0xff] %v6630_v45 }
 0xd05   :  { %2839 = vmatpush1.bf16.msra.mxu0 %v6612_v2  ;;  %2880 = vmatpush1.bf16.msra.mxu1 %v6618_v5  ;;  %v6636_v2 = vld [vmem:[%s6929_s4 + $0xa0] ss:$16 sps:$4 sm:$0xff]   ;;  %v6642_v5 = vld [vmem:[%s6929_s4 + $0xa8] ss:$16 sps:$4 sm:$0xff]  }
 0xd06   :  { %2840 = vmatprep.subr.bf16.mxu0 %v6624_v24  ;;  %2881 = vmatprep.subr.bf16.mxu1 %v6630_v45  ;;  %7678 = vst [vmem:[#allocation58_spill] sm:$0xff] %v6636_v2  ;;  %7679 = vst [vmem:[#allocation61_spill] sm:$0xff] %v6642_v5  ;;  %v6648_v24 = vld [vmem:[%s6929_s4 + $0xc4] ss:$16 sps:$4 sm:$0xff]   ;;  %v6654_v45 = vld [vmem:[%s6929_s4 + $0xcc] ss:$16 sps:$4 sm:$0xff]  }
 0xd07   :  { %7680 = vst [vmem:[#allocation75_spill] sm:$0xff] %v6648_v24  ;;  %7681 = vst [vmem:[#allocation62_spill] sm:$0xff] %v6654_v45 }
 0xd09   :  { %2841 = vmatpush1.bf16.msra.mxu0 %v6636_v2  ;;  %2882 = vmatpush1.bf16.msra.mxu1 %v6642_v5  ;;  %v6660_v2 = vld [vmem:[%s6929_s4 + $0xc0] ss:$16 sps:$4 sm:$0xff]   ;;  %v6666_v5 = vld [vmem:[%s6929_s4 + $0xc8] ss:$16 sps:$4 sm:$0xff]  }
 0xd0a   :  { %2842 = vmatprep.subr.bf16.mxu0 %v6648_v24  ;;  %2883 = vmatprep.subr.bf16.mxu1 %v6654_v45  ;;  %7682 = vst [vmem:[#allocation76_spill] sm:$0xff] %v6660_v2  ;;  %7683 = vst [vmem:[#allocation59_spill] sm:$0xff] %v6666_v5  ;;  %v6672_v24 = vld [vmem:[%s6929_s4 + $0xe4] ss:$16 sps:$4 sm:$0xff]   ;;  %v6678_v45 = vld [vmem:[%s6929_s4 + $0xec] ss:$16 sps:$4 sm:$0xff]  }
 0xd0b   :  { %7684 = vst [vmem:[#allocation60_spill] sm:$0xff] %v6672_v24  ;;  %7685 = vst [vmem:[#allocation63_spill] sm:$0xff] %v6678_v45 }
 0xd0d   :  { %2843 = vmatpush1.bf16.msra.mxu0 %v6660_v2  ;;  %2884 = vmatpush1.bf16.msra.mxu1 %v6666_v5  ;;  %v6684_v2 = vld [vmem:[%s6929_s4 + $0xe0] ss:$16 sps:$4 sm:$0xff]   ;;  %v6690_v5 = vld [vmem:[%s6929_s4 + $0xe8] ss:$16 sps:$4 sm:$0xff]  }
 0xd0e   :  { %2844 = vmatprep.subr.bf16.mxu0 %v6672_v24  ;;  %2885 = vmatprep.subr.bf16.mxu1 %v6678_v45  ;;  %7686 = vst [vmem:[#allocation77_spill] sm:$0xff] %v6684_v2  ;;  %7687 = vst [vmem:[#allocation67_spill] sm:$0xff] %v6690_v5  ;;  %v7688_v24 = vld [vmem:[#allocation15_spill] sm:$0xff] }
 0xd11   :  { %2845 = vmatpush1.bf16.msra.mxu0 %v6684_v2  ;;  %2886 = vmatpush1.bf16.msra.mxu1 %v6690_v5 }
 0xd12   :  { %2935 = vmatprep.subr.bf16.mxu0 %v7688_v24  ;;  %2976 = vmatprep.subr.bf16.mxu1 %v7689_v21 }
 0xda7   :  { %v6695_v0 = vpop.f32.mrb[72].mxu0  ;;  %v6697_v45 = vpop.f32.mrb[104].mxu1 }
 0xda8   :  { %v6699_v13 = vpop.f32.mrb[73].mxu0  ;;  %v6701_v47 = vpop.f32.mrb[105].mxu1 }
 0xda9   :  { %v2681_v2 = vpop.f32.mrb[74].mxu0  ;;  %v2722_v30 = vpop.f32.mrb[106].mxu1 }
 0xdaa   :  { %v2682_v32 = vpop.f32.mrb[75].mxu0  ;;  %v2723_v44 = vpop.f32.mrb[107].mxu1 }
 0xdc7   :  { %v2759_v4 = vpop.f32.mrb[76].mxu0  ;;  %v2800_v57 = vpop.f32.mrb[108].mxu1 }
 0xdc8   :  { %v2807_v5 = vadd.f32 %v2759_v4, %v7690_v6  ;;  %v2809_v24 = vadd.f32 %v2800_v57, %v7691_v14  ;;  %v2761_v28 = vpop.f32.mrb[77].mxu0  ;;  %v2802_v21 = vpop.f32.mrb[109].mxu1 }
 0xdc9   :  { %v2808_v39 = vadd.f32 %v2761_v28, %v7692_v43  ;;  %v2810_v17 = vadd.f32 %v2802_v21, %v7693_v60  ;;  %v2763_v11 = vpop.f32.mrb[78].mxu0  ;;  %v2804_v37 = vpop.f32.mrb[110].mxu1 }
 0xdca   :  { %v2811_v29 = vmul.f32 0.5, %v2807_v5  ;;  %v2764_v20 = vpop.f32.mrb[79].mxu0  ;;  %v2805_v2 = vpop.f32.mrb[111].mxu1  ;;  %v2813_v44 = vmul.f32 0.5, %v2809_v24 }
 0xdcb   :  { %v2812_v30 = vmul.f32 0.5, %v2808_v39 }
 0xdcc   :  { %3844 = vtanh.f32 %v2811_v29 }
 0xdcd   :  { %3846 = vtanh.f32 %v2812_v30 }
 0xdce   :  { %3848 = vtanh.f32 %v2810_v17 }
 0xdcf   :  { %3850 = vtanh.f32 %v2813_v44 }
 0xdd6   :  { %v3845_v32 = vpop.eup %3844 }
 0xdd7   :  { %v2817_v6 = vmul.f32 0.5, %v3845_v32  ;;  %v3847_v4 = vpop.eup %3846 }
 0xdd8   :  { %v2818_v57 = vmul.f32 0.5, %v3847_v4  ;;  %v3849_v52 = vpop.eup %3848 }
 0xdd9   :  { %v2820_v14 = vadd.f32 0.5, %v2817_v6  ;;  %v3851_v20 = vpop.eup %3850 }
 0xdda   :  { %v2821_v43 = vadd.f32 0.5, %v2818_v57  ;;  %v2819_v5 = vmul.f32 0.5, %v3851_v20 }
 0xddb   :  { %v2825_v28 = vmul.f32 %v3849_v52, %v2820_v14 }
 0xddc   :  { %v2824_v11 = vmul.f32 %v2821_v43, %v6398_v62  ;;  %v2822_v29 = vadd.f32 0.5, %v2819_v5 }
 0xdde   :  { %v6708_v37 = vadd.f32 %v2825_v28, %v2824_v11 }
 0xde0   :  { %3852 = vtanh.f32 %v6708_v37 }
 0xdea   :  { %v3853_v17 = vpop.eup %3852 }
 0xdeb   :  { %v2828_v60 = vmul.f32 %v3853_v17, %v2822_v29 }
 0xded   :  { %v6711_v39 = vpack.c.bf16 %v2828_v60, %v2828_v60 }
 0xdef   :  { %2863 = vmatmul.mubr.bf16.vlgmr.msra.gmra.mrb[80].mxu0 %v6711_v39  ;;  %2904 = vmatmul.mubr.bf16.vlgmr.msra.gmra.mrb[112].mxu1 %v6711_v39 }
 0xdf0   :  { %2936 = vmatpush1.bf16.msra.mxu0 %v5968_v61  ;;  %2977 = vmatpush1.bf16.msra.mxu1 %v5974_v31  ;;  %v7694_v61 = vld [vmem:[#allocation79_spill] sm:$0xff]  ;;  %v7695_v31 = vld [vmem:[#allocation28_spill] sm:$0xff] }
 0xdf1   :  { %2937 = vmatprep.subr.bf16.mxu0 %v5980_v38  ;;  %2978 = vmatprep.subr.bf16.mxu1 %v5986_v10  ;;  %v7696_v38 = vld [vmem:[#allocation66_spill] sm:$0xff]  ;;  %v7697_v10 = vld [vmem:[#allocation29_spill] sm:$0xff] }
 0xdf2   :  { %2967 = vmatprep.mubr.bf16.mxu0 %v7280_v56  ;;  %3008 = vmatprep.mubr.bf16.mxu1 %v7280_v56 }
 0xdf4   :  { %2938 = vmatpush1.bf16.msra.mxu0 %v5994_v53  ;;  %2979 = vmatpush1.bf16.msra.mxu1 %v6000_v59  ;;  %v7698_v53 = vld [vmem:[#allocation80_spill] sm:$0xff]  ;;  %v7699_v59 = vld [vmem:[#allocation30_spill] sm:$0xff] }
 0xdf5   :  { %2939 = vmatprep.subr.bf16.mxu0 %v6006_v49  ;;  %2980 = vmatprep.subr.bf16.mxu1 %v6012_v58  ;;  %v7700_v49 = vld [vmem:[#allocation3_spill] sm:$0xff] }
 0xdf6   :  { %v7701_v58 = vld [vmem:[#allocation31_spill] sm:$0xff] }
 0xdf8   :  { %2940 = vmatpush1.bf16.msra.mxu0 %v6018_v18  ;;  %2981 = vmatpush1.bf16.msra.mxu1 %v6024_v54  ;;  %v7702_v18 = vld [vmem:[#allocation37_spill] sm:$0xff]  ;;  %v7703_v54 = vld [vmem:[#allocation32_spill] sm:$0xff] }
 0xdf9   :  { %2941 = vmatprep.subr.bf16.mxu0 %v6030_v51  ;;  %2982 = vmatprep.subr.bf16.mxu1 %v6036_v12  ;;  %v7704_v51 = vld [vmem:[#allocation17_spill] sm:$0xff] }
 0xdfa   :  { %v7705_v12 = vld [vmem:[#allocation33_spill] sm:$0xff] }
 0xdfc   :  { %2942 = vmatpush1.bf16.msra.mxu0 %v6042_v40  ;;  %2983 = vmatpush1.bf16.msra.mxu1 %v6423_v23  ;;  %v7706_v40 = vld [vmem:[#allocation38_spill] sm:$0xff] }
 0xdfd   :  { %2943 = vmatprep.subr.bf16.mxu0 %v6049_v63  ;;  %2984 = vmatprep.subr.bf16.mxu1 %v6430_v50  ;;  %v7707_v63 = vld [vmem:[#allocation34_spill] sm:$0xff] }
 0xe00   :  { %2944 = vmatpush1.bf16.msra.mxu0 %v7628_v1  ;;  %2985 = vmatpush1.bf16.msra.mxu1 %v6437_v7 }
 0xe01   :  { %2945 = vmatprep.subr.bf16.mxu0 %v7694_v61  ;;  %2986 = vmatprep.subr.bf16.mxu1 %v7695_v31 }
 0xe04   :  { %2946 = vmatpush1.bf16.msra.mxu0 %v7696_v38  ;;  %2987 = vmatpush1.bf16.msra.mxu1 %v7697_v10 }
 0xe05   :  { %2947 = vmatprep.subr.bf16.mxu0 %v7698_v53  ;;  %2988 = vmatprep.subr.bf16.mxu1 %v7699_v59 }
 0xe08   :  { %2948 = vmatpush1.bf16.msra.mxu0 %v7700_v49  ;;  %2989 = vmatpush1.bf16.msra.mxu1 %v7701_v58  ;;  %v7723_v58 = vld [vmem:[#allocation10_spill] sm:$0xff] }
 0xe09   :  { %2949 = vmatprep.subr.bf16.mxu0 %v7702_v18  ;;  %2990 = vmatprep.subr.bf16.mxu1 %v7703_v54  ;;  %v7724_v18 = vld [vmem:[#allocation24_spill] sm:$0xff]  ;;  %v7725_v54 = vld [vmem:[#allocation11_spill] sm:$0xff] }
 0xe0c   :  { %2950 = vmatpush1.bf16.msra.mxu0 %v7704_v51  ;;  %2991 = vmatpush1.bf16.msra.mxu1 %v7705_v12  ;;  %v7726_v51 = vld [vmem:[#allocation25_spill] sm:$0xff]  ;;  %v7727_v12 = vld [vmem:[#allocation12_spill] sm:$0xff] }
 0xe0d   :  { %3017 = vmatprep.subr.bf16.mxu0 %v7706_v40  ;;  %3058 = vmatprep.subr.bf16.mxu1 %v7707_v63  ;;  %v7728_v40 = vld [vmem:[#allocation26_spill] sm:$0xff]  ;;  %v7729_v63 = vld [vmem:[#allocation13_spill] sm:$0xff] }
 0xec2   :  { %v2864_v52 = vpop.f32.mrb[80].mxu0  ;;  %v2905_v62 = vpop.f32.mrb[112].mxu1 }
 0xec3   :  { %v2865_v23 = vadd.f32 %v2864_v52, %v6695_v0  ;;  %v2906_v50 = vadd.f32 %v2905_v62, %v6697_v45  ;;  %v2866_v1 = vpop.f32.mrb[81].mxu0  ;;  %v2907_v7 = vpop.f32.mrb[113].mxu1  ;;  %v7730_v52 = vld [vmem:[#allocation27_spill] sm:$0xff]  ;;  %v7731_v62 = vld [vmem:[#allocation14_spill] sm:$0xff] }
 0xec4   :  { %v2867_v24 = vadd.f32 %v2866_v1, %v6699_v13  ;;  %v2908_v21 = vadd.f32 %v2907_v7, %v6701_v47  ;;  %v2868_v2 = vpop.f32.mrb[82].mxu0  ;;  %v2909_v30 = vpop.f32.mrb[114].mxu1  ;;  %v7735_v1 = vld [vmem:[#allocation47_spill] sm:$0xff]  ;;  %v7736_v7 = vld [vmem:[#allocation48_spill] sm:$0xff] }
 0xec5   :  { %v2912_v44 = vadd.f32 %v2865_v23, %v4936_v8  ;;  %v2869_v32 = vpop.f32.mrb[83].mxu0  ;;  %v2910_v6 = vpop.f32.mrb[115].mxu1  ;;  %v2914_v45 = vadd.f32 %v2906_v50, %v4955_v25  ;;  %v7732_v23 = vld [vmem:[#allocation36_spill] sm:$0xff]  ;;  %v7733_v50 = vld [vmem:[#allocation45_spill] sm:$0xff]  ;;  %v7739_v2 = vld [vmem:[#allocation51_spill] sm:$0xff] }
 0xec6   :  { %v2913_v4 = vadd.f32 %v2867_v24, %v4940_v15  ;;  %v2915_v0 = vadd.f32 %v2908_v21, %v4949_v34  ;;  %v7737_v24 = vld [vmem:[#allocation49_spill] sm:$0xff]  ;;  %v7738_v21 = vld [vmem:[#allocation50_spill] sm:$0xff]  ;;  %v7743_v32 = vld [vmem:[#allocation55_spill] sm:$0xff] }
 0xec7   :  { %v2916_v14 = vmul.f32 0.5, %v2912_v44  ;;  %v2918_v13 = vmul.f32 0.5, %v2914_v45  ;;  %v7741_v30 = vld [vmem:[#allocation53_spill] sm:$0xff]  ;;  %v7742_v44 = vld [vmem:[#allocation54_spill] sm:$0xff]  ;;  %v7744_v6 = vld [vmem:[#allocation56_spill] sm:$0xff] }
 0xec8   :  { %v2917_v57 = vmul.f32 0.5, %v2913_v4  ;;  %v7745_v4 = vld [vmem:[#allocation57_spill] sm:$0xff]  ;;  %v7749_v45 = vld [vmem:[#allocation62_spill] sm:$0xff] }
 0xec9   :  { %3854 = vtanh.f32 %v2916_v14  ;;  %v7746_v14 = vld [vmem:[#allocation58_spill] sm:$0xff] }
 0xeca   :  { %3856 = vtanh.f32 %v2917_v57  ;;  %v7747_v57 = vld [vmem:[#allocation61_spill] sm:$0xff] }
 0xecb   :  { %3858 = vtanh.f32 %v2915_v0  ;;  %v7748_v0 = vld [vmem:[#allocation75_spill] sm:$0xff] }
 0xecc   :  { %3860 = vtanh.f32 %v2918_v13  ;;  %v7750_v13 = vld [vmem:[#allocation76_spill] sm:$0xff] }
 0xed3   :  { %v3855_v43 = vpop.eup %3854 }
 0xed4   :  { %v2922_v47 = vmul.f32 0.5, %v3855_v43  ;;  %v3857_v28 = vpop.eup %3856  ;;  %v7751_v43 = vld [vmem:[#allocation59_spill] sm:$0xff] }
 0xed5   :  { %v2923_v20 = vmul.f32 0.5, %v3857_v28  ;;  %v3859_v5 = vpop.eup %3858  ;;  %v7753_v28 = vld [vmem:[#allocation63_spill] sm:$0xff] }
 0xed6   :  { %v2925_v11 = vadd.f32 0.5, %v2922_v47  ;;  %v3861_v31 = vpop.eup %3860  ;;  %v7752_v47 = vld [vmem:[#allocation60_spill] sm:$0xff] }
 0xed7   :  { %v2926_v29 = vadd.f32 0.5, %v2923_v20  ;;  %v2924_v38 = vmul.f32 0.5, %v3861_v31  ;;  %v7755_v20 = vld [vmem:[#allocation67_spill] sm:$0xff] }
 0xed8   :  { %v2930_v17 = vmul.f32 %v3859_v5, %v2925_v11  ;;  %v7754_v11 = vld [vmem:[#allocation77_spill] sm:$0xff]  ;;  %v3716_v5 = vld [vmem:[%s6932_s7] sm:$0xff]  }
 0xed9   :  { %v2929_v60 = vmul.f32 %v2926_v29, %v6498_v19  ;;  %v2927_v10 = vadd.f32 0.5, %v2924_v38  ;;  %v7722_v19 = vld [vmem:[#allocation23_spill] sm:$0xff] }
 0xedb   :  { %v6758_v61 = vadd.f32 %v2930_v17, %v2929_v60 }
 0xedd   :  { %3862 = vtanh.f32 %v6758_v61 }
 0xee7   :  { %v3863_v53 = vpop.eup %3862 }
 0xee8   :  { %v6761_v59 = vmul.f32 %v3863_v53, %v2927_v10 }
 0xeea   :  { %v2934_v49 = vpack.c.bf16 %v6761_v59, %v6761_v59 }
 0xeec   :  { %2968 = vmatmul.mubr.bf16.vlgmr.msra.gmra.mrb[84].mxu0 %v2934_v49  ;;  %3009 = vmatmul.mubr.bf16.vlgmr.msra.gmra.mrb[116].mxu1 %v2934_v49 }
 0xeed   :  { %3018 = vmatpush1.bf16.msra.mxu0 %v6128_v48  ;;  %3059 = vmatpush1.bf16.msra.mxu1 %v6134_v33  ;;  %v7708_v48 = vld [vmem:[#allocation39_spill] sm:$0xff]  ;;  %v7709_v33 = vld [vmem:[#allocation18_spill] sm:$0xff] }
 0xeee   :  { %3019 = vmatprep.subr.bf16.mxu0 %v6140_v26  ;;  %3060 = vmatprep.subr.bf16.mxu1 %v6146_v16  ;;  %v7710_v26 = vld [vmem:[#allocation40_spill] sm:$0xff]  ;;  %v7711_v16 = vld [vmem:[#allocation5_spill] sm:$0xff] }
 0xeef   :  { %3049 = vmatprep.mubr.bf16.mxu0 %v7280_v56  ;;  %3090 = vmatprep.mubr.bf16.mxu1 %v7280_v56 }
 0xef1   :  { %3020 = vmatpush1.bf16.msra.mxu0 %v6154_v27  ;;  %3061 = vmatpush1.bf16.msra.mxu1 %v6160_v3  ;;  %v7712_v27 = vld [vmem:[#allocation41_spill] sm:$0xff]  ;;  %v7713_v3 = vld [vmem:[#allocation19_spill] sm:$0xff] }
 0xef2   :  { %3021 = vmatprep.subr.bf16.mxu0 %v6166_v55  ;;  %3062 = vmatprep.subr.bf16.mxu1 %v6172_v36  ;;  %v7714_v55 = vld [vmem:[#allocation42_spill] sm:$0xff] }
 0xef3   :  { %v7715_v36 = vld [vmem:[#allocation6_spill] sm:$0xff] }
 0xef5   :  { %3022 = vmatpush1.bf16.msra.mxu0 %v6178_v9  ;;  %3063 = vmatpush1.bf16.msra.mxu1 %v6184_v41  ;;  %v7716_v9 = vld [vmem:[#allocation43_spill] sm:$0xff] }
 0xef6   :  { %3023 = vmatprep.subr.bf16.mxu0 %v6190_v46  ;;  %3064 = vmatprep.subr.bf16.mxu1 %v6196_v35  ;;  %v7717_v41 = vld [vmem:[#allocation7_spill] sm:$0xff]  ;;  %v7718_v46 = vld [vmem:[#allocation21_spill] sm:$0xff]  ;;  %v7719_v35 = vld [vmem:[#allocation8_spill] sm:$0xff] }
 0xef9   :  { %3024 = vmatpush1.bf16.msra.mxu0 %v6202_v22  ;;  %3065 = vmatpush1.bf16.msra.mxu1 %v6208_v42  ;;  %v7720_v22 = vld [vmem:[#allocation22_spill] sm:$0xff]  ;;  %v7721_v42 = vld [vmem:[#allocation9_spill] sm:$0xff] }
 0xefa   :  { %3025 = vmatprep.subr.bf16.mxu0 %v7708_v48  ;;  %3066 = vmatprep.subr.bf16.mxu1 %v7709_v33 }
 0xefd   :  { %3026 = vmatpush1.bf16.msra.mxu0 %v7710_v26  ;;  %3067 = vmatpush1.bf16.msra.mxu1 %v7711_v16  ;;  %v7756_v26 = vld [vmem:[#allocation73_spill] sm:$0xff] }
 0xefe   :  { %3027 = vmatprep.subr.bf16.mxu0 %v7712_v27  ;;  %3068 = vmatprep.subr.bf16.mxu1 %v7713_v3  ;;  %v7757_v27 = vld [vmem:[#allocation87_spill] sm:$0xff] }
 0xf01   :  { %3028 = vmatpush1.bf16.msra.mxu0 %v7714_v55  ;;  %3069 = vmatpush1.bf16.msra.mxu1 %v7715_v36 }
 0xf02   :  { %3029 = vmatprep.subr.bf16.mxu0 %v7716_v9  ;;  %3070 = vmatprep.subr.bf16.mxu1 %v7717_v41  ;;  %v7758_v9 = vld [vmem:[#allocation74_spill] sm:$0xff] }
 0xf05   :  { %3030 = vmatpush1.bf16.msra.mxu0 %v7718_v46  ;;  %3071 = vmatpush1.bf16.msra.mxu1 %v7719_v35  ;;  %v7759_v46 = vld [vmem:[#allocation88_spill] sm:$0xff] }
 0xf06   :  { %3031 = vmatprep.subr.bf16.mxu0 %v7720_v22  ;;  %3072 = vmatprep.subr.bf16.mxu1 %v7721_v42 }
 0xf09   :  { %3032 = vmatpush1.bf16.msra.mxu0 %v7722_v19  ;;  %3073 = vmatpush1.bf16.msra.mxu1 %v7723_v58 }
 0xf0a   :  { %3122 = vmatprep.subr.bf16.mxu0 %v7724_v18  ;;  %3163 = vmatprep.subr.bf16.mxu1 %v7725_v54 }
 0xf0c   :  { %3050 = vmatmul.mubr.bf16.vlgmr.msra.gmra.mrb[88].mxu0 %v6711_v39  ;;  %3091 = vmatmul.mubr.bf16.vlgmr.msra.gmra.mrb[120].mxu1 %v6711_v39  ;;  %v7734_v39 = vld [vmem:[#allocation46_spill] sm:$0xff] }
 0xf0d   :  { %3123 = vmatpush1.bf16.msra.mxu0 %v7726_v51  ;;  %3164 = vmatpush1.bf16.msra.mxu1 %v7727_v12 }
 0xf0e   :  { %3124 = vmatprep.subr.bf16.mxu0 %v7728_v40  ;;  %3165 = vmatprep.subr.bf16.mxu1 %v7729_v63 }
 0xf0f   :  { %3154 = vmatprep.mubr.bf16.mxu0 %v7280_v56  ;;  %3195 = vmatprep.mubr.bf16.mxu1 %v7280_v56  ;;  %v7740_v56 = vld [vmem:[#allocation52_spill] sm:$0xff] }
 0xf11   :  { %3125 = vmatpush1.bf16.msra.mxu0 %v7730_v52  ;;  %3166 = vmatpush1.bf16.msra.mxu1 %v7731_v62 }
 0xf12   :  { %3126 = vmatprep.subr.bf16.mxu0 %v7732_v23  ;;  %3167 = vmatprep.subr.bf16.mxu1 %v7733_v50 }
 0xf15   :  { %3127 = vmatpush1.bf16.msra.mxu0 %v7734_v39  ;;  %3168 = vmatpush1.bf16.msra.mxu1 %v7735_v1 }
 0xf16   :  { %3128 = vmatprep.subr.bf16.mxu0 %v7736_v7  ;;  %3169 = vmatprep.subr.bf16.mxu1 %v7737_v24 }
 0xf19   :  { %3129 = vmatpush1.bf16.msra.mxu0 %v7738_v21  ;;  %3170 = vmatpush1.bf16.msra.mxu1 %v7739_v2 }
 0xf1a   :  { %3130 = vmatprep.subr.bf16.mxu0 %v7740_v56  ;;  %3171 = vmatprep.subr.bf16.mxu1 %v7741_v30 }
 0xf1d   :  { %3131 = vmatpush1.bf16.msra.mxu0 %v7742_v44  ;;  %3172 = vmatpush1.bf16.msra.mxu1 %v7743_v32  ;;  %v3717_v32 = vld [vmem:[%s6932_s7 + $0x8] sm:$0xff]  }
 0xf1e   :  { %3132 = vmatprep.subr.bf16.mxu0 %v7744_v6  ;;  %3173 = vmatprep.subr.bf16.mxu1 %v7745_v4  ;;  %v7761_v6 = vld [vmem:[#allocation20_spill] sm:$0xff] }
 0xf21   :  { %3133 = vmatpush1.bf16.msra.mxu0 %v7746_v14  ;;  %3174 = vmatpush1.bf16.msra.mxu1 %v7747_v57  ;;  %v3718_v14 = vld [vmem:[%s6932_s7 + $0x10] sm:$0xff]   ;;  %v3719_v57 = vld [vmem:[%s6932_s7 + $0x18] sm:$0xff]  }
 0xf22   :  { %3134 = vmatprep.subr.bf16.mxu0 %v7748_v0  ;;  %3175 = vmatprep.subr.bf16.mxu1 %v7749_v45  ;;  %v3720_v0 = vld [vmem:[%s6932_s7 + $0x20] sm:$0xff]   ;;  %v3721_v45 = vld [vmem:[%s6932_s7 + $0x28] sm:$0xff]  }
 0xf25   :  { %3135 = vmatpush1.bf16.msra.mxu0 %v7750_v13  ;;  %3176 = vmatpush1.bf16.msra.mxu1 %v7751_v43  ;;  %v3722_v13 = vld [vmem:[%s6932_s7 + $0x30] sm:$0xff]   ;;  %v3723_v43 = vld [vmem:[%s6932_s7 + $0x38] sm:$0xff]  }
 0xf26   :  { %3136 = vmatprep.subr.bf16.mxu0 %v7752_v47  ;;  %3177 = vmatprep.subr.bf16.mxu1 %v7753_v28  ;;  %v7762_v47 = vld [vmem:[#allocation44_spill] sm:$0xff] }
 0xf27   :  { %v7763_v28 = vld [vmem:[#allocation16_spill] sm:$0xff] }
 0xf29   :  { %3137 = vmatpush1.bf16.msra.mxu0 %v7754_v11  ;;  %3178 = vmatpush1.bf16.msra.mxu1 %v7755_v20  ;;  %v3227_v11 = vpack.c.bf16 %v7763_v28, %v7762_v47  ;;  %v7764_v20 = vld [vmem:[#allocation4_spill] sm:$0xff] }
 0xf2a   :  { %3531 = vmatprep.subr.bf16.mxu0 %v3716_v5 }
 0xfbf   :  { %v6836_v29 = vpop.f32.mrb[84].mxu0  ;;  %v6838_v17 = vpop.f32.mrb[116].mxu1 }
 0xfc0   :  { %v6840_v60 = vpop.f32.mrb[85].mxu0  ;;  %v6842_v31 = vpop.f32.mrb[117].mxu1 }
 0xfc1   :  { %v2973_v38 = vpop.f32.mrb[86].mxu0  ;;  %v3014_v10 = vpop.f32.mrb[118].mxu1 }
 0xfc2   :  { %v2974_v53 = vpop.f32.mrb[87].mxu0  ;;  %v3015_v49 = vpop.f32.mrb[119].mxu1 }
 0xfdf   :  { %v3051_v48 = vpop.f32.mrb[88].mxu0  ;;  %v3092_v33 = vpop.f32.mrb[120].mxu1 }
 0xfe0   :  { %v3099_v16 = vadd.f32 %v3051_v48, %v7756_v26  ;;  %v3101_v3 = vadd.f32 %v3092_v33, %v7757_v27  ;;  %v3053_v55 = vpop.f32.mrb[89].mxu0  ;;  %v3094_v36 = vpop.f32.mrb[121].mxu1 }
 0xfe1   :  { %v3100_v41 = vadd.f32 %v3053_v55, %v7758_v9  ;;  %v3102_v35 = vadd.f32 %v3094_v36, %v7759_v46  ;;  %v3055_v22 = vpop.f32.mrb[90].mxu0  ;;  %v3096_v42 = vpop.f32.mrb[122].mxu1 }
 0xfe2   :  { %v3103_v19 = vmul.f32 0.5, %v3099_v16  ;;  %v3056_v58 = vpop.f32.mrb[91].mxu0  ;;  %v3097_v18 = vpop.f32.mrb[123].mxu1  ;;  %v3105_v51 = vmul.f32 0.5, %v3101_v3 }
 0xfe3   :  { %v3104_v54 = vmul.f32 0.5, %v3100_v41 }
 0xfe4   :  { %3864 = vtanh.f32 %v3103_v19 }
 0xfe5   :  { %3866 = vtanh.f32 %v3104_v54 }
 0xfe6   :  { %3868 = vtanh.f32 %v3102_v35 }
 0xfe7   :  { %3870 = vtanh.f32 %v3105_v51 }
 0xfee   :  { %v3865_v12 = vpop.eup %3864 }
 0xfef   :  { %v3109_v40 = vmul.f32 0.5, %v3865_v12  ;;  %v3867_v63 = vpop.eup %3866 }
 0xff0   :  { %v3110_v62 = vmul.f32 0.5, %v3867_v63  ;;  %v3869_v23 = vpop.eup %3868 }
 0xff1   :  { %v3112_v52 = vadd.f32 0.5, %v3109_v40  ;;  %v3871_v24 = vpop.eup %3870 }
 0xff2   :  { %v3113_v50 = vadd.f32 0.5, %v3110_v62  ;;  %v3111_v21 = vmul.f32 0.5, %v3871_v24 }
 0xff3   :  { %v3117_v39 = vmul.f32 %v3869_v23, %v3112_v52 }
 0xff4   :  { %v3116_v1 = vmul.f32 %v3113_v50, %v6708_v37  ;;  %v3114_v2 = vadd.f32 0.5, %v3111_v21  ;;  %v7760_v37 = vld [vmem:[#allocation89_spill] sm:$0xff] }
 0xff5   :  { %v3226_v4 = vpack.c.bf16 %v7761_v6, %v7760_v37 }
 0xff6   :  { %v3118_v7 = vadd.f32 %v3117_v39, %v3116_v1 }
 0xff8   :  { %3872 = vtanh.f32 %v3118_v7  ;;  %3377 = vst [vmem:[%s6933_s11] sm:$0xff] %v3118_v7 }
0x1002   :  { %v3873_v56 = vpop.eup %3872 }
0x1003   :  { %v3120_v30 = vmul.f32 %v3873_v56, %v3114_v2 }
0x1005   :  { %v3121_v44 = vpack.c.bf16 %v3120_v30, %v3120_v30  ;;  %3374 = vst [vmem:[%s6934_s10] sm:$0xff] %v3120_v30 }
0x1007   :  { %3155 = vmatmul.mubr.bf16.vlgmr.msra.gmra.mrb[92].mxu0 %v3121_v44  ;;  %3196 = vmatmul.mubr.bf16.vlgmr.msra.gmra.mrb[124].mxu1 %v3121_v44 }
0x1008   :  { %3532 = vmatpush3.bf16.msra.mxu0 %v3716_v5  ;;  %3547 = vmatprep.mubr.bf16.mxu0 %v3226_v4  ;;  %v7765_v5 = vld [vmem:[#allocation35_spill] sm:$0xff] }
0x1009   :  { %3533 = vmatprep.subr.bf16.mxu0 %v3717_v32  ;;  %v3228_v38 = vpack.c.bf16 %v7765_v5, %v7764_v20 }
0x100c   :  { %3534 = vmatpush3.bf16.msra.mxu0 %v3717_v32 }
0x100d   :  { %3535 = vmatprep.subr.bf16.mxu0 %v3718_v14 }
0x1010   :  { %3536 = vmatpush3.bf16.msra.mxu0 %v3718_v14 }
0x1011   :  { %3537 = vmatprep.subr.bf16.mxu0 %v3719_v57 }
0x1014   :  { %3538 = vmatpush3.bf16.msra.mxu0 %v3719_v57 }
0x1015   :  { %3539 = vmatprep.subr.bf16.mxu0 %v3720_v0 }
0x1018   :  { %3540 = vmatpush3.bf16.msra.mxu0 %v3720_v0 }
0x1019   :  { %3541 = vmatprep.subr.bf16.mxu0 %v3721_v45 }
0x101c   :  { %3542 = vmatpush3.bf16.msra.mxu0 %v3721_v45 }
0x101d   :  { %3543 = vmatprep.subr.bf16.mxu0 %v3722_v13 }
0x1020   :  { %3544 = vmatpush3.bf16.msra.mxu0 %v3722_v13 }
0x1021   :  { %3545 = vmatprep.subr.bf16.mxu0 %v3723_v43 }
0x1024   :  { %3546 = vmatpush3.bf16.msra.mxu0 %v3723_v43 }
0x1027   :  { %3548 = vmatmul.mubr.bf16.vlgmr.msra.gmra.mrb[96].mxu0 %v3227_v11 }
0x1028   :  { %3551 = vmatprep.mubr.bf16.mxu0 %v3228_v38 }
0x10da   :  { %v3156_v10 = vpop.f32.mrb[92].mxu0  ;;  %v3197_v53 = vpop.f32.mrb[124].mxu1 }
0x10db   :  { %v3157_v49 = vadd.f32 %v3156_v10, %v6836_v29  ;;  %v3198_v48 = vadd.f32 %v3197_v53, %v6838_v17  ;;  %v3158_v33 = vpop.f32.mrb[93].mxu0  ;;  %v3199_v26 = vpop.f32.mrb[125].mxu1 }
0x10dc   :  { %v3159_v16 = vadd.f32 %v3158_v33, %v6840_v60  ;;  %v3200_v27 = vadd.f32 %v3199_v26, %v6842_v31  ;;  %v3160_v3 = vpop.f32.mrb[94].mxu0  ;;  %v3201_v55 = vpop.f32.mrb[126].mxu1 }
0x10dd   :  { %v3204_v36 = vadd.f32 %v3157_v49, %v4936_v8  ;;  %v3161_v9 = vpop.f32.mrb[95].mxu0  ;;  %v3202_v41 = vpop.f32.mrb[127].mxu1  ;;  %v3206_v17 = vadd.f32 %v3198_v48, %v4955_v25  ;;  %v3508_v25 = vld [vmem:[%s6935_s8] ss:$0 sm:$0xff] }
0x10de   :  { %v3205_v46 = vadd.f32 %v3159_v16, %v4940_v15  ;;  %v3207_v29 = vadd.f32 %v3200_v27, %v4949_v34 }
0x10df   :  { %v3208_v35 = vmul.f32 0.5, %v3204_v36  ;;  %v3210_v60 = vmul.f32 0.5, %v3206_v17 }
0x10e0   :  { %v3209_v22 = vmul.f32 0.5, %v3205_v46 }
0x10e1   :  { %3874 = vtanh.f32 %v3208_v35 }
0x10e2   :  { %3876 = vtanh.f32 %v3209_v22 }
0x10e3   :  { %3878 = vtanh.f32 %v3207_v29 }
0x10e4   :  { %3880 = vtanh.f32 %v3210_v60 }
0x10eb   :  { %v3875_v42 = vpop.eup %3874 }
0x10ec   :  { %v3214_v31 = vmul.f32 0.5, %v3875_v42  ;;  %v3877_v19 = vpop.eup %3876 }
0x10ed   :  { %v3215_v8 = vmul.f32 0.5, %v3877_v19  ;;  %v3879_v18 = vpop.eup %3878 }
0x10ee   :  { %v3217_v58 = vadd.f32 0.5, %v3214_v31  ;;  %v3881_v34 = vpop.eup %3880 }
0x10ef   :  { %v3218_v54 = vadd.f32 0.5, %v3215_v8  ;;  %v3216_v63 = vmul.f32 0.5, %v3881_v34 }
0x10f0   :  { %v3222_v51 = vmul.f32 %v3879_v18, %v3217_v58 }
0x10f1   :  { %v3221_v15 = vmul.f32 %v3218_v54, %v6758_v61  ;;  %v3219_v7 = vadd.f32 0.5, %v3216_v63 }
0x10f3   :  { %v3223_v12 = vadd.f32 %v3222_v51, %v3221_v15 }
0x10f5   :  { %3518 = vst [vmem:[%s6933_s11 + $0x8] sm:$0xff] %v3223_v12  ;;  %3882 = vtanh.f32 %v3223_v12 }
0x10fa   :  { %v3549_v40 = vpop.f32.mrb[96].mxu0 }
0x10fb   :  { %v3344_v52 = vadd.f32 %v3549_v40, %v3508_v25  ;;  %v3335_v62 = vpop.f32.mrb[97].mxu0 }
0x10fc   :  { %v3336_v23 = vadd.f32 %v3508_v25, %v3335_v62  ;;  %v3550_v50 = vpop.f32.mrb[98].mxu0 }
0x10fd   :  { %3368 = vst [vmem:[%s6936_s9 + $0x10] sm:$0xff] %v3344_v52  ;;  %v3347_v61 = vadd.f32 %v3550_v50, %v3508_v25  ;;  %v3338_v39 = vpop.f32.mrb[99].mxu0 }
0x10fe   :  { %3366 = vst [vmem:[%s6936_s9] sm:$0xff] %v3336_v23  ;;  %v3339_v1 = vadd.f32 %v3508_v25, %v3338_v39 }
0x10ff   :  { %3369 = vst [vmem:[%s6936_s9 + $0x18] sm:$0xff] %v3347_v61  ;;  %v3883_v24 = vpop.eup %3882 }
0x1100   :  { %3367 = vst [vmem:[%s6936_s9 + $0x8] sm:$0xff] %v3339_v1  ;;  %v3225_v21 = vmul.f32 %v3883_v24, %v3219_v7 }
0x1102   :  { %v3229_v2 = vpack.c.bf16 %v3225_v21, %v6761_v59  ;;  %3517 = vst [vmem:[%s6934_s10 + $0x8] sm:$0xff] %v3225_v21 }
0x1104   :  { %3552 = vmatmul.mubr.bf16.gmra.mrb[100].mxu0 %v3229_v2 }
0x11d7   :  { %v3553_v56 = vpop.f32.mrb[100].mxu0 }
0x11d8   :  { %v3360_v30 = vadd.f32 %v3553_v56, %v3508_v25  ;;  %v3351_v44 = vpop.f32.mrb[101].mxu0 }
0x11d9   :  { %v3352_v32 = vadd.f32 %v3508_v25, %v3351_v44  ;;  %v3554_v37 = vpop.f32.mrb[102].mxu0 }
0x11da   :  { %3372 = vst [vmem:[%s6936_s9 + $0x30] sm:$0xff] %v3360_v30  ;;  %v3363_v6 = vadd.f32 %v3554_v37, %v3508_v25  ;;  %v3354_v4 = vpop.f32.mrb[103].mxu0 }
0x11db   :  { %3370 = vst [vmem:[%s6936_s9 + $0x20] sm:$0xff] %v3352_v32  ;;  %v3355_v59 = vadd.f32 %v3508_v25, %v3354_v4 }
0x11dc   :  { %3373 = vst [vmem:[%s6936_s9 + $0x38] sm:$0xff] %v3363_v6 }
0x11dd   :  { %3371 = vst [vmem:[%s6936_s9 + $0x28] sm:$0xff] %v3355_v59 }

</bundles_post_ra>
